<compile_context>
chip_gen: v5e
topology: v5e:2x2
jax: 0.10.0
libtpu: 0.0.40
codegen_flags: <defaults>
</compile_context>

<pallas_src>
import numpy as np
import jax
import jax.numpy as jnp
from jax.experimental import pallas as pl
from jax.experimental.pallas import tpu as pltpu

LANE = 128


# ----------------------------- fused WaveBlock body -----------------------------

def _block_compute(x, T, first_w_ref, first_b_ref, wg_ref, bg_ref, wf_ref, bf_ref,
                   bn_scale_ref, bn_shift_ref):
    """Fused WaveBlock + trailing BatchNorm. x: (M, cin) bf16 where M = BB*T."""
    M = x.shape[0]
    BB = M // T
    C = wf_ref.shape[-1]
    L = wg_ref.shape[0]

    # first_conv (kernel_size=1, 'same') == (M, cin) @ (cin, C); bf16 operands, f32 accumulate.
    x = jnp.dot(x, first_w_ref[...], preferred_element_type=jnp.float32) + first_b_ref[...]
    res = x
    # Within-batch time index (zero-padding mask for the dilated taps).
    t_idx = jax.lax.broadcasted_iota(jnp.int32, (BB, T, C), 1).reshape(M, C)

    for li in range(L):                                  # static unroll over gated layers
        d = 2 ** li                                      # dilation (static)
        xb = x.astype(jnp.bfloat16)
        if d < T:
            # x[t-d] / x[t+d] with zero padding: XLU roll + iota mask (no (T,T) matmuls).
            # Rolling the flat (BB*T, C) slab is safe: any row that wraps across a batch
            # (or array) boundary is exactly a row the within-batch mask zeroes.
            xl = jnp.where(t_idx >= d, pltpu.roll(x, shift=d, axis=0), 0.0).astype(jnp.bfloat16)
            xr = jnp.where(t_idx < T - d, pltpu.roll(x, shift=M - d, axis=0), 0.0).astype(jnp.bfloat16)
        else:                                            # dilation exceeds sequence length
            xl = jnp.zeros_like(xb)
            xr = jnp.zeros_like(xb)

        # tanh + sigmoid dilated convs (3 taps each) fused into one (M,3C)@(3C,2C) matmul.
        xcat = jnp.concatenate([xl, xb, xr], axis=1)     # bf16 concat: half the copy traffic
        z = jnp.dot(xcat, wg_ref[li], preferred_element_type=jnp.float32) + bg_ref[li]
        # sigmoid(u) == 0.5*(1 + tanh(u/2)); the 1/2 on u is folded into wg/bg at pack time.
        gate = jnp.tanh(z[:, :C]) * (0.5 * (1.0 + jnp.tanh(z[:, C:])))
        new_x = jnp.dot(gate.astype(jnp.bfloat16), wf_ref[li],
                        preferred_element_type=jnp.float32) + bf_ref[li]
        res = res + new_x
        x = new_x

    # Trailing BatchNorm1d (eval mode) folded into a per-channel affine (f32).
    return res * bn_scale_ref[...] + bn_shift_ref[...]


# ----------------------------- pallas_call plumbing -----------------------------

def _rep_spec(a, single_buffer):
    """Full-array block replicated across the batch grid (grid-invariant weights)."""
    nd = a.ndim
    if single_buffer:
        # Constant index_map across the grid -> double buffering is pure VMEM waste.
        return pl.BlockSpec(a.shape, lambda b, _nd=nd: (0,) * _nd,
                            pipeline_mode=pl.Buffered(1))
    return pl.BlockSpec(a.shape, lambda b, _nd=nd: (0,) * _nd)


def _vmem_limit_bytes(weights, m_rows, c_pad):
    """Explicit scoped-VMEM budget: weights (x2 buffering headroom) + live acts + I/O blocks."""
    wbytes = sum(int(np.prod(w.shape)) * w.dtype.itemsize for w in weights)
    act = 16 * m_rows * c_pad * 4            # rough bound on live per-layer f32 intermediates
    io = 4 * m_rows * c_pad * 2              # double-buffered bf16 in/out activation blocks
    est = 2 * wbytes + act + io + (2 << 20)
    return int(min(max(est, 16 << 20), 64 << 20))   # cap at v7x per-core physical VMEM


def _run_block(kernel, x, weights, out_shape, x_spec, out_spec, grid, vmem_bytes):
    def build(single_buffer):
        return pl.pallas_call(
            kernel,
            out_shape=out_shape,
            grid=grid,
            in_specs=[x_spec] + [_rep_spec(w, single_buffer) for w in weights],
            out_specs=out_spec,
            compiler_params=pltpu.CompilerParams(
                dimension_semantics=("parallel",),
                vmem_limit_bytes=vmem_bytes),
        )
    try:
        out = build(True)(x, *weights)
        return jax.block_until_ready(out)     # surface any failure inside the try
    except Exception:
        # Fallback: this JAX build rejects single-buffered (pl.Buffered(1)) weight specs.
        return build(False)(x, *weights)


def wave_block(x, blk, bb):
    Bfull, T, cin = x.shape
    C = blk["wf"].shape[-1]
    weights = (blk["first_w"], blk["first_b"], blk["wg"], blk["bg"],
               blk["wf"], blk["bf"], blk["bn_scale"], blk["bn_shift"])

    def kernel(x_ref, fw, fb, wg, bg, wf, bf, bns, bnb, o_ref):
        xin = x_ref[...].reshape(bb * T, cin).astype(jnp.bfloat16)
        out = _block_compute(xin, T, fw, fb, wg, bg, wf, bf, bns, bnb)
        o_ref[...] = out.reshape(bb, T, C).astype(o_ref.dtype)

    return _run_block(
        kernel, x, weights,
        out_shape=jax.ShapeDtypeStruct((Bfull, T, C), jnp.bfloat16),   # bf16 inter-block handoff
        x_spec=pl.BlockSpec((bb, T, cin), lambda b: (b, 0, 0)),
        out_spec=pl.BlockSpec((bb, T, C), lambda b: (b, 0, 0)),
        grid=(Bfull // bb,),
        vmem_bytes=_vmem_limit_bytes(weights, bb * T, C),
    )


def wave_block_head(x, blk, cls_w, cls_b, bb):
    Bfull, T, cin = x.shape
    C = blk["wf"].shape[-1]
    ncls_p = cls_w.shape[-1]
    weights = (blk["first_w"], blk["first_b"], blk["wg"], blk["bg"],
               blk["wf"], blk["bf"], blk["bn_scale"], blk["bn_shift"], cls_w, cls_b)

    def kernel(x_ref, fw, fb, wg, bg, wf, bf, bns, bnb, cw, cb, o_ref):
        xin = x_ref[...].reshape(bb * T, cin).astype(jnp.bfloat16)
        act = _block_compute(xin, T, fw, fb, wg, bg, wf, bf, bns, bnb)
        act = jnp.maximum(act, 0.0)                                   # final_act (ReLU)
        pooled = jnp.mean(act.reshape(bb, T, C), axis=1)              # AdaptiveAvgPool1d(1)
        y = jnp.dot(pooled.astype(jnp.bfloat16), cw[...],             # classifier Linear
                    preferred_element_type=jnp.float32) + cb[...]
        o_ref[0] = y.astype(o_ref.dtype)

    out = _run_block(
        kernel, x, weights,
        out_shape=jax.ShapeDtypeStruct((Bfull // bb, bb, ncls_p), jnp.float32),
        x_spec=pl.BlockSpec((bb, T, cin), lambda b: (b, 0, 0)),
        out_spec=pl.BlockSpec((1, bb, ncls_p), lambda b: (b, 0, 0)),
        grid=(Bfull // bb,),
        vmem_bytes=_vmem_limit_bytes(weights, bb * T, C),
    )
    return out.reshape(Bfull, ncls_p)


# ----------------------------- model wrapper -----------------------------

def _choose_batch_pack(B, T):
    """Fold BB batch elements into the matmul M dim when T alone under-fills the MXU rows."""
    if T % 8 != 0:
        return 1        # the (BB,T,C)->(BB*T,C) reshape is only layout-free when T % 8 == 0
    bb = 1
    for cand in range(1, B + 1):
        if B % cand != 0 or cand * T > 1024:
            continue
        bb = cand
        if cand * T >= 256:   # 256-row MXU on v6e/v7x
            break
    return bb


def wavenet1d_forward(x_ncw, kparams):
    """x_ncw: (B, C_in, T) like PyTorch NCW; returns (B, num_classes)."""
    x = jnp.transpose(x_ncw, (0, 2, 1)).astype(jnp.float32)   # (B, T, C_in); NO lane padding in HBM
    B, T, _ = x.shape
    bb = _choose_batch_pack(B, T)
    for blk in kparams["blocks"][:-1]:
        x = wave_block(x, blk, bb)
    out = wave_block_head(x, kparams["blocks"][-1], kparams["cls_w"], kparams["cls_b"], bb)
    return out[:, : kparams["num_classes"]]


# ----------------------------- parameters -----------------------------

def init_params(key, in_channels, hidden_dims, wave_layers, kernel_size, num_classes):
    """Canonical (unpadded, f32) parameters, mirroring the PyTorch module layout."""
    assert kernel_size == 3
    params = {"blocks": [], "num_classes": num_classes}
    cin = in_channels
    for cout, nl in zip(hidden_dims, wave_layers):
        key, k0, k1 = jax.random.split(key, 3)
        blk = {
            "first_w": jax.random.normal(k0, (cin, cout), jnp.float32) / np.sqrt(cin),
            "first_b": 0.01 * jax.random.normal(k1, (1, cout), jnp.float32),
            "layers": [],
        }
        for _ in range(nl):
            key, a, b, c, e, f, g = jax.random.split(key, 7)
            s = 1.0 / np.sqrt(3 * cout)
            blk["layers"].append({
                "wt": s * jax.random.normal(a, (3, cout, cout), jnp.float32),
                "bt": 0.01 * jax.random.normal(b, (1, cout), jnp.float32),
                "ws": s * jax.random.normal(c, (3, cout, cout), jnp.float32),
                "bs": 0.01 * jax.random.normal(e, (1, cout), jnp.float32),
                "wf": jax.random.normal(f, (cout, cout), jnp.float32) / np.sqrt(cout),
                "bf": 0.01 * jax.random.normal(g, (1, cout), jnp.float32),
            })
        key, kg, kb, km, kv = jax.random.split(key, 5)
        gamma = 1.0 + 0.1 * jax.random.normal(kg, (cout,), jnp.float32)
        beta = 0.1 * jax.random.normal(kb, (cout,), jnp.float32)
        rmean = 0.1 * jax.random.normal(km, (cout,), jnp.float32)
        rvar = 1.0 + 0.1 * jnp.abs(jax.random.normal(kv, (cout,), jnp.float32))
        scale = gamma / jnp.sqrt(rvar + 1e-5)
        blk["bn_scale"] = scale.reshape(1, cout)
        blk["bn_shift"] = (beta - rmean * scale).reshape(1, cout)
        params["blocks"].append(blk)
        cin = cout
    key, kw, kb2 = jax.random.split(key, 3)
    params["cls_w"] = jax.random.normal(kw, (cin, num_classes), jnp.float32) / np.sqrt(cin)
    params["cls_b"] = 0.01 * jax.random.normal(kb2, (1, num_classes), jnp.float32)
    return params


def _rup(n, m=LANE):
    return ((n + m - 1) // m) * m


def _pad2(a, rows, cols):
    return jnp.pad(a, ((0, rows - a.shape[0]), (0, cols - a.shape[1])))


def pack_params(params):
    """Pad channels to multiples of 128 lanes (padded channels provably stay zero), fuse the
    tanh/sigmoid dilated-conv weights into one (3C, 2C) matrix per layer (sigmoid half pre-
    scaled by 1/2 for the tanh-based sigmoid), stack per-layer weights, and store matmul
    operands in bf16 (biases / BN affines stay f32)."""
    kp = {"blocks": [], "num_classes": params["num_classes"]}
    for bi, blk in enumerate(params["blocks"]):
        cin, cout = blk["first_w"].shape
        # Block 0 consumes the raw (unpadded) input channels straight from HBM;
        # later blocks consume the previous block's lane-padded activations.
        cin_p = cin if bi == 0 else _rup(cin)
        cout_p = _rup(cout)
        wg, bg, wf, bf = [], [], [], []
        for layer in blk["layers"]:
            taps_t = jnp.concatenate([_pad2(layer["wt"][k], cout_p, cout_p) for k in range(3)], axis=0)
            taps_s = jnp.concatenate([_pad2(0.5 * layer["ws"][k], cout_p, cout_p) for k in range(3)], axis=0)
            wg.append(jnp.concatenate([taps_t, taps_s], axis=1))          # (3C, 2C)
            bg.append(jnp.concatenate([_pad2(layer["bt"], 1, cout_p),
                                       _pad2(0.5 * layer["bs"], 1, cout_p)], axis=1))
            wf.append(_pad2(layer["wf"], cout_p, cout_p))
            bf.append(_pad2(layer["bf"], 1, cout_p))
        kp["blocks"].append({
            "first_w": _pad2(blk["first_w"], cin_p, cout_p).astype(jnp.bfloat16),
            "first_b": _pad2(blk["first_b"], 1, cout_p),
            "wg": jnp.stack(wg).astype(jnp.bfloat16),                     # (L, 3C, 2C)
            "bg": jnp.stack(bg),                                          # (L, 1, 2C)
            "wf": jnp.stack(wf).astype(jnp.bfloat16),                     # (L, C, C)
            "bf": jnp.stack(bf),                                          # (L, 1, C)
            "bn_scale": _pad2(blk["bn_scale"], 1, cout_p),
            "bn_shift": _pad2(blk["bn_shift"], 1, cout_p),
        })
    clast, ncls = params["cls_w"].shape
    kp["cls_w"] = _pad2(params["cls_w"], _rup(clast), _rup(ncls)).astype(jnp.bfloat16)
    kp["cls_b"] = _pad2(params["cls_b"], 1, _rup(ncls))
    return kp


# ----------------------------- pure-JAX reference -----------------------------

def ref_forward(x_ncw, params):
    """Reference with the same matmul precision as the kernels (bf16 operands, f32 accumulate)."""
    def bdot(a, w):
        return jnp.dot(a.astype(jnp.bfloat16), w.astype(jnp.bfloat16),
                       preferred_element_type=jnp.float32)

    x = jnp.transpose(x_ncw, (0, 2, 1))
    for blk in params["blocks"]:
        x = bdot(x, blk["first_w"]) + blk["first_b"]
        res = x
        for li, layer in enumerate(blk["layers"]):
            d = 2 ** li
            _, T, _ = x.shape
            padded = jnp.pad(x, ((0, 0), (d, d), (0, 0)))
            xl, xc, xr = padded[:, 0:T], padded[:, d:d + T], padded[:, 2 * d:2 * d + T]

            def dconv(w, b):
                return bdot(xl, w[0]) + bdot(xc, w[1]) + bdot(xr, w[2]) + b

            gate = jnp.tanh(dconv(layer["wt"], layer["bt"])) * \
                   jax.nn.sigmoid(dconv(layer["ws"], layer["bs"]))
            new_x = bdot(gate, layer["wf"]) + layer["bf"]
            res = res + new_x
            x = new_x
        x = res * blk["bn_scale"] + blk["bn_shift"]
    x = jnp.maximum(x, 0.0)
    pooled = jnp.mean(x, axis=1)
    return bdot(pooled, params["cls_w"]) + params["cls_b"]


# ----------------------------- main -----------------------------

if __name__ == "__main__":
    B, T = 2, 16
    in_channels = 3
    hidden_dims = (16, 32)     # small, structure-preserving config
    wave_layers = (3, 2)
    kernel_size = 3
    num_classes = 1

    key = jax.random.PRNGKey(0)
    key, xk = jax.random.split(key)
    x = jax.random.normal(xk, (B, in_channels, T), jnp.float32)   # NCW, like PyTorch

    params = init_params(key, in_channels, hidden_dims, wave_layers, kernel_size, num_classes)
    kparams = pack_params(params)

    out = wavenet1d_forward(x, kparams)
    out = jax.block_until_ready(out)

    ref = ref_forward(x, params)
    np.testing.assert_allclose(np.asarray(out), np.asarray(ref), rtol=2e-3, atol=2e-3)
    assert out.shape == (B, num_classes)
    print("KERNEL_OK")
</pallas_src>

<mosaic_0001>
module attributes {stable_mosaic.version = 11 : i64} {
  func.func @kernel(%arg0: i32, %arg1: memref<2x16x3xf32, #tpu.memory_space<vmem>>, %arg2: memref<3x128xbf16, #tpu.memory_space<vmem>>, %arg3: memref<1x128xf32, #tpu.memory_space<vmem>>, %arg4: memref<3x384x256xbf16, #tpu.memory_space<vmem>>, %arg5: memref<3x1x256xf32, #tpu.memory_space<vmem>>, %arg6: memref<3x128x128xbf16, #tpu.memory_space<vmem>>, %arg7: memref<3x1x128xf32, #tpu.memory_space<vmem>>, %arg8: memref<1x128xf32, #tpu.memory_space<vmem>>, %arg9: memref<1x128xf32, #tpu.memory_space<vmem>>, %arg10: memref<2x16x128xbf16, #tpu.memory_space<vmem>>) attributes {dimension_semantics = [#tpu.dimension_semantics<parallel>], iteration_bounds = array<i64: 1>, scalar_prefetch = 0 : i64, scratch_operands = 0 : i64, tpu.core_type = #tpu.core_type<tc>, window_params = [{transform_indices = @transform_0, window_bounds = array<i64: 2, 16, 3>}, {pipeline_mode = #tpu.pipeline_mode<synchronous>, transform_indices = @transform_1, window_bounds = array<i64: 3, 128>}, {pipeline_mode = #tpu.pipeline_mode<synchronous>, transform_indices = @transform_2, window_bounds = array<i64: 1, 128>}, {pipeline_mode = #tpu.pipeline_mode<synchronous>, transform_indices = @transform_3, window_bounds = array<i64: 3, 384, 256>}, {pipeline_mode = #tpu.pipeline_mode<synchronous>, transform_indices = @transform_4, window_bounds = array<i64: 3, 1, 256>}, {pipeline_mode = #tpu.pipeline_mode<synchronous>, transform_indices = @transform_5, window_bounds = array<i64: 3, 128, 128>}, {pipeline_mode = #tpu.pipeline_mode<synchronous>, transform_indices = @transform_6, window_bounds = array<i64: 3, 1, 128>}, {pipeline_mode = #tpu.pipeline_mode<synchronous>, transform_indices = @transform_7, window_bounds = array<i64: 1, 128>}, {pipeline_mode = #tpu.pipeline_mode<synchronous>, transform_indices = @transform_8, window_bounds = array<i64: 1, 128>}, {transform_indices = @transform_9, window_bounds = array<i64: 2, 16, 128>}]} {
    %c0 = arith.constant 0 : index
    %c0_0 = arith.constant 0 : index
    %c0_1 = arith.constant 0 : index
    %0 = vector.load %arg1[%c0, %c0_0, %c0_1] : memref<2x16x3xf32, #tpu.memory_space<vmem>>, vector<2x16x3xf32>
    %1 = vector.shape_cast %0 : vector<2x16x3xf32> to vector<32x3xf32>
    %2 = arith.truncf %1 : vector<32x3xf32> to vector<32x3xbf16>
    %c0_2 = arith.constant 0 : index
    %c0_3 = arith.constant 0 : index
    %3 = vector.load %arg2[%c0_2, %c0_3] : memref<3x128xbf16, #tpu.memory_space<vmem>>, vector<3x128xbf16>
    %cst = arith.constant dense<0.000000e+00> : vector<32x128xf32>
    %4 = tpu.matmul %2, %3, %cst {dimension_numbers = #tpu.dot_dimension_numbers<[1], [0], [0], [1], [0, 0, 1, 1], [], []>} : vector<32x3xbf16>, vector<3x128xbf16>, vector<32x128xf32> -> vector<32x128xf32>
    %c0_4 = arith.constant 0 : index
    %c0_5 = arith.constant 0 : index
    %5 = vector.load %arg3[%c0_4, %c0_5] : memref<1x128xf32, #tpu.memory_space<vmem>>, vector<1x128xf32>
    %6 = vector.broadcast %5 : vector<1x128xf32> to vector<32x128xf32>
    %7 = arith.addf %4, %6 : vector<32x128xf32>
    %8 = tpu.iota {dimensions = array<i32: 1>} : vector<2x16x128xi32>
    %9 = vector.shape_cast %8 : vector<2x16x128xi32> to vector<32x128xi32>
    %10 = arith.truncf %7 : vector<32x128xf32> to vector<32x128xbf16>
    %c1_i32 = arith.constant 1 : i32
    %11 = vector.broadcast %c1_i32 : i32 to vector<32x128xi32>
    %12 = arith.cmpi sge, %9, %11 : vector<32x128xi32>
    %c1_i32_6 = arith.constant 1 : i32
    %13 = tpu.dynamic_rotate %7 by %c1_i32_6 dim 0 : vector<32x128xf32>, i32 -> vector<32x128xf32>
    %cst_7 = arith.constant 0.000000e+00 : f32
    %14 = vector.broadcast %cst_7 : f32 to vector<32x128xf32>
    %15 = arith.select %12, %13, %14 : vector<32x128xi1>, vector<32x128xf32>
    %16 = arith.truncf %15 : vector<32x128xf32> to vector<32x128xbf16>
    %c15_i32 = arith.constant 15 : i32
    %17 = vector.broadcast %c15_i32 : i32 to vector<32x128xi32>
    %18 = arith.cmpi slt, %9, %17 : vector<32x128xi32>
    %c31_i32 = arith.constant 31 : i32
    %19 = tpu.dynamic_rotate %7 by %c31_i32 dim 0 : vector<32x128xf32>, i32 -> vector<32x128xf32>
    %cst_8 = arith.constant 0.000000e+00 : f32
    %20 = vector.broadcast %cst_8 : f32 to vector<32x128xf32>
    %21 = arith.select %18, %19, %20 : vector<32x128xi1>, vector<32x128xf32>
    %22 = arith.truncf %21 : vector<32x128xf32> to vector<32x128xbf16>
    %23 = tpu.concatenate %16, %10, %22 in 1 : vector<32x128xbf16>, vector<32x128xbf16>, vector<32x128xbf16> -> vector<32x384xbf16>
    %c0_9 = arith.constant 0 : index
    %c0_10 = arith.constant 0 : index
    %c0_11 = arith.constant 0 : index
    %24 = vector.load %arg4[%c0_9, %c0_10, %c0_11] : memref<3x384x256xbf16, #tpu.memory_space<vmem>>, vector<1x384x256xbf16>
    %25 = vector.shape_cast %24 : vector<1x384x256xbf16> to vector<384x256xbf16>
    %cst_12 = arith.constant dense<0.000000e+00> : vector<32x256xf32>
    %26 = tpu.matmul %23, %25, %cst_12 {dimension_numbers = #tpu.dot_dimension_numbers<[1], [0], [0], [1], [0, 0, 1, 1], [], []>} : vector<32x384xbf16>, vector<384x256xbf16>, vector<32x256xf32> -> vector<32x256xf32>
    %c0_13 = arith.constant 0 : index
    %c0_14 = arith.constant 0 : index
    %c0_15 = arith.constant 0 : index
    %27 = vector.load %arg5[%c0_13, %c0_14, %c0_15] : memref<3x1x256xf32, #tpu.memory_space<vmem>>, vector<1x1x256xf32>
    %28 = vector.shape_cast %27 : vector<1x1x256xf32> to vector<1x256xf32>
    %29 = vector.broadcast %28 : vector<1x256xf32> to vector<32x256xf32>
    %30 = arith.addf %26, %29 : vector<32x256xf32>
    %31 = vector.extract_strided_slice %30 {offsets = [0, 0], sizes = [32, 128], strides = [1, 1]} : vector<32x256xf32> to vector<32x128xf32>
    %32 = math.tanh %31 : vector<32x128xf32>
    %33 = vector.extract_strided_slice %30 {offsets = [0, 128], sizes = [32, 128], strides = [1, 1]} : vector<32x256xf32> to vector<32x128xf32>
    %34 = math.tanh %33 : vector<32x128xf32>
    %cst_16 = arith.constant 1.000000e+00 : f32
    %35 = vector.broadcast %cst_16 : f32 to vector<32x128xf32>
    %36 = arith.addf %35, %34 : vector<32x128xf32>
    %cst_17 = arith.constant 5.000000e-01 : f32
    %37 = vector.broadcast %cst_17 : f32 to vector<32x128xf32>
    %38 = arith.mulf %37, %36 : vector<32x128xf32>
    %39 = arith.mulf %32, %38 : vector<32x128xf32>
    %40 = arith.truncf %39 : vector<32x128xf32> to vector<32x128xbf16>
    %c0_18 = arith.constant 0 : index
    %c0_19 = arith.constant 0 : index
    %c0_20 = arith.constant 0 : index
    %41 = vector.load %arg6[%c0_18, %c0_19, %c0_20] : memref<3x128x128xbf16, #tpu.memory_space<vmem>>, vector<1x128x128xbf16>
    %42 = vector.shape_cast %41 : vector<1x128x128xbf16> to vector<128x128xbf16>
    %cst_21 = arith.constant dense<0.000000e+00> : vector<32x128xf32>
    %43 = tpu.matmul %40, %42, %cst_21 {dimension_numbers = #tpu.dot_dimension_numbers<[1], [0], [0], [1], [0, 0, 1, 1], [], []>} : vector<32x128xbf16>, vector<128x128xbf16>, vector<32x128xf32> -> vector<32x128xf32>
    %c0_22 = arith.constant 0 : index
    %c0_23 = arith.constant 0 : index
    %c0_24 = arith.constant 0 : index
    %44 = vector.load %arg7[%c0_22, %c0_23, %c0_24] : memref<3x1x128xf32, #tpu.memory_space<vmem>>, vector<1x1x128xf32>
    %45 = vector.shape_cast %44 : vector<1x1x128xf32> to vector<1x128xf32>
    %46 = vector.broadcast %45 : vector<1x128xf32> to vector<32x128xf32>
    %47 = arith.addf %43, %46 : vector<32x128xf32>
    %48 = arith.addf %7, %47 : vector<32x128xf32>
    %49 = arith.truncf %47 : vector<32x128xf32> to vector<32x128xbf16>
    %c2_i32 = arith.constant 2 : i32
    %50 = vector.broadcast %c2_i32 : i32 to vector<32x128xi32>
    %51 = arith.cmpi sge, %9, %50 : vector<32x128xi32>
    %c2_i32_25 = arith.constant 2 : i32
    %52 = tpu.dynamic_rotate %47 by %c2_i32_25 dim 0 : vector<32x128xf32>, i32 -> vector<32x128xf32>
    %cst_26 = arith.constant 0.000000e+00 : f32
    %53 = vector.broadcast %cst_26 : f32 to vector<32x128xf32>
    %54 = arith.select %51, %52, %53 : vector<32x128xi1>, vector<32x128xf32>
    %55 = arith.truncf %54 : vector<32x128xf32> to vector<32x128xbf16>
    %c14_i32 = arith.constant 14 : i32
    %56 = vector.broadcast %c14_i32 : i32 to vector<32x128xi32>
    %57 = arith.cmpi slt, %9, %56 : vector<32x128xi32>
    %c30_i32 = arith.constant 30 : i32
    %58 = tpu.dynamic_rotate %47 by %c30_i32 dim 0 : vector<32x128xf32>, i32 -> vector<32x128xf32>
    %cst_27 = arith.constant 0.000000e+00 : f32
    %59 = vector.broadcast %cst_27 : f32 to vector<32x128xf32>
    %60 = arith.select %57, %58, %59 : vector<32x128xi1>, vector<32x128xf32>
    %61 = arith.truncf %60 : vector<32x128xf32> to vector<32x128xbf16>
    %62 = tpu.concatenate %55, %49, %61 in 1 : vector<32x128xbf16>, vector<32x128xbf16>, vector<32x128xbf16> -> vector<32x384xbf16>
    %c1 = arith.constant 1 : index
    %c0_28 = arith.constant 0 : index
    %c0_29 = arith.constant 0 : index
    %63 = vector.load %arg4[%c1, %c0_28, %c0_29] : memref<3x384x256xbf16, #tpu.memory_space<vmem>>, vector<1x384x256xbf16>
    %64 = vector.shape_cast %63 : vector<1x384x256xbf16> to vector<384x256xbf16>
    %cst_30 = arith.constant dense<0.000000e+00> : vector<32x256xf32>
    %65 = tpu.matmul %62, %64, %cst_30 {dimension_numbers = #tpu.dot_dimension_numbers<[1], [0], [0], [1], [0, 0, 1, 1], [], []>} : vector<32x384xbf16>, vector<384x256xbf16>, vector<32x256xf32> -> vector<32x256xf32>
    %c1_31 = arith.constant 1 : index
    %c0_32 = arith.constant 0 : index
    %c0_33 = arith.constant 0 : index
    %66 = vector.load %arg5[%c1_31, %c0_32, %c0_33] : memref<3x1x256xf32, #tpu.memory_space<vmem>>, vector<1x1x256xf32>
    %67 = vector.shape_cast %66 : vector<1x1x256xf32> to vector<1x256xf32>
    %68 = vector.broadcast %67 : vector<1x256xf32> to vector<32x256xf32>
    %69 = arith.addf %65, %68 : vector<32x256xf32>
    %70 = vector.extract_strided_slice %69 {offsets = [0, 0], sizes = [32, 128], strides = [1, 1]} : vector<32x256xf32> to vector<32x128xf32>
    %71 = math.tanh %70 : vector<32x128xf32>
    %72 = vector.extract_strided_slice %69 {offsets = [0, 128], sizes = [32, 128], strides = [1, 1]} : vector<32x256xf32> to vector<32x128xf32>
    %73 = math.tanh %72 : vector<32x128xf32>
    %cst_34 = arith.constant 1.000000e+00 : f32
    %74 = vector.broadcast %cst_34 : f32 to vector<32x128xf32>
    %75 = arith.addf %74, %73 : vector<32x128xf32>
    %cst_35 = arith.constant 5.000000e-01 : f32
    %76 = vector.broadcast %cst_35 : f32 to vector<32x128xf32>
    %77 = arith.mulf %76, %75 : vector<32x128xf32>
    %78 = arith.mulf %71, %77 : vector<32x128xf32>
    %79 = arith.truncf %78 : vector<32x128xf32> to vector<32x128xbf16>
    %c1_36 = arith.constant 1 : index
    %c0_37 = arith.constant 0 : index
    %c0_38 = arith.constant 0 : index
    %80 = vector.load %arg6[%c1_36, %c0_37, %c0_38] : memref<3x128x128xbf16, #tpu.memory_space<vmem>>, vector<1x128x128xbf16>
    %81 = vector.shape_cast %80 : vector<1x128x128xbf16> to vector<128x128xbf16>
    %cst_39 = arith.constant dense<0.000000e+00> : vector<32x128xf32>
    %82 = tpu.matmul %79, %81, %cst_39 {dimension_numbers = #tpu.dot_dimension_numbers<[1], [0], [0], [1], [0, 0, 1, 1], [], []>} : vector<32x128xbf16>, vector<128x128xbf16>, vector<32x128xf32> -> vector<32x128xf32>
    %c1_40 = arith.constant 1 : index
    %c0_41 = arith.constant 0 : index
    %c0_42 = arith.constant 0 : index
    %83 = vector.load %arg7[%c1_40, %c0_41, %c0_42] : memref<3x1x128xf32, #tpu.memory_space<vmem>>, vector<1x1x128xf32>
    %84 = vector.shape_cast %83 : vector<1x1x128xf32> to vector<1x128xf32>
    %85 = vector.broadcast %84 : vector<1x128xf32> to vector<32x128xf32>
    %86 = arith.addf %82, %85 : vector<32x128xf32>
    %87 = arith.addf %48, %86 : vector<32x128xf32>
    %88 = arith.truncf %86 : vector<32x128xf32> to vector<32x128xbf16>
    %c4_i32 = arith.constant 4 : i32
    %89 = vector.broadcast %c4_i32 : i32 to vector<32x128xi32>
    %90 = arith.cmpi sge, %9, %89 : vector<32x128xi32>
    %c4_i32_43 = arith.constant 4 : i32
    %91 = tpu.dynamic_rotate %86 by %c4_i32_43 dim 0 : vector<32x128xf32>, i32 -> vector<32x128xf32>
    %cst_44 = arith.constant 0.000000e+00 : f32
    %92 = vector.broadcast %cst_44 : f32 to vector<32x128xf32>
    %93 = arith.select %90, %91, %92 : vector<32x128xi1>, vector<32x128xf32>
    %94 = arith.truncf %93 : vector<32x128xf32> to vector<32x128xbf16>
    %c12_i32 = arith.constant 12 : i32
    %95 = vector.broadcast %c12_i32 : i32 to vector<32x128xi32>
    %96 = arith.cmpi slt, %9, %95 : vector<32x128xi32>
    %c28_i32 = arith.constant 28 : i32
    %97 = tpu.dynamic_rotate %86 by %c28_i32 dim 0 : vector<32x128xf32>, i32 -> vector<32x128xf32>
    %cst_45 = arith.constant 0.000000e+00 : f32
    %98 = vector.broadcast %cst_45 : f32 to vector<32x128xf32>
    %99 = arith.select %96, %97, %98 : vector<32x128xi1>, vector<32x128xf32>
    %100 = arith.truncf %99 : vector<32x128xf32> to vector<32x128xbf16>
    %101 = tpu.concatenate %94, %88, %100 in 1 : vector<32x128xbf16>, vector<32x128xbf16>, vector<32x128xbf16> -> vector<32x384xbf16>
    %c2 = arith.constant 2 : index
    %c0_46 = arith.constant 0 : index
    %c0_47 = arith.constant 0 : index
    %102 = vector.load %arg4[%c2, %c0_46, %c0_47] : memref<3x384x256xbf16, #tpu.memory_space<vmem>>, vector<1x384x256xbf16>
    %103 = vector.shape_cast %102 : vector<1x384x256xbf16> to vector<384x256xbf16>
    %cst_48 = arith.constant dense<0.000000e+00> : vector<32x256xf32>
    %104 = tpu.matmul %101, %103, %cst_48 {dimension_numbers = #tpu.dot_dimension_numbers<[1], [0], [0], [1], [0, 0, 1, 1], [], []>} : vector<32x384xbf16>, vector<384x256xbf16>, vector<32x256xf32> -> vector<32x256xf32>
    %c2_49 = arith.constant 2 : index
    %c0_50 = arith.constant 0 : index
    %c0_51 = arith.constant 0 : index
    %105 = vector.load %arg5[%c2_49, %c0_50, %c0_51] : memref<3x1x256xf32, #tpu.memory_space<vmem>>, vector<1x1x256xf32>
    %106 = vector.shape_cast %105 : vector<1x1x256xf32> to vector<1x256xf32>
    %107 = vector.broadcast %106 : vector<1x256xf32> to vector<32x256xf32>
    %108 = arith.addf %104, %107 : vector<32x256xf32>
    %109 = vector.extract_strided_slice %108 {offsets = [0, 0], sizes = [32, 128], strides = [1, 1]} : vector<32x256xf32> to vector<32x128xf32>
    %110 = math.tanh %109 : vector<32x128xf32>
    %111 = vector.extract_strided_slice %108 {offsets = [0, 128], sizes = [32, 128], strides = [1, 1]} : vector<32x256xf32> to vector<32x128xf32>
    %112 = math.tanh %111 : vector<32x128xf32>
    %cst_52 = arith.constant 1.000000e+00 : f32
    %113 = vector.broadcast %cst_52 : f32 to vector<32x128xf32>
    %114 = arith.addf %113, %112 : vector<32x128xf32>
    %cst_53 = arith.constant 5.000000e-01 : f32
    %115 = vector.broadcast %cst_53 : f32 to vector<32x128xf32>
    %116 = arith.mulf %115, %114 : vector<32x128xf32>
    %117 = arith.mulf %110, %116 : vector<32x128xf32>
    %118 = arith.truncf %117 : vector<32x128xf32> to vector<32x128xbf16>
    %c2_54 = arith.constant 2 : index
    %c0_55 = arith.constant 0 : index
    %c0_56 = arith.constant 0 : index
    %119 = vector.load %arg6[%c2_54, %c0_55, %c0_56] : memref<3x128x128xbf16, #tpu.memory_space<vmem>>, vector<1x128x128xbf16>
    %120 = vector.shape_cast %119 : vector<1x128x128xbf16> to vector<128x128xbf16>
    %cst_57 = arith.constant dense<0.000000e+00> : vector<32x128xf32>
    %121 = tpu.matmul %118, %120, %cst_57 {dimension_numbers = #tpu.dot_dimension_numbers<[1], [0], [0], [1], [0, 0, 1, 1], [], []>} : vector<32x128xbf16>, vector<128x128xbf16>, vector<32x128xf32> -> vector<32x128xf32>
    %c2_58 = arith.constant 2 : index
    %c0_59 = arith.constant 0 : index
    %c0_60 = arith.constant 0 : index
    %122 = vector.load %arg7[%c2_58, %c0_59, %c0_60] : memref<3x1x128xf32, #tpu.memory_space<vmem>>, vector<1x1x128xf32>
    %123 = vector.shape_cast %122 : vector<1x1x128xf32> to vector<1x128xf32>
    %124 = vector.broadcast %123 : vector<1x128xf32> to vector<32x128xf32>
    %125 = arith.addf %121, %124 : vector<32x128xf32>
    %126 = arith.addf %87, %125 : vector<32x128xf32>
    %c0_61 = arith.constant 0 : index
    %c0_62 = arith.constant 0 : index
    %127 = vector.load %arg8[%c0_61, %c0_62] : memref<1x128xf32, #tpu.memory_space<vmem>>, vector<1x128xf32>
    %128 = vector.broadcast %127 : vector<1x128xf32> to vector<32x128xf32>
    %129 = arith.mulf %126, %128 : vector<32x128xf32>
    %c0_63 = arith.constant 0 : index
    %c0_64 = arith.constant 0 : index
    %130 = vector.load %arg9[%c0_63, %c0_64] : memref<1x128xf32, #tpu.memory_space<vmem>>, vector<1x128xf32>
    %131 = vector.broadcast %130 : vector<1x128xf32> to vector<32x128xf32>
    %132 = arith.addf %129, %131 : vector<32x128xf32>
    %133 = vector.shape_cast %132 : vector<32x128xf32> to vector<2x16x128xf32>
    %134 = arith.truncf %133 : vector<2x16x128xf32> to vector<2x16x128xbf16>
    %c0_65 = arith.constant 0 : index
    %c0_66 = arith.constant 0 : index
    %c0_67 = arith.constant 0 : index
    %135 = vector.load %arg10[%c0_65, %c0_66, %c0_67] : memref<2x16x128xbf16, #tpu.memory_space<vmem>>, vector<2x16x128xbf16>
    tpu.vector_store %arg10[%c0_65, %c0_66, %c0_67], %134 {strides = array<i32>} : memref<2x16x128xbf16, #tpu.memory_space<vmem>>, vector<2x16x128xbf16>,
    return
  }
  func.func @transform_0(%arg0: i32) -> (i32, i32, i32) {
    %c0_i32 = arith.constant 0 : i32
    %c0_i32_0 = arith.constant 0 : i32
    %c0_i32_1 = arith.constant 0 : i32
    return %arg0, %c0_i32, %c0_i32_0 : i32, i32, i32
  }
  func.func @transform_1(%arg0: i32) -> (i32, i32) {
    %c0_i32 = arith.constant 0 : i32
    %c0_i32_0 = arith.constant 0 : i32
    %c0_i32_1 = arith.constant 0 : i32
    return %c0_i32, %c0_i32_0 : i32, i32
  }
  func.func @transform_2(%arg0: i32) -> (i32, i32) {
    %c0_i32 = arith.constant 0 : i32
    %c0_i32_0 = arith.constant 0 : i32
    %c0_i32_1 = arith.constant 0 : i32
    return %c0_i32, %c0_i32_0 : i32, i32
  }
  func.func @transform_3(%arg0: i32) -> (i32, i32, i32) {
    %c0_i32 = arith.constant 0 : i32
    %c0_i32_0 = arith.constant 0 : i32
    %c0_i32_1 = arith.constant 0 : i32
    %c0_i32_2 = arith.constant 0 : i32
    return %c0_i32, %c0_i32_0, %c0_i32_1 : i32, i32, i32
  }
  func.func @transform_4(%arg0: i32) -> (i32, i32, i32) {
    %c0_i32 = arith.constant 0 : i32
    %c0_i32_0 = arith.constant 0 : i32
    %c0_i32_1 = arith.constant 0 : i32
    %c0_i32_2 = arith.constant 0 : i32
    return %c0_i32, %c0_i32_0, %c0_i32_1 : i32, i32, i32
  }
  func.func @transform_5(%arg0: i32) -> (i32, i32, i32) {
    %c0_i32 = arith.constant 0 : i32
    %c0_i32_0 = arith.constant 0 : i32
    %c0_i32_1 = arith.constant 0 : i32
    %c0_i32_2 = arith.constant 0 : i32
    return %c0_i32, %c0_i32_0, %c0_i32_1 : i32, i32, i32
  }
  func.func @transform_6(%arg0: i32) -> (i32, i32, i32) {
    %c0_i32 = arith.constant 0 : i32
    %c0_i32_0 = arith.constant 0 : i32
    %c0_i32_1 = arith.constant 0 : i32
    %c0_i32_2 = arith.constant 0 : i32
    return %c0_i32, %c0_i32_0, %c0_i32_1 : i32, i32, i32
  }
  func.func @transform_7(%arg0: i32) -> (i32, i32) {
    %c0_i32 = arith.constant 0 : i32
    %c0_i32_0 = arith.constant 0 : i32
    %c0_i32_1 = arith.constant 0 : i32
    return %c0_i32, %c0_i32_0 : i32, i32
  }
  func.func @transform_8(%arg0: i32) -> (i32, i32) {
    %c0_i32 = arith.constant 0 : i32
    %c0_i32_0 = arith.constant 0 : i32
    %c0_i32_1 = arith.constant 0 : i32
    return %c0_i32, %c0_i32_0 : i32, i32
  }
  func.func @transform_9(%arg0: i32) -> (i32, i32, i32) {
    %c0_i32 = arith.constant 0 : i32
    %c0_i32_0 = arith.constant 0 : i32
    %c0_i32_1 = arith.constant 0 : i32
    return %arg0, %c0_i32, %c0_i32_0 : i32, i32, i32
  }
}

module attributes {stable_mosaic.version = 11 : i64} {
  func.func @kernel(%arg0: i32, %arg1: memref<2x16x3xf32, #tpu.memory_space<vmem>>, %arg2: memref<3x128xbf16, #tpu.memory_space<vmem>>, %arg3: memref<1x128xf32, #tpu.memory_space<vmem>>, %arg4: memref<3x384x256xbf16, #tpu.memory_space<vmem>>, %arg5: memref<3x1x256xf32, #tpu.memory_space<vmem>>, %arg6: memref<3x128x128xbf16, #tpu.memory_space<vmem>>, %arg7: memref<3x1x128xf32, #tpu.memory_space<vmem>>, %arg8: memref<1x128xf32, #tpu.memory_space<vmem>>, %arg9: memref<1x128xf32, #tpu.memory_space<vmem>>, %arg10: memref<2x16x128xbf16, #tpu.memory_space<vmem>>) attributes {dimension_semantics = [#tpu.dimension_semantics<parallel>], iteration_bounds = array<i64: 1>, scalar_prefetch = 0 : i64, scratch_operands = 0 : i64, tpu.core_type = #tpu.core_type<tc>, window_params = [{transform_indices = @transform_0, window_bounds = array<i64: 2, 16, 3>}, {pipeline_mode = #tpu.pipeline_mode<synchronous>, transform_indices = @transform_1, window_bounds = array<i64: 3, 128>}, {pipeline_mode = #tpu.pipeline_mode<synchronous>, transform_indices = @transform_2, window_bounds = array<i64: 1, 128>}, {pipeline_mode = #tpu.pipeline_mode<synchronous>, transform_indices = @transform_3, window_bounds = array<i64: 3, 384, 256>}, {pipeline_mode = #tpu.pipeline_mode<synchronous>, transform_indices = @transform_4, window_bounds = array<i64: 3, 1, 256>}, {pipeline_mode = #tpu.pipeline_mode<synchronous>, transform_indices = @transform_5, window_bounds = array<i64: 3, 128, 128>}, {pipeline_mode = #tpu.pipeline_mode<synchronous>, transform_indices = @transform_6, window_bounds = array<i64: 3, 1, 128>}, {pipeline_mode = #tpu.pipeline_mode<synchronous>, transform_indices = @transform_7, window_bounds = array<i64: 1, 128>}, {pipeline_mode = #tpu.pipeline_mode<synchronous>, transform_indices = @transform_8, window_bounds = array<i64: 1, 128>}, {transform_indices = @transform_9, window_bounds = array<i64: 2, 16, 128>}]} {
    %c0 = arith.constant 0 : index
    %c0_0 = arith.constant 0 : index
    %c0_1 = arith.constant 0 : index
    %0 = vector.load %arg1[%c0, %c0_0, %c0_1] : memref<2x16x3xf32, #tpu.memory_space<vmem>>, vector<2x16x3xf32>
    %1 = vector.shape_cast %0 : vector<2x16x3xf32> to vector<32x3xf32>
    %2 = arith.truncf %1 : vector<32x3xf32> to vector<32x3xbf16>
    %c0_2 = arith.constant 0 : index
    %c0_3 = arith.constant 0 : index
    %3 = vector.load %arg2[%c0_2, %c0_3] : memref<3x128xbf16, #tpu.memory_space<vmem>>, vector<3x128xbf16>
    %cst = arith.constant dense<0.000000e+00> : vector<32x128xf32>
    %4 = tpu.matmul %2, %3, %cst {dimension_numbers = #tpu.dot_dimension_numbers<[1], [0], [0], [1], [0, 0, 1, 1], [], []>} : vector<32x3xbf16>, vector<3x128xbf16>, vector<32x128xf32> -> vector<32x128xf32>
    %c0_4 = arith.constant 0 : index
    %c0_5 = arith.constant 0 : index
    %5 = vector.load %arg3[%c0_4, %c0_5] : memref<1x128xf32, #tpu.memory_space<vmem>>, vector<1x128xf32>
    %6 = vector.broadcast %5 : vector<1x128xf32> to vector<32x128xf32>
    %7 = arith.addf %4, %6 : vector<32x128xf32>
    %8 = tpu.iota {dimensions = array<i32: 1>} : vector<2x16x128xi32>
    %9 = vector.shape_cast %8 : vector<2x16x128xi32> to vector<32x128xi32>
    %10 = arith.truncf %7 : vector<32x128xf32> to vector<32x128xbf16>
    %c1_i32 = arith.constant 1 : i32
    %11 = vector.broadcast %c1_i32 : i32 to vector<32x128xi32>
    %12 = arith.cmpi sge, %9, %11 : vector<32x128xi32>
    %c1_i32_6 = arith.constant 1 : i32
    %13 = tpu.dynamic_rotate %7 by %c1_i32_6 dim 0 : vector<32x128xf32>, i32 -> vector<32x128xf32>
    %cst_7 = arith.constant 0.000000e+00 : f32
    %14 = vector.broadcast %cst_7 : f32 to vector<32x128xf32>
    %15 = arith.select %12, %13, %14 : vector<32x128xi1>, vector<32x128xf32>
    %16 = arith.truncf %15 : vector<32x128xf32> to vector<32x128xbf16>
    %c15_i32 = arith.constant 15 : i32
    %17 = vector.broadcast %c15_i32 : i32 to vector<32x128xi32>
    %18 = arith.cmpi slt, %9, %17 : vector<32x128xi32>
    %c31_i32 = arith.constant 31 : i32
    %19 = tpu.dynamic_rotate %7 by %c31_i32 dim 0 : vector<32x128xf32>, i32 -> vector<32x128xf32>
    %cst_8 = arith.constant 0.000000e+00 : f32
    %20 = vector.broadcast %cst_8 : f32 to vector<32x128xf32>
    %21 = arith.select %18, %19, %20 : vector<32x128xi1>, vector<32x128xf32>
    %22 = arith.truncf %21 : vector<32x128xf32> to vector<32x128xbf16>
    %23 = tpu.concatenate %16, %10, %22 in 1 : vector<32x128xbf16>, vector<32x128xbf16>, vector<32x128xbf16> -> vector<32x384xbf16>
    %c0_9 = arith.constant 0 : index
    %c0_10 = arith.constant 0 : index
    %c0_11 = arith.constant 0 : index
    %24 = vector.load %arg4[%c0_9, %c0_10, %c0_11] : memref<3x384x256xbf16, #tpu.memory_space<vmem>>, vector<1x384x256xbf16>
    %25 = vector.shape_cast %24 : vector<1x384x256xbf16> to vector<384x256xbf16>
    %cst_12 = arith.constant dense<0.000000e+00> : vector<32x256xf32>
    %26 = tpu.matmul %23, %25, %cst_12 {dimension_numbers = #tpu.dot_dimension_numbers<[1], [0], [0], [1], [0, 0, 1, 1], [], []>} : vector<32x384xbf16>, vector<384x256xbf16>, vector<32x256xf32> -> vector<32x256xf32>
    %c0_13 = arith.constant 0 : index
    %c0_14 = arith.constant 0 : index
    %c0_15 = arith.constant 0 : index
    %27 = vector.load %arg5[%c0_13, %c0_14, %c0_15] : memref<3x1x256xf32, #tpu.memory_space<vmem>>, vector<1x1x256xf32>
    %28 = vector.shape_cast %27 : vector<1x1x256xf32> to vector<1x256xf32>
    %29 = vector.broadcast %28 : vector<1x256xf32> to vector<32x256xf32>
    %30 = arith.addf %26, %29 : vector<32x256xf32>
    %31 = vector.extract_strided_slice %30 {offsets = [0, 0], sizes = [32, 128], strides = [1, 1]} : vector<32x256xf32> to vector<32x128xf32>
    %32 = math.tanh %31 : vector<32x128xf32>
    %33 = vector.extract_strided_slice %30 {offsets = [0, 128], sizes = [32, 128], strides = [1, 1]} : vector<32x256xf32> to vector<32x128xf32>
    %34 = math.tanh %33 : vector<32x128xf32>
    %cst_16 = arith.constant 1.000000e+00 : f32
    %35 = vector.broadcast %cst_16 : f32 to vector<32x128xf32>
    %36 = arith.addf %35, %34 : vector<32x128xf32>
    %cst_17 = arith.constant 5.000000e-01 : f32
    %37 = vector.broadcast %cst_17 : f32 to vector<32x128xf32>
    %38 = arith.mulf %37, %36 : vector<32x128xf32>
    %39 = arith.mulf %32, %38 : vector<32x128xf32>
    %40 = arith.truncf %39 : vector<32x128xf32> to vector<32x128xbf16>
    %c0_18 = arith.constant 0 : index
    %c0_19 = arith.constant 0 : index
    %c0_20 = arith.constant 0 : index
    %41 = vector.load %arg6[%c0_18, %c0_19, %c0_20] : memref<3x128x128xbf16, #tpu.memory_space<vmem>>, vector<1x128x128xbf16>
    %42 = vector.shape_cast %41 : vector<1x128x128xbf16> to vector<128x128xbf16>
    %cst_21 = arith.constant dense<0.000000e+00> : vector<32x128xf32>
    %43 = tpu.matmul %40, %42, %cst_21 {dimension_numbers = #tpu.dot_dimension_numbers<[1], [0], [0], [1], [0, 0, 1, 1], [], []>} : vector<32x128xbf16>, vector<128x128xbf16>, vector<32x128xf32> -> vector<32x128xf32>
    %c0_22 = arith.constant 0 : index
    %c0_23 = arith.constant 0 : index
    %c0_24 = arith.constant 0 : index
    %44 = vector.load %arg7[%c0_22, %c0_23, %c0_24] : memref<3x1x128xf32, #tpu.memory_space<vmem>>, vector<1x1x128xf32>
    %45 = vector.shape_cast %44 : vector<1x1x128xf32> to vector<1x128xf32>
    %46 = vector.broadcast %45 : vector<1x128xf32> to vector<32x128xf32>
    %47 = arith.addf %43, %46 : vector<32x128xf32>
    %48 = arith.addf %7, %47 : vector<32x128xf32>
    %49 = arith.truncf %47 : vector<32x128xf32> to vector<32x128xbf16>
    %c2_i32 = arith.constant 2 : i32
    %50 = vector.broadcast %c2_i32 : i32 to vector<32x128xi32>
    %51 = arith.cmpi sge, %9, %50 : vector<32x128xi32>
    %c2_i32_25 = arith.constant 2 : i32
    %52 = tpu.dynamic_rotate %47 by %c2_i32_25 dim 0 : vector<32x128xf32>, i32 -> vector<32x128xf32>
    %cst_26 = arith.constant 0.000000e+00 : f32
    %53 = vector.broadcast %cst_26 : f32 to vector<32x128xf32>
    %54 = arith.select %51, %52, %53 : vector<32x128xi1>, vector<32x128xf32>
    %55 = arith.truncf %54 : vector<32x128xf32> to vector<32x128xbf16>
    %c14_i32 = arith.constant 14 : i32
    %56 = vector.broadcast %c14_i32 : i32 to vector<32x128xi32>
    %57 = arith.cmpi slt, %9, %56 : vector<32x128xi32>
    %c30_i32 = arith.constant 30 : i32
    %58 = tpu.dynamic_rotate %47 by %c30_i32 dim 0 : vector<32x128xf32>, i32 -> vector<32x128xf32>
    %cst_27 = arith.constant 0.000000e+00 : f32
    %59 = vector.broadcast %cst_27 : f32 to vector<32x128xf32>
    %60 = arith.select %57, %58, %59 : vector<32x128xi1>, vector<32x128xf32>
    %61 = arith.truncf %60 : vector<32x128xf32> to vector<32x128xbf16>
    %62 = tpu.concatenate %55, %49, %61 in 1 : vector<32x128xbf16>, vector<32x128xbf16>, vector<32x128xbf16> -> vector<32x384xbf16>
    %c1 = arith.constant 1 : index
    %c0_28 = arith.constant 0 : index
    %c0_29 = arith.constant 0 : index
    %63 = vector.load %arg4[%c1, %c0_28, %c0_29] : memref<3x384x256xbf16, #tpu.memory_space<vmem>>, vector<1x384x256xbf16>
    %64 = vector.shape_cast %63 : vector<1x384x256xbf16> to vector<384x256xbf16>
    %cst_30 = arith.constant dense<0.000000e+00> : vector<32x256xf32>
    %65 = tpu.matmul %62, %64, %cst_30 {dimension_numbers = #tpu.dot_dimension_numbers<[1], [0], [0], [1], [0, 0, 1, 1], [], []>} : vector<32x384xbf16>, vector<384x256xbf16>, vector<32x256xf32> -> vector<32x256xf32>
    %c1_31 = arith.constant 1 : index
    %c0_32 = arith.constant 0 : index
    %c0_33 = arith.constant 0 : index
    %66 = vector.load %arg5[%c1_31, %c0_32, %c0_33] : memref<3x1x256xf32, #tpu.memory_space<vmem>>, vector<1x1x256xf32>
    %67 = vector.shape_cast %66 : vector<1x1x256xf32> to vector<1x256xf32>
    %68 = vector.broadcast %67 : vector<1x256xf32> to vector<32x256xf32>
    %69 = arith.addf %65, %68 : vector<32x256xf32>
    %70 = vector.extract_strided_slice %69 {offsets = [0, 0], sizes = [32, 128], strides = [1, 1]} : vector<32x256xf32> to vector<32x128xf32>
    %71 = math.tanh %70 : vector<32x128xf32>
    %72 = vector.extract_strided_slice %69 {offsets = [0, 128], sizes = [32, 128], strides = [1, 1]} : vector<32x256xf32> to vector<32x128xf32>
    %73 = math.tanh %72 : vector<32x128xf32>
    %cst_34 = arith.constant 1.000000e+00 : f32
    %74 = vector.broadcast %cst_34 : f32 to vector<32x128xf32>
    %75 = arith.addf %74, %73 : vector<32x128xf32>
    %cst_35 = arith.constant 5.000000e-01 : f32
    %76 = vector.broadcast %cst_35 : f32 to vector<32x128xf32>
    %77 = arith.mulf %76, %75 : vector<32x128xf32>
    %78 = arith.mulf %71, %77 : vector<32x128xf32>
    %79 = arith.truncf %78 : vector<32x128xf32> to vector<32x128xbf16>
    %c1_36 = arith.constant 1 : index
    %c0_37 = arith.constant 0 : index
    %c0_38 = arith.constant 0 : index
    %80 = vector.load %arg6[%c1_36, %c0_37, %c0_38] : memref<3x128x128xbf16, #tpu.memory_space<vmem>>, vector<1x128x128xbf16>
    %81 = vector.shape_cast %80 : vector<1x128x128xbf16> to vector<128x128xbf16>
    %cst_39 = arith.constant dense<0.000000e+00> : vector<32x128xf32>
    %82 = tpu.matmul %79, %81, %cst_39 {dimension_numbers = #tpu.dot_dimension_numbers<[1], [0], [0], [1], [0, 0, 1, 1], [], []>} : vector<32x128xbf16>, vector<128x128xbf16>, vector<32x128xf32> -> vector<32x128xf32>
    %c1_40 = arith.constant 1 : index
    %c0_41 = arith.constant 0 : index
    %c0_42 = arith.constant 0 : index
    %83 = vector.load %arg7[%c1_40, %c0_41, %c0_42] : memref<3x1x128xf32, #tpu.memory_space<vmem>>, vector<1x1x128xf32>
    %84 = vector.shape_cast %83 : vector<1x1x128xf32> to vector<1x128xf32>
    %85 = vector.broadcast %84 : vector<1x128xf32> to vector<32x128xf32>
    %86 = arith.addf %82, %85 : vector<32x128xf32>
    %87 = arith.addf %48, %86 : vector<32x128xf32>
    %88 = arith.truncf %86 : vector<32x128xf32> to vector<32x128xbf16>
    %c4_i32 = arith.constant 4 : i32
    %89 = vector.broadcast %c4_i32 : i32 to vector<32x128xi32>
    %90 = arith.cmpi sge, %9, %89 : vector<32x128xi32>
    %c4_i32_43 = arith.constant 4 : i32
    %91 = tpu.dynamic_rotate %86 by %c4_i32_43 dim 0 : vector<32x128xf32>, i32 -> vector<32x128xf32>
    %cst_44 = arith.constant 0.000000e+00 : f32
    %92 = vector.broadcast %cst_44 : f32 to vector<32x128xf32>
    %93 = arith.select %90, %91, %92 : vector<32x128xi1>, vector<32x128xf32>
    %94 = arith.truncf %93 : vector<32x128xf32> to vector<32x128xbf16>
    %c12_i32 = arith.constant 12 : i32
    %95 = vector.broadcast %c12_i32 : i32 to vector<32x128xi32>
    %96 = arith.cmpi slt, %9, %95 : vector<32x128xi32>
    %c28_i32 = arith.constant 28 : i32
    %97 = tpu.dynamic_rotate %86 by %c28_i32 dim 0 : vector<32x128xf32>, i32 -> vector<32x128xf32>
    %cst_45 = arith.constant 0.000000e+00 : f32
    %98 = vector.broadcast %cst_45 : f32 to vector<32x128xf32>
    %99 = arith.select %96, %97, %98 : vector<32x128xi1>, vector<32x128xf32>
    %100 = arith.truncf %99 : vector<32x128xf32> to vector<32x128xbf16>
    %101 = tpu.concatenate %94, %88, %100 in 1 : vector<32x128xbf16>, vector<32x128xbf16>, vector<32x128xbf16> -> vector<32x384xbf16>
    %c2 = arith.constant 2 : index
    %c0_46 = arith.constant 0 : index
    %c0_47 = arith.constant 0 : index
    %102 = vector.load %arg4[%c2, %c0_46, %c0_47] : memref<3x384x256xbf16, #tpu.memory_space<vmem>>, vector<1x384x256xbf16>
    %103 = vector.shape_cast %102 : vector<1x384x256xbf16> to vector<384x256xbf16>
    %cst_48 = arith.constant dense<0.000000e+00> : vector<32x256xf32>
    %104 = tpu.matmul %101, %103, %cst_48 {dimension_numbers = #tpu.dot_dimension_numbers<[1], [0], [0], [1], [0, 0, 1, 1], [], []>} : vector<32x384xbf16>, vector<384x256xbf16>, vector<32x256xf32> -> vector<32x256xf32>
    %c2_49 = arith.constant 2 : index
    %c0_50 = arith.constant 0 : index
    %c0_51 = arith.constant 0 : index
    %105 = vector.load %arg5[%c2_49, %c0_50, %c0_51] : memref<3x1x256xf32, #tpu.memory_space<vmem>>, vector<1x1x256xf32>
    %106 = vector.shape_cast %105 : vector<1x1x256xf32> to vector<1x256xf32>
    %107 = vector.broadcast %106 : vector<1x256xf32> to vector<32x256xf32>
    %108 = arith.addf %104, %107 : vector<32x256xf32>
    %109 = vector.extract_strided_slice %108 {offsets = [0, 0], sizes = [32, 128], strides = [1, 1]} : vector<32x256xf32> to vector<32x128xf32>
    %110 = math.tanh %109 : vector<32x128xf32>
    %111 = vector.extract_strided_slice %108 {offsets = [0, 128], sizes = [32, 128], strides = [1, 1]} : vector<32x256xf32> to vector<32x128xf32>
    %112 = math.tanh %111 : vector<32x128xf32>
    %cst_52 = arith.constant 1.000000e+00 : f32
    %113 = vector.broadcast %cst_52 : f32 to vector<32x128xf32>
    %114 = arith.addf %113, %112 : vector<32x128xf32>
    %cst_53 = arith.constant 5.000000e-01 : f32
    %115 = vector.broadcast %cst_53 : f32 to vector<32x128xf32>
    %116 = arith.mulf %115, %114 : vector<32x128xf32>
    %117 = arith.mulf %110, %116 : vector<32x128xf32>
    %118 = arith.truncf %117 : vector<32x128xf32> to vector<32x128xbf16>
    %c2_54 = arith.constant 2 : index
    %c0_55 = arith.constant 0 : index
    %c0_56 = arith.constant 0 : index
    %119 = vector.load %arg6[%c2_54, %c0_55, %c0_56] : memref<3x128x128xbf16, #tpu.memory_space<vmem>>, vector<1x128x128xbf16>
    %120 = vector.shape_cast %119 : vector<1x128x128xbf16> to vector<128x128xbf16>
    %cst_57 = arith.constant dense<0.000000e+00> : vector<32x128xf32>
    %121 = tpu.matmul %118, %120, %cst_57 {dimension_numbers = #tpu.dot_dimension_numbers<[1], [0], [0], [1], [0, 0, 1, 1], [], []>} : vector<32x128xbf16>, vector<128x128xbf16>, vector<32x128xf32> -> vector<32x128xf32>
    %c2_58 = arith.constant 2 : index
    %c0_59 = arith.constant 0 : index
    %c0_60 = arith.constant 0 : index
    %122 = vector.load %arg7[%c2_58, %c0_59, %c0_60] : memref<3x1x128xf32, #tpu.memory_space<vmem>>, vector<1x1x128xf32>
    %123 = vector.shape_cast %122 : vector<1x1x128xf32> to vector<1x128xf32>
    %124 = vector.broadcast %123 : vector<1x128xf32> to vector<32x128xf32>
    %125 = arith.addf %121, %124 : vector<32x128xf32>
    %126 = arith.addf %87, %125 : vector<32x128xf32>
    %c0_61 = arith.constant 0 : index
    %c0_62 = arith.constant 0 : index
    %127 = vector.load %arg8[%c0_61, %c0_62] : memref<1x128xf32, #tpu.memory_space<vmem>>, vector<1x128xf32>
    %128 = vector.broadcast %127 : vector<1x128xf32> to vector<32x128xf32>
    %129 = arith.mulf %126, %128 : vector<32x128xf32>
    %c0_63 = arith.constant 0 : index
    %c0_64 = arith.constant 0 : index
    %130 = vector.load %arg9[%c0_63, %c0_64] : memref<1x128xf32, #tpu.memory_space<vmem>>, vector<1x128xf32>
    %131 = vector.broadcast %130 : vector<1x128xf32> to vector<32x128xf32>
    %132 = arith.addf %129, %131 : vector<32x128xf32>
    %133 = vector.shape_cast %132 : vector<32x128xf32> to vector<2x16x128xf32>
    %134 = arith.truncf %133 : vector<2x16x128xf32> to vector<2x16x128xbf16>
    %c0_65 = arith.constant 0 : index
    %c0_66 = arith.constant 0 : index
    %c0_67 = arith.constant 0 : index
    %135 = vector.load %arg10[%c0_65, %c0_66, %c0_67] : memref<2x16x128xbf16, #tpu.memory_space<vmem>>, vector<2x16x128xbf16>
    tpu.vector_store %arg10[%c0_65, %c0_66, %c0_67], %134 {strides = array<i32>} : memref<2x16x128xbf16, #tpu.memory_space<vmem>>, vector<2x16x128xbf16>,
    return
  }
  func.func @transform_0(%arg0: i32) -> (i32, i32, i32) {
    %c0_i32 = arith.constant 0 : i32
    %c0_i32_0 = arith.constant 0 : i32
    %c0_i32_1 = arith.constant 0 : i32
    return %arg0, %c0_i32, %c0_i32_0 : i32, i32, i32
  }
  func.func @transform_1(%arg0: i32) -> (i32, i32) {
    %c0_i32 = arith.constant 0 : i32
    %c0_i32_0 = arith.constant 0 : i32
    %c0_i32_1 = arith.constant 0 : i32
    return %c0_i32, %c0_i32_0 : i32, i32
  }
  func.func @transform_2(%arg0: i32) -> (i32, i32) {
    %c0_i32 = arith.constant 0 : i32
    %c0_i32_0 = arith.constant 0 : i32
    %c0_i32_1 = arith.constant 0 : i32
    return %c0_i32, %c0_i32_0 : i32, i32
  }
  func.func @transform_3(%arg0: i32) -> (i32, i32, i32) {
    %c0_i32 = arith.constant 0 : i32
    %c0_i32_0 = arith.constant 0 : i32
    %c0_i32_1 = arith.constant 0 : i32
    %c0_i32_2 = arith.constant 0 : i32
    return %c0_i32, %c0_i32_0, %c0_i32_1 : i32, i32, i32
  }
  func.func @transform_4(%arg0: i32) -> (i32, i32, i32) {
    %c0_i32 = arith.constant 0 : i32
    %c0_i32_0 = arith.constant 0 : i32
    %c0_i32_1 = arith.constant 0 : i32
    %c0_i32_2 = arith.constant 0 : i32
    return %c0_i32, %c0_i32_0, %c0_i32_1 : i32, i32, i32
  }
  func.func @transform_5(%arg0: i32) -> (i32, i32, i32) {
    %c0_i32 = arith.constant 0 : i32
    %c0_i32_0 = arith.constant 0 : i32
    %c0_i32_1 = arith.constant 0 : i32
    %c0_i32_2 = arith.constant 0 : i32
    return %c0_i32, %c0_i32_0, %c0_i32_1 : i32, i32, i32
  }
  func.func @transform_6(%arg0: i32) -> (i32, i32, i32) {
    %c0_i32 = arith.constant 0 : i32
    %c0_i32_0 = arith.constant 0 : i32
    %c0_i32_1 = arith.constant 0 : i32
    %c0_i32_2 = arith.constant 0 : i32
    return %c0_i32, %c0_i32_0, %c0_i32_1 : i32, i32, i32
  }
  func.func @transform_7(%arg0: i32) -> (i32, i32) {
    %c0_i32 = arith.constant 0 : i32
    %c0_i32_0 = arith.constant 0 : i32
    %c0_i32_1 = arith.constant 0 : i32
    return %c0_i32, %c0_i32_0 : i32, i32
  }
  func.func @transform_8(%arg0: i32) -> (i32, i32) {
    %c0_i32 = arith.constant 0 : i32
    %c0_i32_0 = arith.constant 0 : i32
    %c0_i32_1 = arith.constant 0 : i32
    return %c0_i32, %c0_i32_0 : i32, i32
  }
  func.func @transform_9(%arg0: i32) -> (i32, i32, i32) {
    %c0_i32 = arith.constant 0 : i32
    %c0_i32_0 = arith.constant 0 : i32
    %c0_i32_1 = arith.constant 0 : i32
    return %arg0, %c0_i32, %c0_i32_0 : i32, i32, i32
  }
}

</mosaic_0001>

<bundles_post_ra>
// kernel: tpu_custom_call.1
= control target key start
LH: loop header
LB: loop body
LE: loop exit
PB: predicated region body
PF: predicated region fallthrough
CT: control target
= control target key end

     0   :  { %14 = vsyncpa [#allocation3], 0  ;;  %s3274_s0 = inlined_call_operand.vmem [shape: f32[2,16,3], index: 0, kind: input, shape index: {}]   ;;  %s3275_s1 = inlined_call_operand.vmem [shape: bf16[3,128], index: 1, kind: input, shape index: {}]   ;;  %s3276_s2 = inlined_call_operand.vmem [shape: f32[1,128], index: 2, kind: input, shape index: {}]   ;;  %s3277_s3 = inlined_call_operand.hbm [shape: bf16[3,384,256], index: 3, kind: input, shape index: {}]   ;;  %s3278_s4 = inlined_call_operand.vmem [shape: f32[3,1,256], index: 4, kind: input, shape index: {}]   ;;  %s3279_s5 = inlined_call_operand.hbm [shape: bf16[3,128,128], index: 5, kind: input, shape index: {}]   ;;  %s3280_s6 = inlined_call_operand.vmem [shape: f32[3,1,128], index: 6, kind: input, shape index: {}]   ;;  %s3281_s7 = inlined_call_operand.vmem [shape: f32[1,128], index: 7, kind: input, shape index: {}]   ;;  %s3282_s8 = inlined_call_operand.vmem [shape: f32[1,128], index: 8, kind: input, shape index: {}]   ;;  %s3283_s9 = inlined_call_operand.hbm [shape: bf16[2,16,128], index: 9, kind: output, shape index: {}]  }
   0x1   :  { %15 = vsyncpa [#allocation6], 0 }
   0x2   :  { %16 = vsyncpa [#allocation4], 0  ;;  %s27_s11 = sshll.u32 %s3277_s3, 4  ;;  %s2958_s12 = smov [#allocation2]   ;;  %s28_s11 = int_to_ptr.hbm [resolvable:$true] %s27_s11 }
   0x3   :  { %s29_s13 = sshll.u32 %s2958_s12, 4  ;;  %s42_s16 = sshll.u32 %s3279_s5, 4  ;;  %s30_s13 = int_to_ptr.vmem [resolvable:$true] %s29_s13  ;;  %s43_s16 = int_to_ptr.hbm [resolvable:$true] %s42_s16 }
   0x4   :  { %s2959_s17 = smov 128   ;;  %s2960_s18 = smov 8  }
   0x5   :  { %35 = dma.hbm_to_vmem [thread:$0]  %s28_s11, 18432, %s30_s13, [#allocation3], %s2959_s17, %s2959_s17, %s2960_s18  }
   0x6   :  { %s2961_s19 = smov [#allocation5]   ;;  %s2962_s21 = smov 64  }
   0x7   :  { %s44_s20 = sshll.u32 %s2961_s19, 4  ;;  %s2963_s22 = smov 4   ;;  %s45_s20 = int_to_ptr.vmem [resolvable:$true] %s44_s20 }
   0x8   :  { %50 = dma.hbm_to_vmem [thread:$0]  %s43_s16, 3072, %s45_s20, [#allocation6], %s2962_s21, %s2962_s21, %s2963_s22  }
   0x9   :  { %2952 = dma.done.wait [#allocation3], 18432  }
   0xa   :  { %2953 = vsyncadd [#allocation3], 4294948864 }
   0xb   :  { %2954 = dma.done.wait [#allocation6], 3072  }
   0xc   :  { %2955 = vsyncadd [#allocation6], 4294964224  ;;  %vm84_vm0 = vcmask 1040384   ;;  %vm85_vm1 = vcmask 1041408   ;;  %v2964_v0 = vmov 65535   ;;  %v66_v4 = vld [vmem:[%s3274_s0] sm:$0xff] }
   0xd   :  { %v86_v1 = vsel %vm84_vm0, 4294967295, %v2964_v0  ;;  %v72_v3 = vld [vmem:[%s3275_s1] sm:$0x3]  ;;  %v67_v5 = vld [vmem:[%s3274_s0 + $0x8] sm:$0xff]  ;;  %v2077_v7 = vld [vmem:[#allocation2 + $0xf0] sm:$0xf] }
   0xe   :  { %v87_v2 = vsel %vm85_vm1, %v86_v1, 0  ;;  %v70_v8 = vpack.c.bf16 %v67_v5, %v66_v4  ;;  %v2662_v9 = vld [vmem:[#allocation2 + $0xf4] sm:$0xf0]  ;;  %v2069_v10 = vld [vmem:[#allocation2 + $0xe0] sm:$0xf]  ;;  %vm77_vm2 = vcmask 23552  }
   0xf   :  { %v89_v6 = vand.u32 %v87_v2, %v72_v3  ;;  %v2660_v11 = vld [vmem:[#allocation2 + $0xe4] sm:$0xf0]  ;;  %v2078_v12 = vor.u32 %v2662_v9, %v2077_v7  ;;  %v2061_v13 = vld [vmem:[#allocation2 + $0xd0] sm:$0xf]  ;;  %v2678_v15 = vld [vmem:[#allocation2 + $0x174] sm:$0xf0] }
  0x10   :  { %v2141_v14 = vld [vmem:[#allocation2 + $0x170] sm:$0xf]  ;;  %v2070_v16 = vor.u32 %v2660_v11, %v2069_v10  ;;  %v2658_v17 = vld [vmem:[#allocation2 + $0xd4] sm:$0xf0]  ;;  %v2053_v20 = vld [vmem:[#allocation2 + $0xc0] sm:$0xf] }
  0x11   :  { %98 = vmatpush.bf16.msra.mxu0 %v89_v6  ;;  %504 = vmatpush.bf16.msra.mxu2 %v2078_v12  ;;  %v2142_v18 = vor.u32 %v2678_v15, %v2141_v14  ;;  %v2062_v19 = vor.u32 %v2658_v17, %v2061_v13  ;;  %v2656_v21 = vld [vmem:[#allocation2 + $0xc4] sm:$0xf0]  ;;  %v68_v23 = vld [vmem:[%s3274_s0 + $0x10] sm:$0xff]  ;;  %v69_v24 = vld [vmem:[%s3274_s0 + $0x18] sm:$0xff]  ;;  %s1939_s25 = sshll.u32 %s3283_s9, 4  ;;  %s1940_s25 = int_to_ptr.hbm [resolvable:$true] %s1939_s25 }
  0x12   :  { %v2054_v22 = vor.u32 %v2656_v21, %v2053_v20  ;;  %v71_v25 = vpack.c.bf16 %v69_v24, %v68_v23  ;;  %v2045_v26 = vld [vmem:[#allocation2 + $0xb0] sm:$0xf]  ;;  %v2654_v27 = vld [vmem:[#allocation2 + $0xb4] sm:$0xf0]  ;;  %v2133_v28 = vld [vmem:[#allocation2 + $0x160] sm:$0xf] }
  0x13   :  { %523 = vmatpush.bf16.msra.mxu3 %v2142_v18  ;;  %v2046_v29 = vor.u32 %v2654_v27, %v2045_v26  ;;  %v2676_v30 = vld [vmem:[#allocation2 + $0x164] sm:$0xf0]  ;;  %v2013_v32 = vld [vmem:[#allocation2 + $0x70] sm:$0xf]  ;;  %v2646_v33 = vld [vmem:[#allocation2 + $0x74] sm:$0xf0] }
  0x14   :  { %1953 = vmatmul.msk.bf16.vlgmr.msra.gmra.mxu0 %vm77_vm2, %v70_v8  ;;  %v2134_v31 = vor.u32 %v2676_v30, %v2133_v28  ;;  %v2037_v34 = vld [vmem:[#allocation2 + $0xa0] sm:$0xf]  ;;  %v2014_v35 = vor.u32 %v2646_v33, %v2013_v32  ;;  %v2652_v36 = vld [vmem:[#allocation2 + $0xa4] sm:$0xf0]  ;;  %v2125_v37 = vld [vmem:[#allocation2 + $0x150] sm:$0xf] }
  0x15   :  { %505 = vmatpush.bf16.msra.mxu2 %v2070_v16  ;;  %v2674_v38 = vld [vmem:[#allocation2 + $0x154] sm:$0xf0]  ;;  %v2038_v39 = vor.u32 %v2652_v36, %v2037_v34  ;;  %v2645_v41 = vld [vmem:[#allocation2 + $0x74] sm:$0xf]  ;;  %v2015_v42 = vld [vmem:[#allocation2 + $0x78] sm:$0xf0] }
  0x16   :  { %v2126_v40 = vor.u32 %v2674_v38, %v2125_v37  ;;  %485 = vmatpush.bf16.msra.mxu1 %v2014_v35  ;;  %v2018_v43 = vor.u32 %v2645_v41, %v2015_v42  ;;  %v2005_v44 = vld [vmem:[#allocation2 + $0x60] sm:$0xf]  ;;  %v2644_v45 = vld [vmem:[#allocation2 + $0x64] sm:$0xf0]  ;;  %v2029_v46 = vld [vmem:[#allocation2 + $0x90] sm:$0xf] }
  0x17   :  { %524 = vmatpush.bf16.msra.mxu3 %v2134_v31  ;;  %v2006_v47 = vor.u32 %v2644_v45, %v2005_v44  ;;  %v2650_v48 = vld [vmem:[#allocation2 + $0x94] sm:$0xf0]  ;;  %v2117_v49 = vld [vmem:[#allocation2 + $0x140] sm:$0xf]  ;;  %v2672_v50 = vld [vmem:[#allocation2 + $0x144] sm:$0xf0] }
  0x18   :  { %542 = vmatpush.bf16.msrb.mxu0 %v2018_v43  ;;  %v2030_v51 = vor.u32 %v2650_v48, %v2029_v46  ;;  %v2118_v52 = vor.u32 %v2672_v50, %v2117_v49  ;;  %v2643_v53 = vld [vmem:[#allocation2 + $0x64] sm:$0xf]  ;;  %v2007_v54 = vld [vmem:[#allocation2 + $0x68] sm:$0xf0]  ;;  %v1997_v56 = vld [vmem:[#allocation2 + $0x50] sm:$0xf] }
  0x19   :  { %506 = vmatpush.bf16.msra.mxu2 %v2062_v19  ;;  %v2010_v55 = vor.u32 %v2643_v53, %v2007_v54  ;;  %v2642_v57 = vld [vmem:[#allocation2 + $0x54] sm:$0xf0]  ;;  %v2021_v58 = vld [vmem:[#allocation2 + $0x80] sm:$0xf]  ;;  %v2648_v60 = vld [vmem:[#allocation2 + $0x84] sm:$0xf0] }
  0x1a   :  { %486 = vmatpush.bf16.msra.mxu1 %v2006_v47  ;;  %v1998_v59 = vor.u32 %v2642_v57, %v1997_v56  ;;  %v2109_v61 = vld [vmem:[#allocation2 + $0x130] sm:$0xf]  ;;  %v2670_v62 = vld [vmem:[#allocation2 + $0x134] sm:$0xf0]  ;;  %v2022_v63 = vor.u32 %v2648_v60, %v2021_v58  ;;  %v2641_v1 = vld [vmem:[#allocation2 + $0x54] sm:$0xf] }
  0x1b   :  { %525 = vmatpush.bf16.msra.mxu3 %v2126_v40  ;;  %v2110_v0 = vor.u32 %v2670_v62, %v2109_v61  ;;  %v1999_v2 = vld [vmem:[#allocation2 + $0x58] sm:$0xf0]  ;;  %v1989_v4 = vld [vmem:[#allocation2 + $0x40] sm:$0xf]  ;;  %v2640_v5 = vld [vmem:[#allocation2 + $0x44] sm:$0xf0] }
  0x1c   :  { %543 = vmatpush.bf16.msrb.mxu0 %v2010_v55  ;;  %v2002_v3 = vor.u32 %v2641_v1, %v1999_v2  ;;  %v2101_v6 = vld [vmem:[#allocation2 + $0x120] sm:$0xf]  ;;  %v1990_v7 = vor.u32 %v2640_v5, %v1989_v4  ;;  %v2668_v8 = vld [vmem:[#allocation2 + $0x124] sm:$0xf0]  ;;  %v2639_v9 = vld [vmem:[#allocation2 + $0x44] sm:$0xf] }
  0x1d   :  { %507 = vmatpush.bf16.msra.mxu2 %v2054_v22  ;;  %v1991_v10 = vld [vmem:[#allocation2 + $0x48] sm:$0xf0]  ;;  %v2102_v11 = vor.u32 %v2668_v8, %v2101_v6  ;;  %v2677_v13 = vld [vmem:[#allocation2 + $0x174] sm:$0xf]  ;;  %v2143_v14 = vld [vmem:[#allocation2 + $0x178] sm:$0xf0]  ;;  %v110_v8 = vlaneseq }
  0x1e   :  { %487 = vmatpush.bf16.msra.mxu1 %v1998_v59  ;;  %v1994_v12 = vor.u32 %v2639_v9, %v1991_v10  ;;  %v2146_v15 = vor.u32 %v2677_v13, %v2143_v14  ;;  %v1981_v16 = vld [vmem:[#allocation2 + $0x30] sm:$0xf]  ;;  %v2638_v17 = vld [vmem:[#allocation2 + $0x34] sm:$0xf0]  ;;  %v2637_v21 = vld [vmem:[#allocation2 + $0x34] sm:$0xf] }
  0x1f   :  { %526 = vmatpush.bf16.msra.mxu3 %v2118_v52  ;;  %v2093_v18 = vld [vmem:[#allocation2 + $0x110] sm:$0xf]  ;;  %v1982_v19 = vor.u32 %v2638_v17, %v1981_v16  ;;  %v2666_v20 = vld [vmem:[#allocation2 + $0x114] sm:$0xf0]  ;;  %v1983_v22 = vld [vmem:[#allocation2 + $0x38] sm:$0xf0] }
  0x20   :  { %544 = vmatpush.bf16.msrb.mxu0 %v2002_v3  ;;  %v2094_v23 = vor.u32 %v2666_v20, %v2093_v18  ;;  %v1986_v24 = vor.u32 %v2637_v21, %v1983_v22  ;;  %v2135_v26 = vld [vmem:[#allocation2 + $0x168] sm:$0xf0]  ;;  %v1973_v28 = vld [vmem:[#allocation2 + $0x20] sm:$0xf]  ;;  %v2664_v32 = vld [vmem:[#allocation2 + $0x104] sm:$0xf0] }
  0x21   :  { %508 = vmatpush.bf16.msra.mxu2 %v2046_v29  ;;  %v2636_v29 = vld [vmem:[#allocation2 + $0x24] sm:$0xf0]  ;;  %v2085_v30 = vld [vmem:[#allocation2 + $0x100] sm:$0xf]  ;;  %v2635_v33 = vld [vmem:[#allocation2 + $0x24] sm:$0xf] }
  0x22   :  { %488 = vmatpush.bf16.msra.mxu1 %v1990_v7  ;;  %v1974_v31 = vor.u32 %v2636_v29, %v1973_v28  ;;  %v1975_v34 = vld [vmem:[#allocation2 + $0x28] sm:$0xf0]  ;;  %v2086_v35 = vor.u32 %v2664_v32, %v2085_v30  ;;  %v2673_v37 = vld [vmem:[#allocation2 + $0x154] sm:$0xf]  ;;  %v2127_v38 = vld [vmem:[#allocation2 + $0x158] sm:$0xf0] }
  0x23   :  { %527 = vmatpush.bf16.msra.mxu3 %v2110_v0  ;;  %v1978_v36 = vor.u32 %v2635_v33, %v1975_v34  ;;  %v1965_v40 = vld [vmem:[#allocation2 + $0x10] sm:$0xf]  ;;  %v2634_v41 = vld [vmem:[#allocation2 + $0x14] sm:$0xf0]  ;;  %v2633_v42 = vld [vmem:[#allocation2 + $0x14] sm:$0xf] }
  0x24   :  { %1954 = vmatmul.msk.bf16.gmra.mxu0 %vm77_vm2, %v71_v25  ;;  %v2675_v25 = vld [vmem:[#allocation2 + $0x164] sm:$0xf]  ;;  %v1966_v43 = vor.u32 %v2634_v41, %v1965_v40  ;;  %v1967_v44 = vld [vmem:[#allocation2 + $0x18] sm:$0xf0]  ;;  %v2119_v46 = vld [vmem:[#allocation2 + $0x148] sm:$0xf0] }
  0x25   :  { %509 = vmatpush.bf16.msra.mxu2 %v2038_v39  ;;  %545 = vmatpush.bf16.msrb.mxu0 %v1994_v12  ;;  %v2138_v27 = vor.u32 %v2675_v25, %v2135_v26  ;;  %v2130_v39 = vor.u32 %v2673_v37, %v2127_v38  ;;  %v2671_v45 = vld [vmem:[#allocation2 + $0x144] sm:$0xf]  ;;  %v1970_v47 = vor.u32 %v2633_v42, %v1967_v44  ;;  %v1957_v49 = vld [vmem:[#allocation2] sm:$0xf]  ;;  %v2632_v50 = vld [vmem:[#allocation2 + $0x4] sm:$0xf0] }
  0x26   :  { %489 = vmatpush.bf16.msra.mxu1 %v1982_v19  ;;  %v2122_v48 = vor.u32 %v2671_v45, %v2119_v46  ;;  %v1958_v53 = vor.u32 %v2632_v50, %v1957_v49  ;;  %v1959_v54 = vld [vmem:[#allocation2 + $0x8] sm:$0xf0]  ;;  %v2669_v55 = vld [vmem:[#allocation2 + $0x134] sm:$0xf]  ;;  %v2111_v56 = vld [vmem:[#allocation2 + $0x138] sm:$0xf0] }
  0x27   :  { %528 = vmatpush.bf16.msra.mxu3 %v2102_v11  ;;  %v3045_v57 = vld [vmem:[%s3276_s2] ss:$0 sm:$0xff]  ;;  %v2114_v59 = vor.u32 %v2669_v55, %v2111_v56  ;;  %v2661_v60 = vld [vmem:[#allocation2 + $0xf4] sm:$0xf]  ;;  %v2079_v61 = vld [vmem:[#allocation2 + $0xf8] sm:$0xf0] }
  0x28   :  { %v2082_v62 = vor.u32 %v2661_v60, %v2079_v61  ;;  %v2103_v0 = vld [vmem:[#allocation2 + $0x128] sm:$0xf0]  ;;  %v2659_v3 = vld [vmem:[#allocation2 + $0xe4] sm:$0xf]  ;;  %v2665_v5 = vld [vmem:[#allocation2 + $0x114] sm:$0xf] }
  0x29   :  { %510 = vmatpush.bf16.msra.mxu2 %v2030_v51  ;;  %546 = vmatpush.bf16.msrb.mxu0 %v1986_v24  ;;  %v2631_v51 = vld [vmem:[#allocation2 + $0x4] sm:$0xf]  ;;  %v2071_v4 = vld [vmem:[#allocation2 + $0xe8] sm:$0xf0]  ;;  %v2095_v7 = vld [vmem:[#allocation2 + $0x118] sm:$0xf0] }
  0x2a   :  { %490 = vmatpush.bf16.msra.mxu1 %v1974_v31  ;;  %v1962_v58 = vor.u32 %v2631_v51, %v1959_v54  ;;  %v2074_v6 = vor.u32 %v2659_v3, %v2071_v4  ;;  %v2098_v10 = vor.u32 %v2665_v5, %v2095_v7  ;;  %v3057_v14 = vshrl.u32 %v110_v8, 7  ;;  %v2063_v16 = vld [vmem:[#allocation2 + $0xd8] sm:$0xf0]  ;;  %v2663_v18 = vld [vmem:[#allocation2 + $0x104] sm:$0xf] }
  0x2b   :  { %529 = vmatpush.bf16.msra.mxu3 %v2094_v23  ;;  %v2087_v19 = vld [vmem:[#allocation2 + $0x108] sm:$0xf0]  ;;  %v2655_v23 = vld [vmem:[#allocation2 + $0xc4] sm:$0xf]  ;;  %v2649_v46 = vld [vmem:[#allocation2 + $0x94] sm:$0xf] }
  0x2c   :  { %v2090_v22 = vor.u32 %v2663_v18, %v2087_v19  ;;  %v2055_v24 = vld [vmem:[#allocation2 + $0xc8] sm:$0xf0]  ;;  %v3063_v28 = vadd.s32 8, %v3057_v14  ;;  %vm142_vm3 = vcmp.lt.s32.totalorder %v3057_v14, 7  ;;  %vm123_vm5 = vcmp.lt.s32.totalorder %v3057_v14, 1 }
  0x2d   :  { %511 = vmatpush.bf16.msra.mxu2 %v2022_v63  ;;  %547 = vmatpush.bf16.msrb.mxu0 %v1978_v36  ;;  %v2667_v63 = vld [vmem:[#allocation2 + $0x124] sm:$0xf]  ;;  %v2058_v26 = vor.u32 %v2655_v23, %v2055_v24  ;;  %v2047_v36 = vld [vmem:[#allocation2 + $0xb8] sm:$0xf0]  ;;  %v2039_v41 = vld [vmem:[#allocation2 + $0xa8] sm:$0xf0] }
  0x2e   :  { %491 = vmatpush.bf16.msra.mxu1 %v1966_v43  ;;  %v2106_v2 = vor.u32 %v2667_v63, %v2103_v0  ;;  %vm137_vm4 = vcmp.lt.s32.totalorder %v3063_v28, 15  ;;  %v2651_v40 = vld [vmem:[#allocation2 + $0xa4] sm:$0xf]  ;;  %vm117_vm6 = vcmp.ge.s32.totalorder %v3057_v14, 1  ;;  %v2023_v61 = vld [vmem:[#allocation2 + $0x88] sm:$0xf0] }
  0x2f   :  { %530 = vmatpush.bf16.msra.mxu3 %v2086_v35  ;;  %v2653_v35 = vld [vmem:[#allocation2 + $0xb4] sm:$0xf]  ;;  %v2042_v45 = vor.u32 %v2651_v40, %v2039_v41  ;;  %v2682_v40 = vld [vmem:[#allocation5 + $0x18] sm:$0xff]  ;;  %vm741_vm7 = vcmp.lt.s32.totalorder %v3057_v14, 6  ;;  %vm736_vm8 = vcmp.lt.s32.totalorder %v3063_v28, 14  ;;  %vm722_vm9 = vcmp.lt.s32.totalorder %v3057_v14, 2 }
  0x30   :  { %vm716_vm10 = vcmp.ge.s32.totalorder %v3057_v14, 2  ;;  %vm1325_vm11 = vcmp.lt.s32.totalorder %v3057_v14, 4  ;;  %vm1339_vm12 = vcmp.lt.s32.totalorder %v3063_v28, 12  ;;  %vm1319_vm13 = vcmp.ge.s32.totalorder %v3057_v14, 4  ;;  %v2797_v14 = vld [vmem:[#allocation5 + $0xb0] sm:$0xff] }
  0x31   :  { %580 = vmatpush.bf16.msrb.mxu2 %v2146_v15  ;;  %548 = vmatpush.bf16.msrb.mxu0 %v1970_v47  ;;  %v2657_v15 = vld [vmem:[#allocation2 + $0xd4] sm:$0xf]  ;;  %v2031_v47 = vld [vmem:[#allocation2 + $0x98] sm:$0xf0] }
  0x32   :  { %492 = vmatpush.bf16.msra.mxu1 %v1958_v53  ;;  %v2066_v17 = vor.u32 %v2657_v15, %v2063_v16  ;;  %v2034_v54 = vor.u32 %v2649_v46, %v2031_v47  ;;  %v2679_v47 = vld [vmem:[#allocation5] sm:$0xff] }
  0x35   :  { %581 = vmatpush.bf16.msrb.mxu2 %v2138_v27  ;;  %549 = vmatpush.bf16.msrb.mxu0 %v1962_v58 }
  0x36   :  { %561 = vmatpush.bf16.msrb.mxu1 %v2082_v62 }
  0x39   :  { %582 = vmatpush.bf16.msrb.mxu2 %v2130_v39  ;;  %v2050_v39 = vor.u32 %v2653_v35, %v2047_v36  ;;  %v2685_v35 = vld [vmem:[#allocation5 + $0x30] sm:$0xff]  ;;  %v2684_v36 = vld [vmem:[#allocation5 + $0x28] sm:$0xff] }
  0x3a   :  { %562 = vmatpush.bf16.msrb.mxu1 %v2074_v6 }
  0x3d   :  { %583 = vmatpush.bf16.msrb.mxu2 %v2122_v48 }
  0x3e   :  { %563 = vmatpush.bf16.msrb.mxu1 %v2066_v17 }
  0x41   :  { %584 = vmatpush.bf16.msrb.mxu2 %v2114_v59 }
  0x42   :  { %564 = vmatpush.bf16.msrb.mxu1 %v2058_v26 }
  0x45   :  { %585 = vmatpush.bf16.msrb.mxu2 %v2106_v2 }
  0x46   :  { %565 = vmatpush.bf16.msrb.mxu1 %v2050_v39  ;;  %v2683_v39 = vld [vmem:[#allocation5 + $0x20] sm:$0xff] }
  0x49   :  { %586 = vmatpush.bf16.msrb.mxu2 %v2098_v10 }
  0x4a   :  { %566 = vmatpush.bf16.msrb.mxu1 %v2042_v45  ;;  %v239_v45 = vld [vmem:[%s3278_s4] sm:$0x3] }
  0x4d   :  { %587 = vmatpush.bf16.msrb.mxu2 %v2090_v22 }
  0x4e   :  { %567 = vmatpush.bf16.msrb.mxu1 %v2034_v54 }
  0x91   :  { %v100_v52 = vpop.f32.mrf.mxu0 }
  0x92   :  { %v3048_v1 = vadd.f32 %v3045_v57, %v100_v52 }
  0x94   :  { %v113_v12 = vpack.c.bf16 %v3048_v1, %v3048_v1  ;;  %v138_v29 = vrot.slane %v3048_v1, 1  ;;  %v119_v42 = vrot.slane %v3048_v1, 7 }
  0x96   :  { %v171_v20 = vunpack.c.l.b16 %v113_v12 }
  0x99   :  { %v102_v9 = vpop.f32.mrf.mxu0 }
  0x9a   :  { %v3051_v11 = vadd.f32 %v3045_v57, %v102_v9 }
  0x9c   :  { %v114_v13 = vpack.c.bf16 %v3051_v11, %v3051_v11  ;;  %v139_v25 = vrot.slane %v3051_v11, 1  ;;  %v120_v34 = vrot.slane %v3051_v11, 7 }
  0x9e   :  { %v172_v21 = vunpack.c.l.b16 %v114_v13  ;;  %v145_v32 = vsel %vm142_vm3, %v138_v29, %v139_v25  ;;  %v126_v49 = vsel %vm123_vm5, %v119_v42, %v120_v34 }
  0x9f   :  { %v151_v38 = vpack.c.bf16 %v145_v32, %v145_v32  ;;  %v133_v60 = vpack.c.bf16 %v126_v49, %v126_v49  ;;  %v2686_v32 = vld [vmem:[#allocation5 + $0x38] sm:$0xff] }
  0xa0   :  { %v3060_v27 = vpack.c.b16 %v172_v21, %v171_v20  ;;  %689 = vmatpush.bf16.msrb.mxu3 %v2686_v32 }
  0xa1   :  { %v105_v30 = vpop.f32.mrf.mxu0  ;;  %v183_v51 = vunpack.c.l.b16 %v151_v38  ;;  %v160_v10 = vunpack.c.l.b16 %v133_v60 }
  0xa2   :  { %v3068_v31 = vadd.f32 %v3045_v57, %v105_v30  ;;  %512 = vmatmul.bf16.vlgmr.msra.gmra.mxu2 %v3060_v27 }
  0xa4   :  { %v140_v33 = vrot.slane %v3068_v31, 1  ;;  %v115_v53 = vpack.c.bf16 %v3068_v31, %v3068_v31  ;;  %v121_v12 = vrot.slane %v3068_v31, 7  ;;  %690 = vmatpush.bf16.msrb.mxu3 %v2685_v35 }
  0xa6   :  { %v144_v37 = vsel %vm142_vm3, %v139_v25, %v140_v33  ;;  %v173_v62 = vunpack.c.l.b16 %v115_v53  ;;  %v125_v19 = vsel %vm123_vm5, %v120_v34, %v121_v12  ;;  %v241_v53 = vperm.slane %v239_v45, 0 }
  0xa7   :  { %v148_v43 = vsel %vm137_vm4, %v144_v37, 0.0  ;;  %v130_v21 = vsel %vm117_vm6, %v125_v19, 0.0  ;;  %v2734_v19 = vld [vmem:[#allocation2 + $0x2f4] sm:$0xf0] }
  0xa8   :  { %v152_v44 = vpack.c.bf16 %v148_v43, %v148_v43  ;;  %v134_v24 = vpack.c.bf16 %v130_v21, %v130_v21  ;;  %691 = vmatpush.bf16.msrb.mxu3 %v2684_v36  ;;  %v2680_v43 = vld [vmem:[#allocation5 + $0x8] sm:$0xff] }
  0xa9   :  { %v107_v48 = vpop.f32.mrf.mxu0 }
  0xaa   :  { %v3085_v50 = vadd.f32 %v3045_v57, %v107_v48  ;;  %v184_v52 = vunpack.c.l.b16 %v152_v44  ;;  %v2647_v57 = vld [vmem:[#allocation2 + $0x84] sm:$0xf]  ;;  %v161_v26 = vunpack.c.l.b16 %v134_v24  ;;  %v242_v48 = vperm.slane %v239_v45, 1  ;;  %v2714_v24 = vld [vmem:[#allocation2 + $0x254] sm:$0xf0] }
  0xab   :  { %v2026_v6 = vor.u32 %v2647_v57, %v2023_v61 }
  0xac   :  { %v122_v55 = vrot.slane %v3085_v50, 7  ;;  %v141_v56 = vrot.slane %v3085_v50, 1  ;;  %v187_v58 = vpack.c.b16 %v184_v52, %v183_v51  ;;  %v116_v59 = vpack.c.bf16 %v3085_v50, %v3085_v50  ;;  %692 = vmatpush.bf16.msrb.mxu3 %v2683_v39  ;;  %v2278_v39 = vld [vmem:[#allocation2 + $0x240] sm:$0xf] }
  0xad   :  { %568 = vmatpush.bf16.msrb.mxu1 %v2026_v6 }
  0xae   :  { %531 = vmatmul.bf16.vlgmr.msra.gmra.mxu3 %v187_v58  ;;  %v174_v63 = vunpack.c.l.b16 %v116_v59  ;;  %v127_v0 = vsel %vm123_vm5, %v122_v55, %v119_v42  ;;  %v146_v2 = vsel %vm142_vm3, %v141_v56, %v138_v29  ;;  %v143_v7 = vsel %vm142_vm3, %v140_v33, %v141_v56  ;;  %v2681_v42 = vld [vmem:[#allocation5 + $0x10] sm:$0xff] }
  0xaf   :  { %v128_v3 = vsel %vm117_vm6, %v127_v0, 0.0  ;;  %v150_v8 = vsel %vm137_vm4, %v146_v2, 0.0  ;;  %v153_v15 = vpack.c.bf16 %v143_v7, %v143_v7  ;;  %v124_v20 = vsel %vm123_vm5, %v121_v12, %v122_v55  ;;  %v2302_v7 = vld [vmem:[#allocation2 + $0x270] sm:$0xf] }
  0xb0   :  { %v176_v4 = vpack.c.b16 %v174_v63, %v173_v62  ;;  %v132_v5 = vpack.c.bf16 %v128_v3, %v128_v3  ;;  %v154_v16 = vpack.c.bf16 %v150_v8, %v150_v8  ;;  %v135_v23 = vpack.c.bf16 %v124_v20, %v124_v20  ;;  %693 = vmatpush.bf16.msrb.mxu3 %v2682_v40  ;;  %v2718_v8 = vld [vmem:[#allocation2 + $0x274] sm:$0xf0]  ;;  %v2712_v40 = vld [vmem:[#allocation2 + $0x244] sm:$0xf0] }
  0xb1   :  { %v185_v17 = vunpack.c.l.b16 %v153_v15  ;;  %v2303_v12 = vor.u32 %v2718_v8, %v2302_v7  ;;  %v2716_v15 = vld [vmem:[#allocation2 + $0x264] sm:$0xf0]  ;;  %v2710_v7 = vld [vmem:[#allocation2 + $0x234] sm:$0xf0]  ;;  %v2358_v8 = vld [vmem:[#allocation2 + $0x2e0] sm:$0xf] }
  0xb2   :  { %517 = vmatmul.bf16.gmra.mxu2 %v176_v4  ;;  %v159_v9 = vunpack.c.l.b16 %v132_v5  ;;  %v186_v18 = vunpack.c.l.b16 %v154_v16  ;;  %v162_v25 = vunpack.c.l.b16 %v135_v23  ;;  %v2286_v23 = vld [vmem:[#allocation2 + $0x250] sm:$0xf] }
  0xb4   :  { %v163_v13 = vpack.c.b16 %v160_v10, %v159_v9  ;;  %v188_v22 = vpack.c.b16 %v186_v18, %v185_v17  ;;  %v164_v29 = vpack.c.b16 %v162_v25, %v161_v26  ;;  %694 = vmatpush.bf16.msrb.mxu3 %v2681_v42  ;;  %v2366_v18 = vld [vmem:[#allocation2 + $0x2f0] sm:$0xf] }
  0xb5   :  { %v2367_v25 = vor.u32 %v2734_v19, %v2366_v18  ;;  %v2708_v18 = vld [vmem:[#allocation2 + $0x224] sm:$0xf0]  ;;  %v2350_v19 = vld [vmem:[#allocation2 + $0x2d0] sm:$0xf] }
  0xb6   :  { %493 = vmatmul.bf16.vlgmr.msra.gmra.mxu1 %v163_v13  ;;  %550 = vmatmul.bf16.vlgmr.msrb.gmra.mxu0 %v163_v13  ;;  %v2294_v13 = vld [vmem:[#allocation2 + $0x260] sm:$0xf] }
  0xb7   :  { %1105 = vmatpush.bf16.msra.mxu1 %v2303_v12  ;;  %v2295_v17 = vor.u32 %v2716_v15, %v2294_v13  ;;  %1124 = vmatpush.bf16.msra.mxu2 %v2367_v25  ;;  %v2238_v13 = vld [vmem:[#allocation2 + $0x1f0] sm:$0xf]  ;;  %v2702_v15 = vld [vmem:[#allocation2 + $0x1f4] sm:$0xf0] }
  0xb8   :  { %695 = vmatpush.bf16.msrb.mxu3 %v2680_v43 }
  0xbb   :  { %1106 = vmatpush.bf16.msra.mxu1 %v2295_v17  ;;  %v2239_v17 = vor.u32 %v2702_v15, %v2238_v13  ;;  %v2360_v13 = vld [vmem:[#allocation2 + $0x2e8] sm:$0xf0] }
  0xbc   :  { %696 = vmatpush.bf16.msrb.mxu3 %v2679_v47 }
  0xbd   :  { %1086 = vmatpush.bf16.msra.mxu0 %v2239_v17  ;;  %v2692_v17 = vld [vmem:[#allocation2 + $0x1a4] sm:$0xf0] }
  0xbe   :  { %536 = vmatmul.bf16.gmra.mxu3 %v188_v22 }
  0xc2   :  { %588 = vmatmul.bf16.vlgmr.msrb.gmra.mxu2 %v187_v58 }
  0xc6   :  { %498 = vmatmul.bf16.gmra.mxu1 %v164_v29  ;;  %555 = vmatmul.bf16.gmra.mxu0 %v164_v29 }
  0xd2   :  { %593 = vmatmul.bf16.gmra.mxu2 %v188_v22 }
  0xd6   :  { %569 = vmatmul.bf16.vlgmr.msrb.gmra.mxu1 %v3060_v27 }
  0xe6   :  { %574 = vmatmul.bf16.gmra.mxu1 %v176_v4 }
 0x125   :  { %v513_v30 = vpop.f32.mrf.mxu2 }
 0x12d   :  { %v515_v33 = vpop.f32.mrf.mxu2 }
 0x131   :  { %v532_v51 = vpop.f32.mrf.mxu3 }
 0x133   :  { %v494_v34 = vpop.f32.mrf.mxu1  ;;  %v551_v44 = vpop.f32.mrf.mxu0 }
 0x134   :  { %v552_v52 = vadd.f32 %v551_v44, %v242_v48  ;;  %v495_v59 = vadd.f32 %v494_v34, %v241_v53 }
 0x135   :  { %v3112_v37 = vpop.f32.mrf.mxu2 }
 0x136   :  { %v514_v62 = vadd.f32 %v513_v30, %v495_v59 }
 0x138   :  { %v533_v6 = vadd.f32 %v532_v51, %v514_v62 }
 0x139   :  { %v534_v63 = vpop.f32.mrf.mxu3 }
 0x13b   :  { %v496_v38 = vpop.f32.mrf.mxu1  ;;  %v553_v54 = vpop.f32.mrf.mxu0 }
 0x13c   :  { %v497_v60 = vadd.f32 %v496_v38, %v241_v53  ;;  %v554_v61 = vadd.f32 %v553_v54, %v242_v48 }
 0x13d   :  { %v3114_v27 = vpop.f32.mrf.mxu2 }
 0x13e   :  { %v516_v2 = vadd.f32 %v515_v33, %v497_v60  ;;  %v2287_v33 = vor.u32 %v2714_v24, %v2286_v23  ;;  %v2701_v23 = vld [vmem:[#allocation2 + $0x1f4] sm:$0xf]  ;;  %v2240_v24 = vld [vmem:[#allocation2 + $0x1f8] sm:$0xf0] }
 0x13f   :  { %v2243_v25 = vor.u32 %v2701_v23, %v2240_v24 }
 0x140   :  { %v535_v10 = vadd.f32 %v534_v63, %v516_v2  ;;  %1107 = vmatpush.bf16.msra.mxu1 %v2287_v33  ;;  %v2706_v33 = vld [vmem:[#allocation2 + $0x214] sm:$0xf0] }
 0x141   :  { %v537_v29 = vpop.f32.mrf.mxu3  ;;  %1143 = vmatpush.bf16.msra.mxu3 %v2243_v25  ;;  %v2729_v25 = vld [vmem:[#allocation2 + $0x2d4] sm:$0xf] }
 0x143   :  { %v499_v41 = vpop.f32.mrf.mxu1  ;;  %v556_v4 = vpop.f32.mrf.mxu0 }
 0x144   :  { %v557_v16 = vadd.f32 %v556_v4, %v242_v48  ;;  %v500_v34 = vadd.f32 %v499_v41, %v241_v53 }
 0x145   :  { %v589_v49 = vpop.f32.mrf.mxu2 }
 0x146   :  { %v519_v51 = vadd.f32 %v3112_v37, %v500_v34  ;;  %v2342_v34 = vld [vmem:[#allocation2 + $0x2c0] sm:$0xf] }
 0x14b   :  { %v501_v46 = vpop.f32.mrf.mxu1  ;;  %v558_v35 = vpop.f32.mrf.mxu0 }
 0x14c   :  { %v502_v42 = vadd.f32 %v501_v46, %v241_v53  ;;  %v559_v47 = vadd.f32 %v558_v35, %v242_v48  ;;  %v538_v46 = vadd.f32 %v537_v29, %v519_v51  ;;  %v539_v53 = vpop.f32.mrf.mxu3  ;;  %v2700_v29 = vld [vmem:[#allocation2 + $0x1e4] sm:$0xf0]  ;;  %v2334_v51 = vld [vmem:[#allocation2 + $0x2b0] sm:$0xf] }
 0x14d   :  { %v591_v57 = vpop.f32.mrf.mxu2  ;;  %v2728_v35 = vld [vmem:[#allocation2 + $0x2c4] sm:$0xf0] }
 0x14e   :  { %v521_v41 = vadd.f32 %v3114_v27, %v502_v42 }
 0x150   :  { %v540_v48 = vadd.f32 %v539_v53, %v521_v41  ;;  %v2697_v41 = vld [vmem:[#allocation2 + $0x1d4] sm:$0xf] }
 0x153   :  { %v570_v55 = vpop.f32.mrf.mxu1 }
 0x154   :  { %v571_v56 = vadd.f32 %v570_v55, %v552_v52 }
 0x155   :  { %v594_v21 = vpop.f32.mrf.mxu2 }
 0x156   :  { %v590_v58 = vadd.f32 %v589_v49, %v571_v56  ;;  %v2279_v49 = vor.u32 %v2712_v40, %v2278_v39  ;;  %v2699_v39 = vld [vmem:[#allocation2 + $0x1e4] sm:$0xf]  ;;  %v2232_v40 = vld [vmem:[#allocation2 + $0x1e8] sm:$0xf0] }
 0x157   :  { %v2235_v42 = vor.u32 %v2699_v39, %v2232_v40  ;;  %v2344_v39 = vld [vmem:[#allocation2 + $0x2c8] sm:$0xf0]  ;;  %v2182_v40 = vld [vmem:[#allocation2 + $0x180] sm:$0xf] }
 0x158   :  { %2832 = vtanh.f32 %v590_v58  ;;  %1108 = vmatpush.bf16.msra.mxu1 %v2279_v49  ;;  %v2704_v49 = vld [vmem:[#allocation2 + $0x204] sm:$0xf0] }
 0x159   :  { %1144 = vmatpush.bf16.msra.mxu3 %v2235_v42  ;;  %v2688_v42 = vld [vmem:[#allocation2 + $0x184] sm:$0xf0] }
 0x15b   :  { %v572_v0 = vpop.f32.mrf.mxu1 }
 0x15c   :  { %v573_v3 = vadd.f32 %v572_v0, %v554_v61 }
 0x15d   :  { %v596_v58 = vpop.f32.mrf.mxu2 }
 0x15e   :  { %v592_v5 = vadd.f32 %v591_v57, %v573_v3  ;;  %v2833_v9 = vpop.eup %2832 }
 0x15f   :  { %v607_v20 = vadd.f32 1.0, %v2833_v9 }
 0x160   :  { %2834 = vtanh.f32 %v592_v5 }
 0x161   :  { %2836 = vtanh.f32 %v533_v6  ;;  %v611_v36 = vmul.f32 0.5, %v607_v20  ;;  %v2270_v6 = vld [vmem:[#allocation2 + $0x230] sm:$0xf]  ;;  %v2730_v20 = vld [vmem:[#allocation2 + $0x2d4] sm:$0xf0] }
 0x162   :  { %2838 = vtanh.f32 %v535_v10  ;;  %v2271_v9 = vor.u32 %v2710_v7, %v2270_v6  ;;  %v2732_v10 = vld [vmem:[#allocation2 + $0x2e4] sm:$0xf0]  ;;  %v2722_v6 = vld [vmem:[#allocation2 + $0x294] sm:$0xf0]  ;;  %v2693_v7 = vld [vmem:[#allocation2 + $0x1b4] sm:$0xf] }
 0x163   :  { %v575_v22 = vpop.f32.mrf.mxu1  ;;  %v2359_v12 = vor.u32 %v2732_v10, %v2358_v8  ;;  %v2208_v8 = vld [vmem:[#allocation2 + $0x1b8] sm:$0xf0] }
 0x164   :  { %v576_v26 = vadd.f32 %v575_v22, %v557_v16  ;;  %1109 = vmatpush.bf16.msra.mxu1 %v2271_v9  ;;  %v2262_v16 = vld [vmem:[#allocation2 + $0x220] sm:$0xf]  ;;  %v2351_v22 = vor.u32 %v2730_v20, %v2350_v19  ;;  %v2211_v10 = vor.u32 %v2693_v7, %v2208_v8  ;;  %v2720_v20 = vld [vmem:[#allocation2 + $0x284] sm:$0xf0]  ;;  %v2719_v7 = vld [vmem:[#allocation2 + $0x284] sm:$0xf] }
 0x165   :  { %1125 = vmatpush.bf16.msra.mxu2 %v2359_v12  ;;  %v2731_v12 = vld [vmem:[#allocation2 + $0x2e4] sm:$0xf] }
 0x166   :  { %v2835_v30 = vpop.eup %2834  ;;  %v595_v32 = vadd.f32 %v594_v21, %v576_v26  ;;  %v2263_v21 = vor.u32 %v2708_v18, %v2262_v16  ;;  %v2230_v26 = vld [vmem:[#allocation2 + $0x1e0] sm:$0xf]  ;;  %v2363_v15 = vor.u32 %v2731_v12, %v2360_v13  ;;  %v2312_v12 = vld [vmem:[#allocation2 + $0x288] sm:$0xf0]  ;;  %v2711_v13 = vld [vmem:[#allocation2 + $0x244] sm:$0xf] }
 0x167   :  { %v608_v38 = vadd.f32 1.0, %v2835_v30  ;;  %v2837_v43 = vpop.eup %2836  ;;  %v2254_v30 = vld [vmem:[#allocation2 + $0x210] sm:$0xf]  ;;  %v2198_v16 = vld [vmem:[#allocation2 + $0x1a0] sm:$0xf] }
 0x168   :  { %v2839_v45 = vpop.eup %2838  ;;  %2840 = vtanh.f32 %v595_v32  ;;  %v615_v54 = vmul.f32 %v2837_v43, %v611_v36  ;;  %1110 = vmatpush.bf16.msra.mxu1 %v2263_v21  ;;  %v2231_v32 = vor.u32 %v2700_v29, %v2230_v26  ;;  %v2255_v36 = vor.u32 %v2706_v33, %v2254_v30  ;;  %v2222_v43 = vld [vmem:[#allocation2 + $0x1d0] sm:$0xf]  ;;  %v2310_v18 = vld [vmem:[#allocation2 + $0x280] sm:$0xf]  ;;  %v2691_v21 = vld [vmem:[#allocation2 + $0x1a4] sm:$0xf] }
 0x169   :  { %v612_v44 = vmul.f32 0.5, %v608_v38  ;;  %1126 = vmatpush.bf16.msra.mxu2 %v2351_v22  ;;  %v2343_v38 = vor.u32 %v2728_v35, %v2342_v34  ;;  %v2199_v19 = vor.u32 %v2692_v17, %v2198_v16  ;;  %v2200_v22 = vld [vmem:[#allocation2 + $0x1a8] sm:$0xf0]  ;;  %v2311_v23 = vor.u32 %v2720_v20, %v2310_v18  ;;  %v2352_v26 = vld [vmem:[#allocation2 + $0x2d8] sm:$0xf0] }
 0x16a   :  { %1087 = vmatpush.bf16.msra.mxu0 %v2231_v32  ;;  %v2203_v24 = vor.u32 %v2691_v21, %v2200_v22  ;;  %v2355_v29 = vor.u32 %v2729_v25, %v2352_v26  ;;  %v2190_v30 = vld [vmem:[#allocation2 + $0x190] sm:$0xf]  ;;  %v2690_v32 = vld [vmem:[#allocation2 + $0x194] sm:$0xf0]  ;;  %v2689_v34 = vld [vmem:[#allocation2 + $0x194] sm:$0xf]  ;;  %v2315_v17 = vor.u32 %v2719_v7, %v2312_v12 }
 0x16b   :  { %v577_v52 = vpop.f32.mrf.mxu1  ;;  %v616_v55 = vmul.f32 %v2839_v45, %v612_v44  ;;  %v2698_v44 = vld [vmem:[#allocation2 + $0x1d4] sm:$0xf0]  ;;  %v2246_v45 = vld [vmem:[#allocation2 + $0x200] sm:$0xf]  ;;  %v2191_v33 = vor.u32 %v2690_v32, %v2190_v30  ;;  %v2192_v35 = vld [vmem:[#allocation2 + $0x198] sm:$0xf0] }
 0x16c   :  { %v578_v56 = vadd.f32 %v577_v52, %v559_v47  ;;  %1111 = vmatpush.bf16.msra.mxu1 %v2255_v36  ;;  %v2223_v47 = vor.u32 %v2698_v44, %v2222_v43  ;;  %v2726_v52 = vld [vmem:[#allocation2 + $0x2b4] sm:$0xf0]  ;;  %v2727_v36 = vld [vmem:[#allocation2 + $0x2c4] sm:$0xf]  ;;  %v2183_v44 = vor.u32 %v2688_v42, %v2182_v40  ;;  %v2709_v26 = vld [vmem:[#allocation2 + $0x234] sm:$0xf] }
 0x16d   :  { %v619_v59 = vpack.c.bf16 %v616_v55, %v615_v54  ;;  %1127 = vmatpush.bf16.msra.mxu2 %v2343_v38  ;;  %v2247_v54 = vor.u32 %v2704_v49, %v2246_v45  ;;  %v2335_v55 = vor.u32 %v2726_v52, %v2334_v51  ;;  %v2195_v38 = vor.u32 %v2689_v34, %v2192_v35  ;;  %v2184_v49 = vld [vmem:[#allocation2 + $0x188] sm:$0xf0]  ;;  %v2725_v51 = vld [vmem:[#allocation2 + $0x2b4] sm:$0xf]  ;;  %v3124_v52 = vld [vmem:[%s3280_s6] ss:$0 sm:$0xff] }
 0x16e   :  { %v597_v60 = vadd.f32 %v596_v58, %v578_v56  ;;  %v2841_v57 = vpop.eup %2840  ;;  %v2224_v56 = vld [vmem:[#allocation2 + $0x1d8] sm:$0xf0]  ;;  %1088 = vmatpush.bf16.msra.mxu0 %v2223_v47  ;;  %v2347_v43 = vor.u32 %v2727_v36, %v2344_v39  ;;  %v2687_v47 = vld [vmem:[#allocation2 + $0x184] sm:$0xf]  ;;  %v2264_v35 = vld [vmem:[#allocation2 + $0x228] sm:$0xf0] }
 0x16f   :  { %697 = vmatmul.bf16.vlgmr.msrb.gmra.mxu3 %v619_v59  ;;  %v609_v61 = vadd.f32 1.0, %v2841_v57  ;;  %v2227_v58 = vor.u32 %v2697_v41, %v2224_v56  ;;  %v2214_v59 = vld [vmem:[#allocation2 + $0x1c0] sm:$0xf]  ;;  %v2724_v57 = vld [vmem:[#allocation2 + $0x2a4] sm:$0xf0] }
 0x170   :  { %2842 = vtanh.f32 %v597_v60  ;;  %1112 = vmatpush.bf16.msra.mxu1 %v2247_v54  ;;  %v2696_v60 = vld [vmem:[#allocation2 + $0x1c4] sm:$0xf0]  ;;  %v2187_v54 = vor.u32 %v2687_v47, %v2184_v49  ;;  %v2717_v56 = vld [vmem:[#allocation2 + $0x274] sm:$0xf]  ;;  %v2707_v34 = vld [vmem:[#allocation2 + $0x224] sm:$0xf] }
 0x171   :  { %2844 = vtanh.f32 %v538_v46  ;;  %v613_v62 = vmul.f32 0.5, %v609_v61  ;;  %1128 = vmatpush.bf16.msra.mxu2 %v2335_v55  ;;  %v2326_v46 = vld [vmem:[#allocation2 + $0x2a0] sm:$0xf]  ;;  %1145 = vmatpush.bf16.msra.mxu3 %v2227_v58  ;;  %v2215_v53 = vor.u32 %v2696_v60, %v2214_v59  ;;  %v2216_v61 = vld [vmem:[#allocation2 + $0x1c8] sm:$0xf0]  ;;  %v2267_v40 = vor.u32 %v2707_v34, %v2264_v35 }
 0x172   :  { %2846 = vtanh.f32 %v540_v48  ;;  %v2695_v48 = vld [vmem:[#allocation2 + $0x1c4] sm:$0xf]  ;;  %v2336_v55 = vld [vmem:[#allocation2 + $0x2b8] sm:$0xf0]  ;;  %v2705_v42 = vld [vmem:[#allocation2 + $0x214] sm:$0xf] }
 0x173   :  { %1089 = vmatpush.bf16.msra.mxu0 %v2215_v53  ;;  %v2339_v41 = vor.u32 %v2725_v51, %v2336_v55  ;;  %v2304_v58 = vld [vmem:[#allocation2 + $0x278] sm:$0xf0]  ;;  %v2723_v59 = vld [vmem:[#allocation2 + $0x2a4] sm:$0xf]  ;;  %v2328_v53 = vld [vmem:[#allocation2 + $0x2a8] sm:$0xf0] }
 0x174   :  { %v2740_v34 = vld [vmem:[#allocation5 + $0x68] sm:$0xff] }
 0x176   :  { %v2843_v37 = vpop.eup %2842 }
 0x177   :  { %v610_v63 = vadd.f32 1.0, %v2843_v37  ;;  %v2845_v0 = vpop.eup %2844  ;;  %v2327_v37 = vor.u32 %v2724_v57, %v2326_v46  ;;  %v2307_v46 = vor.u32 %v2717_v56, %v2304_v58  ;;  %v2715_v57 = vld [vmem:[#allocation2 + $0x264] sm:$0xf] }
 0x178   :  { %v2847_v27 = vpop.eup %2846  ;;  %v617_v3 = vmul.f32 %v2845_v0, %v613_v62  ;;  %v2219_v62 = vor.u32 %v2695_v48, %v2216_v61  ;;  %v2368_v0 = vld [vmem:[#allocation2 + $0x2f8] sm:$0xf0]  ;;  %v2296_v48 = vld [vmem:[#allocation2 + $0x268] sm:$0xf0]  ;;  %v2331_v61 = vor.u32 %v2723_v59, %v2328_v53 }
 0x179   :  { %v614_v2 = vmul.f32 0.5, %v610_v63  ;;  %v2733_v63 = vld [vmem:[#allocation2 + $0x2f4] sm:$0xf]  ;;  %1129 = vmatpush.bf16.msra.mxu2 %v2327_v37  ;;  %v2248_v53 = vld [vmem:[#allocation2 + $0x208] sm:$0xf0] }
 0x17a   :  { %1146 = vmatpush.bf16.msra.mxu3 %v2219_v62  ;;  %v2721_v37 = vld [vmem:[#allocation2 + $0x294] sm:$0xf]  ;;  %v2320_v62 = vld [vmem:[#allocation2 + $0x298] sm:$0xf0] }
 0x17b   :  { %v618_v4 = vmul.f32 %v2847_v27, %v614_v2  ;;  %v2371_v2 = vor.u32 %v2733_v63, %v2368_v0  ;;  %v2206_v27 = vld [vmem:[#allocation2 + $0x1b0] sm:$0xf]  ;;  %v2299_v63 = vor.u32 %v2715_v57, %v2296_v48 }
 0x17d   :  { %v620_v5 = vpack.c.bf16 %v618_v4, %v617_v3  ;;  %v2694_v3 = vld [vmem:[#allocation2 + $0x1b4] sm:$0xf0]  ;;  %v2318_v4 = vld [vmem:[#allocation2 + $0x290] sm:$0xf]  ;;  %1181 = vmatpush.bf16.msrb.mxu1 %v2371_v2 }
 0x17e   :  { %v2319_v9 = vor.u32 %v2722_v6, %v2318_v4  ;;  %1147 = vmatpush.bf16.msra.mxu3 %v2211_v10  ;;  %v2288_v6 = vld [vmem:[#allocation2 + $0x258] sm:$0xf0] }
 0x17f   :  { %702 = vmatmul.bf16.gmra.mxu3 %v620_v5  ;;  %v2207_v5 = vor.u32 %v2694_v3, %v2206_v27  ;;  %v2323_v3 = vor.u32 %v2721_v37, %v2320_v62 }
 0x180   :  { %1130 = vmatpush.bf16.msra.mxu2 %v2319_v9 }
 0x181   :  { %1090 = vmatpush.bf16.msra.mxu0 %v2207_v5  ;;  %1182 = vmatpush.bf16.msrb.mxu1 %v2363_v15  ;;  %v2713_v5 = vld [vmem:[#allocation2 + $0x254] sm:$0xf]  ;;  %v2280_v15 = vld [vmem:[#allocation2 + $0x248] sm:$0xf0] }
 0x182   :  { %1148 = vmatpush.bf16.msra.mxu3 %v2203_v24  ;;  %v2291_v10 = vor.u32 %v2713_v5, %v2288_v6 }
 0x184   :  { %1131 = vmatpush.bf16.msra.mxu2 %v2311_v23 }
 0x185   :  { %1091 = vmatpush.bf16.msra.mxu0 %v2199_v19  ;;  %1183 = vmatpush.bf16.msrb.mxu1 %v2355_v29  ;;  %v2283_v19 = vor.u32 %v2711_v13, %v2280_v15  ;;  %v2272_v29 = vld [vmem:[#allocation2 + $0x238] sm:$0xf0] }
 0x186   :  { %1149 = vmatpush.bf16.msra.mxu3 %v2195_v38 }
 0x189   :  { %1092 = vmatpush.bf16.msra.mxu0 %v2191_v33  ;;  %1184 = vmatpush.bf16.msrb.mxu1 %v2347_v43  ;;  %v2275_v33 = vor.u32 %v2709_v26, %v2272_v29  ;;  %v2256_v43 = vld [vmem:[#allocation2 + $0x218] sm:$0xf0] }
 0x18a   :  { %1150 = vmatpush.bf16.msra.mxu3 %v2187_v54  ;;  %v2259_v55 = vor.u32 %v2705_v42, %v2256_v43  ;;  %v2742_v29 = vld [vmem:[#allocation5 + $0x78] sm:$0xff]  ;;  %v2737_v42 = vld [vmem:[#allocation5 + $0x50] sm:$0xff]  ;;  %v2736_v43 = vld [vmem:[#allocation5 + $0x48] sm:$0xff] }
 0x18b   :  { %1292 = vmatpush.bf16.msrb.mxu2 %v2742_v29 }
 0x18d   :  { %1093 = vmatpush.bf16.msra.mxu0 %v2183_v44  ;;  %1185 = vmatpush.bf16.msrb.mxu1 %v2339_v41 }
 0x191   :  { %1162 = vmatpush.bf16.msrb.mxu0 %v2307_v46  ;;  %1186 = vmatpush.bf16.msrb.mxu1 %v2331_v61 }
 0x195   :  { %1163 = vmatpush.bf16.msrb.mxu0 %v2299_v63  ;;  %1187 = vmatpush.bf16.msrb.mxu1 %v2323_v3 }
 0x199   :  { %1164 = vmatpush.bf16.msrb.mxu0 %v2291_v10  ;;  %1188 = vmatpush.bf16.msrb.mxu1 %v2315_v17 }
 0x19d   :  { %1165 = vmatpush.bf16.msrb.mxu0 %v2283_v19 }
 0x1a1   :  { %1166 = vmatpush.bf16.msrb.mxu0 %v2275_v33  ;;  %v2741_v33 = vld [vmem:[#allocation5 + $0x70] sm:$0xff] }
 0x1a2   :  { %1293 = vmatpush.bf16.msrb.mxu2 %v2741_v33 }
 0x1a5   :  { %1167 = vmatpush.bf16.msrb.mxu0 %v2267_v40 }
 0x1a6   :  { %1294 = vmatpush.bf16.msrb.mxu2 %v2740_v34 }
 0x1a9   :  { %1168 = vmatpush.bf16.msrb.mxu0 %v2259_v55 }
 0x1f2   :  { %v698_v45 = vpop.f32.mrf.mxu3 }
 0x1f3   :  { %v3127_v60 = vadd.f32 %v3124_v52, %v698_v45 }
 0x1f5   :  { %v712_v2 = vpack.c.bf16 %v3127_v60, %v3127_v60  ;;  %v737_v20 = vrot.slane %v3127_v60, 2  ;;  %v718_v36 = vrot.slane %v3127_v60, 6 }
 0x1f7   :  { %v770_v8 = vunpack.c.l.b16 %v712_v2 }
 0x1fa   :  { %v700_v0 = vpop.f32.mrf.mxu3 }
 0x1fb   :  { %v3132_v27 = vadd.f32 %v3124_v52, %v700_v0 }
 0x1fd   :  { %v713_v4 = vpack.c.bf16 %v3132_v27, %v3132_v27  ;;  %v738_v16 = vrot.slane %v3132_v27, 2  ;;  %v719_v25 = vrot.slane %v3132_v27, 6 }
 0x1ff   :  { %v771_v9 = vunpack.c.l.b16 %v713_v4  ;;  %v744_v23 = vsel %vm741_vm7, %v737_v20, %v738_v16  ;;  %v725_v45 = vsel %vm722_vm9, %v718_v36, %v719_v25 }
 0x200   :  { %v750_v32 = vpack.c.bf16 %v744_v23, %v744_v23  ;;  %v732_v46 = vpack.c.bf16 %v725_v45, %v725_v45 }
 0x201   :  { %v3137_v18 = vpack.c.b16 %v771_v9, %v770_v8 }
 0x202   :  { %v703_v21 = vpop.f32.mrf.mxu3  ;;  %v782_v49 = vunpack.c.l.b16 %v750_v32  ;;  %v759_v6 = vunpack.c.l.b16 %v732_v46 }
 0x203   :  { %v3142_v22 = vadd.f32 %v3124_v52, %v703_v21  ;;  %1113 = vmatmul.bf16.vlgmr.msra.gmra.mxu1 %v3137_v18 }
 0x205   :  { %v739_v24 = vrot.slane %v3142_v22, 2  ;;  %v714_v54 = vpack.c.bf16 %v3142_v22, %v3142_v22  ;;  %v720_v7 = vrot.slane %v3142_v22, 6 }
 0x207   :  { %v743_v30 = vsel %vm741_vm7, %v738_v16, %v739_v24  ;;  %v772_v57 = vunpack.c.l.b16 %v714_v54  ;;  %v724_v15 = vsel %vm722_vm9, %v719_v25, %v720_v7 }
 0x208   :  { %v747_v38 = vsel %vm736_vm8, %v743_v30, 0.0  ;;  %v729_v17 = vsel %vm716_vm10, %v724_v15, 0.0  ;;  %v2772_v15 = vld [vmem:[#allocation2 + $0x3e4] sm:$0xf0] }
 0x209   :  { %v751_v39 = vpack.c.bf16 %v747_v38, %v747_v38  ;;  %v733_v21 = vpack.c.bf16 %v729_v17, %v729_v17  ;;  %v2739_v38 = vld [vmem:[#allocation5 + $0x60] sm:$0xff] }
 0x20a   :  { %v705_v44 = vpop.f32.mrf.mxu3  ;;  %1295 = vmatpush.bf16.msrb.mxu2 %v2739_v38 }
 0x20b   :  { %v3159_v47 = vadd.f32 %v3124_v52, %v705_v44  ;;  %v783_v51 = vunpack.c.l.b16 %v751_v39  ;;  %v2703_v52 = vld [vmem:[#allocation2 + $0x204] sm:$0xf]  ;;  %v2738_v39 = vld [vmem:[#allocation5 + $0x58] sm:$0xff] }
 0x20c   :  { %v2251_v2 = vor.u32 %v2703_v52, %v2248_v53 }
 0x20d   :  { %v721_v41 = vrot.slane %v3159_v47, 6  ;;  %v740_v56 = vrot.slane %v3159_v47, 2  ;;  %v786_v58 = vpack.c.b16 %v783_v51, %v782_v49  ;;  %v715_v59 = vpack.c.bf16 %v3159_v47, %v3159_v47  ;;  %v2735_v49 = vld [vmem:[#allocation5 + $0x40] sm:$0xff] }
 0x20e   :  { %1169 = vmatpush.bf16.msrb.mxu0 %v2251_v2  ;;  %1296 = vmatpush.bf16.msrb.mxu2 %v2738_v39  ;;  %v2179_v51 = vld [vmem:[%s3278_s4 + $0x2] sm:$0x3] }
 0x20f   :  { %1132 = vmatmul.bf16.vlgmr.msra.gmra.mxu2 %v786_v58  ;;  %v773_v48 = vunpack.c.l.b16 %v715_v59  ;;  %v726_v61 = vsel %vm722_vm9, %v721_v41, %v718_v36  ;;  %v745_v37 = vsel %vm741_vm7, %v740_v56, %v737_v20  ;;  %v742_v3 = vsel %vm741_vm7, %v739_v24, %v740_v56 }
 0x210   :  { %v727_v62 = vsel %vm716_vm10, %v726_v61, 0.0  ;;  %v749_v4 = vsel %vm736_vm8, %v745_v37, 0.0  ;;  %v752_v9 = vpack.c.bf16 %v742_v3, %v742_v3  ;;  %v723_v16 = vsel %vm722_vm9, %v720_v7, %v721_v41  ;;  %v2528_v7 = vld [vmem:[#allocation2 + $0x3f0] sm:$0xf] }
 0x211   :  { %v775_v63 = vpack.c.b16 %v773_v48, %v772_v57  ;;  %v731_v0 = vpack.c.bf16 %v727_v62, %v727_v62  ;;  %v753_v10 = vpack.c.bf16 %v749_v4, %v749_v4  ;;  %v734_v20 = vpack.c.bf16 %v723_v16, %v723_v16 }
 0x212   :  { %v784_v12 = vunpack.c.l.b16 %v752_v9  ;;  %v760_v24 = vunpack.c.l.b16 %v733_v21  ;;  %1297 = vmatpush.bf16.msrb.mxu2 %v2737_v42  ;;  %v843_v54 = vperm.slane %v2179_v51, 1 }
 0x213   :  { %1118 = vmatmul.bf16.gmra.mxu1 %v775_v63  ;;  %v758_v5 = vunpack.c.l.b16 %v731_v0  ;;  %v785_v13 = vunpack.c.l.b16 %v753_v10  ;;  %v761_v23 = vunpack.c.l.b16 %v734_v20  ;;  %v2790_v20 = vld [vmem:[#allocation2 + $0x474] sm:$0xf0] }
 0x215   :  { %v762_v8 = vpack.c.b16 %v759_v6, %v758_v5  ;;  %v787_v19 = vpack.c.b16 %v785_v13, %v784_v12  ;;  %v763_v26 = vpack.c.b16 %v761_v23, %v760_v24  ;;  %v2520_v13 = vld [vmem:[#allocation2 + $0x3e0] sm:$0xf] }
 0x216   :  { %1298 = vmatpush.bf16.msrb.mxu2 %v2736_v43  ;;  %v2521_v17 = vor.u32 %v2772_v15, %v2520_v13  ;;  %v2584_v13 = vld [vmem:[#allocation2 + $0x460] sm:$0xf] }
 0x217   :  { %1094 = vmatmul.bf16.vlgmr.msra.gmra.mxu0 %v762_v8  ;;  %1151 = vmatmul.bf16.vlgmr.msra.gmra.mxu3 %v762_v8  ;;  %v2774_v8 = vld [vmem:[#allocation2 + $0x3f4] sm:$0xf0] }
 0x218   :  { %v2529_v12 = vor.u32 %v2774_v8, %v2528_v7 }
 0x21a   :  { %1299 = vmatpush.bf16.msrb.mxu2 %v2735_v49  ;;  %1699 = vmatpush.bf16.msra.mxu0 %v2529_v12  ;;  %v2768_v49 = vld [vmem:[#allocation2 + $0x3c4] sm:$0xf0]  ;;  %v2766_v12 = vld [vmem:[#allocation2 + $0x3b4] sm:$0xf0] }
 0x21e   :  { %1700 = vmatpush.bf16.msra.mxu0 %v2521_v17 }
 0x21f   :  { %1137 = vmatmul.bf16.gmra.mxu2 %v787_v19 }
 0x223   :  { %1189 = vmatmul.bf16.vlgmr.msrb.gmra.mxu1 %v786_v58  ;;  %v842_v58 = vperm.slane %v2179_v51, 0 }
 0x227   :  { %1099 = vmatmul.bf16.gmra.mxu0 %v763_v26  ;;  %1156 = vmatmul.bf16.gmra.mxu3 %v763_v26  ;;  %v2512_v26 = vld [vmem:[#allocation2 + $0x3d0] sm:$0xf] }
 0x233   :  { %1194 = vmatmul.bf16.gmra.mxu1 %v787_v19  ;;  %v2592_v19 = vld [vmem:[#allocation2 + $0x470] sm:$0xf] }
 0x234   :  { %v2593_v29 = vor.u32 %v2790_v20, %v2592_v19  ;;  %v2464_v19 = vld [vmem:[#allocation2 + $0x370] sm:$0xf]  ;;  %v2758_v20 = vld [vmem:[#allocation2 + $0x374] sm:$0xf0] }
 0x236   :  { %1718 = vmatpush.bf16.msra.mxu1 %v2593_v29 }
 0x237   :  { %1170 = vmatmul.bf16.vlgmr.msrb.gmra.mxu0 %v3137_v18 }
 0x247   :  { %1175 = vmatmul.bf16.gmra.mxu0 %v775_v63 }
 0x280   :  { %v1114_v25 = vpop.f32.mrf.mxu1 }
 0x288   :  { %v1116_v30 = vpop.f32.mrf.mxu1 }
 0x290   :  { %v3186_v35 = vpop.f32.mrf.mxu1 }
 0x292   :  { %v1133_v41 = vpop.f32.mrf.mxu2 }
 0x294   :  { %v1095_v32 = vpop.f32.mrf.mxu0 }
 0x295   :  { %v1096_v57 = vadd.f32 %v1095_v32, %v842_v58 }
 0x297   :  { %v1115_v62 = vadd.f32 %v1114_v25, %v1096_v57  ;;  %v2770_v25 = vld [vmem:[#allocation2 + $0x3d4] sm:$0xf0] }
 0x298   :  { %v3188_v18 = vpop.f32.mrf.mxu1 }
 0x299   :  { %v1134_v6 = vadd.f32 %v1133_v41, %v1115_v62 }
 0x29a   :  { %v1152_v44 = vpop.f32.mrf.mxu3  ;;  %v1135_v63 = vpop.f32.mrf.mxu2 }
 0x29b   :  { %v1153_v56 = vadd.f32 %v1152_v44, %v843_v54  ;;  %v2504_v44 = vld [vmem:[#allocation2 + $0x3c0] sm:$0xf] }
 0x29c   :  { %v1097_v36 = vpop.f32.mrf.mxu0 }
 0x29d   :  { %v1098_v48 = vadd.f32 %v1097_v36, %v842_v58  ;;  %v2513_v36 = vor.u32 %v2770_v25, %v2512_v26  ;;  %v2576_v26 = vld [vmem:[#allocation2 + $0x450] sm:$0xf]  ;;  %v2786_v25 = vld [vmem:[#allocation2 + $0x454] sm:$0xf0] }
 0x29f   :  { %v1117_v2 = vadd.f32 %v1116_v30, %v1098_v48  ;;  %1701 = vmatpush.bf16.msra.mxu0 %v2513_v36  ;;  %v2456_v36 = vld [vmem:[#allocation2 + $0x360] sm:$0xf] }
 0x2a0   :  { %v1190_v55 = vpop.f32.mrf.mxu1 }
 0x2a1   :  { %v1136_v10 = vadd.f32 %v1135_v63, %v1117_v2 }
 0x2a2   :  { %v1154_v59 = vpop.f32.mrf.mxu3  ;;  %v1138_v32 = vpop.f32.mrf.mxu2 }
 0x2a3   :  { %v1155_v37 = vadd.f32 %v1154_v59, %v843_v54 }
 0x2a4   :  { %v1100_v40 = vpop.f32.mrf.mxu0 }
 0x2a5   :  { %v1101_v38 = vadd.f32 %v1100_v40, %v842_v58 }
 0x2a8   :  { %v1192_v61 = vpop.f32.mrf.mxu1 }
 0x2aa   :  { %v1157_v4 = vpop.f32.mrf.mxu3 }
 0x2ab   :  { %v1158_v16 = vadd.f32 %v1157_v4, %v843_v54 }
 0x2ac   :  { %v1102_v45 = vpop.f32.mrf.mxu0 }
 0x2ad   :  { %v1103_v51 = vadd.f32 %v1102_v45, %v842_v58  ;;  %v1140_v58 = vpop.f32.mrf.mxu2 }
 0x2af   :  { %v1122_v40 = vadd.f32 %v3188_v18, %v1103_v51 }
 0x2b0   :  { %v1195_v21 = vpop.f32.mrf.mxu1 }
 0x2b2   :  { %v1159_v39 = vpop.f32.mrf.mxu3 }
 0x2b3   :  { %v1160_v59 = vadd.f32 %v1159_v39, %v843_v54  ;;  %v1141_v54 = vadd.f32 %v1140_v58, %v1122_v40  ;;  %v2480_v39 = vld [vmem:[#allocation2 + $0x390] sm:$0xf] }
 0x2b4   :  { %v1171_v46 = vpop.f32.mrf.mxu0  ;;  %v2560_v40 = vld [vmem:[#allocation2 + $0x430] sm:$0xf] }
 0x2b5   :  { %v1172_v52 = vadd.f32 %v1171_v46, %v1153_v56  ;;  %v2505_v46 = vor.u32 %v2768_v49, %v2504_v44  ;;  %v2568_v44 = vld [vmem:[#allocation2 + $0x440] sm:$0xf]  ;;  %v2784_v49 = vld [vmem:[#allocation2 + $0x444] sm:$0xf0] }
 0x2b7   :  { %v1191_v53 = vadd.f32 %v1190_v55, %v1172_v52  ;;  %v1120_v52 = vadd.f32 %v3186_v35, %v1101_v38  ;;  %1702 = vmatpush.bf16.msra.mxu0 %v2505_v46  ;;  %v2756_v38 = vld [vmem:[#allocation2 + $0x364] sm:$0xf0]  ;;  %v2448_v46 = vld [vmem:[#allocation2 + $0x350] sm:$0xf] }
 0x2b9   :  { %2848 = vtanh.f32 %v1191_v53  ;;  %v1139_v45 = vadd.f32 %v1138_v32, %v1120_v52  ;;  %v2757_v32 = vld [vmem:[#allocation2 + $0x374] sm:$0xf]  ;;  %v2754_v52 = vld [vmem:[#allocation2 + $0x354] sm:$0xf0] }
 0x2bc   :  { %v1173_v0 = vpop.f32.mrf.mxu0 }
 0x2bd   :  { %v1174_v3 = vadd.f32 %v1173_v0, %v1155_v37  ;;  %v1197_v37 = vpop.f32.mrf.mxu1 }
 0x2bf   :  { %v1193_v5 = vadd.f32 %v1192_v61, %v1174_v3  ;;  %v2849_v9 = vpop.eup %2848 }
 0x2c0   :  { %v1208_v23 = vadd.f32 1.0, %v2849_v9 }
 0x2c1   :  { %2850 = vtanh.f32 %v1193_v5 }
 0x2c2   :  { %2852 = vtanh.f32 %v1134_v6  ;;  %v1212_v42 = vmul.f32 0.5, %v1208_v23  ;;  %v2465_v23 = vor.u32 %v2758_v20, %v2464_v19  ;;  %v2434_v19 = vld [vmem:[#allocation2 + $0x338] sm:$0xf0] }
 0x2c3   :  { %2854 = vtanh.f32 %v1136_v10  ;;  %v2496_v10 = vld [vmem:[#allocation2 + $0x3b0] sm:$0xf] }
 0x2c4   :  { %v1176_v24 = vpop.f32.mrf.mxu0  ;;  %v2497_v15 = vor.u32 %v2766_v12, %v2496_v10  ;;  %1680 = vmatpush.bf16.msrb.mxu3 %v2465_v23  ;;  %v2432_v10 = vld [vmem:[#allocation2 + $0x330] sm:$0xf]  ;;  %v2750_v12 = vld [vmem:[#allocation2 + $0x334] sm:$0xf0]  ;;  %v2787_v23 = vld [vmem:[#allocation2 + $0x464] sm:$0xf] }
 0x2c5   :  { %v1177_v30 = vadd.f32 %v1176_v24, %v1158_v16  ;;  %v2788_v16 = vld [vmem:[#allocation2 + $0x464] sm:$0xf0] }
 0x2c6   :  { %v2585_v17 = vor.u32 %v2788_v16, %v2584_v13  ;;  %1703 = vmatpush.bf16.msra.mxu0 %v2497_v15  ;;  %v2764_v24 = vld [vmem:[#allocation2 + $0x3a4] sm:$0xf0]  ;;  %v2544_v13 = vld [vmem:[#allocation2 + $0x410] sm:$0xf]  ;;  %v2433_v15 = vor.u32 %v2750_v12, %v2432_v10  ;;  %v2778_v16 = vld [vmem:[#allocation2 + $0x414] sm:$0xf0] }
 0x2c7   :  { %v2851_v33 = vpop.eup %2850  ;;  %v1196_v34 = vadd.f32 %v1195_v21, %v1177_v30  ;;  %v2488_v21 = vld [vmem:[#allocation2 + $0x3a0] sm:$0xf]  ;;  %v2577_v30 = vor.u32 %v2786_v25, %v2576_v26  ;;  %v2545_v20 = vor.u32 %v2778_v16, %v2544_v13  ;;  %v2777_v12 = vld [vmem:[#allocation2 + $0x414] sm:$0xf]  ;;  %v2546_v13 = vld [vmem:[#allocation2 + $0x418] sm:$0xf0] }
 0x2c8   :  { %v1209_v43 = vadd.f32 1.0, %v2851_v33  ;;  %v2853_v55 = vpop.eup %2852  ;;  %1719 = vmatpush.bf16.msra.mxu1 %v2585_v17  ;;  %v2489_v29 = vor.u32 %v2764_v24, %v2488_v21  ;;  %v2466_v33 = vld [vmem:[#allocation2 + $0x378] sm:$0xf0]  ;;  %v2749_v17 = vld [vmem:[#allocation2 + $0x334] sm:$0xf] }
 0x2c9   :  { %v2855_v56 = vpop.eup %2854  ;;  %2856 = vtanh.f32 %v1196_v34  ;;  %v1216_v53 = vmul.f32 %v2853_v55, %v1212_v42  ;;  %v2469_v34 = vor.u32 %v2757_v32, %v2466_v33  ;;  %v2457_v42 = vor.u32 %v2756_v38, %v2456_v36  ;;  %v2586_v24 = vld [vmem:[#allocation2 + $0x468] sm:$0xf0]  ;;  %v2424_v25 = vld [vmem:[#allocation2 + $0x320] sm:$0xf]  ;;  %v2776_v33 = vld [vmem:[#allocation2 + $0x404] sm:$0xf0] }
 0x2ca   :  { %v1213_v41 = vmul.f32 0.5, %v1209_v43  ;;  %1704 = vmatpush.bf16.msra.mxu0 %v2489_v29  ;;  %v2762_v43 = vld [vmem:[#allocation2 + $0x394] sm:$0xf0]  ;;  %v2569_v55 = vor.u32 %v2784_v49, %v2568_v44  ;;  %v2437_v21 = vor.u32 %v2749_v17, %v2434_v19  ;;  %v2589_v26 = vor.u32 %v2787_v23, %v2586_v24  ;;  %v2748_v29 = vld [vmem:[#allocation2 + $0x324] sm:$0xf0] }
 0x2cb   :  { %1737 = vmatpush.bf16.msra.mxu2 %v2469_v34  ;;  %v2481_v51 = vor.u32 %v2762_v43, %v2480_v39  ;;  %1681 = vmatpush.bf16.msrb.mxu3 %v2457_v42  ;;  %v2425_v32 = vor.u32 %v2748_v29, %v2424_v25  ;;  %v2747_v34 = vld [vmem:[#allocation2 + $0x324] sm:$0xf]  ;;  %v2426_v36 = vld [vmem:[#allocation2 + $0x328] sm:$0xf0]  ;;  %v2785_v42 = vld [vmem:[#allocation2 + $0x454] sm:$0xf]  ;;  %v2549_v17 = vor.u32 %v2777_v12, %v2546_v13 }
 0x2cc   :  { %v1217_v57 = vmul.f32 %v2855_v56, %v1213_v41  ;;  %v1178_v48 = vpop.f32.mrf.mxu0  ;;  %1720 = vmatpush.bf16.msra.mxu1 %v2577_v30  ;;  %v2755_v41 = vld [vmem:[#allocation2 + $0x364] sm:$0xf]  ;;  %v2458_v56 = vld [vmem:[#allocation2 + $0x368] sm:$0xf0]  ;;  %v2536_v30 = vld [vmem:[#allocation2 + $0x400] sm:$0xf]  ;;  %v2429_v39 = vor.u32 %v2747_v34, %v2426_v36  ;;  %v709_v19 = vadd.f32 %v3132_v27, %v3051_v11 }
 0x2cd   :  { %v1179_v61 = vadd.f32 %v1178_v48, %v1160_v59  ;;  %v2461_v59 = vor.u32 %v2755_v41, %v2458_v56  ;;  %v2760_v48 = vld [vmem:[#allocation2 + $0x384] sm:$0xf0]  ;;  %v2537_v38 = vor.u32 %v2776_v33, %v2536_v30  ;;  %v2578_v43 = vld [vmem:[#allocation2 + $0x458] sm:$0xf0]  ;;  %v3198_v44 = vld [vmem:[%s3280_s6 + $0x1] ss:$0 sm:$0xff] }
 0x2ce   :  { %v1220_v62 = vpack.c.bf16 %v1217_v57, %v1216_v53  ;;  %1705 = vmatpush.bf16.msra.mxu0 %v2481_v51  ;;  %v2472_v53 = vld [vmem:[#allocation2 + $0x380] sm:$0xf]  ;;  %v2449_v57 = vor.u32 %v2754_v52, %v2448_v46  ;;  %v2581_v49 = vor.u32 %v2785_v42, %v2578_v43  ;;  %v2416_v51 = vld [vmem:[#allocation2 + $0x310] sm:$0xf]  ;;  %v2745_v41 = vld [vmem:[#allocation2 + $0x314] sm:$0xf] }
 0x2cf   :  { %v1198_v63 = vadd.f32 %v1197_v37, %v1179_v61  ;;  %v2857_v0 = vpop.eup %2856  ;;  %1738 = vmatpush.bf16.msra.mxu2 %v2461_v59  ;;  %v2782_v61 = vld [vmem:[#allocation2 + $0x434] sm:$0xf0]  ;;  %v2473_v37 = vor.u32 %v2760_v48, %v2472_v53  ;;  %v2418_v59 = vld [vmem:[#allocation2 + $0x318] sm:$0xf0]  ;;  %v2783_v46 = vld [vmem:[#allocation2 + $0x444] sm:$0xf] }
 0x2d0   :  { %1300 = vmatmul.bf16.vlgmr.msrb.gmra.mxu2 %v1220_v62  ;;  %v1210_v2 = vadd.f32 1.0, %v2857_v0  ;;  %1721 = vmatpush.bf16.msra.mxu1 %v2569_v55  ;;  %v2561_v62 = vor.u32 %v2782_v61, %v2560_v40  ;;  %v2440_v0 = vld [vmem:[#allocation2 + $0x340] sm:$0xf]  ;;  %v2746_v55 = vld [vmem:[#allocation2 + $0x314] sm:$0xf0]  ;;  %v2421_v53 = vor.u32 %v2745_v41, %v2418_v59 }
 0x2d1   :  { %2858 = vtanh.f32 %v1198_v63  ;;  %v2753_v63 = vld [vmem:[#allocation2 + $0x354] sm:$0xf]  ;;  %1682 = vmatpush.bf16.msrb.mxu3 %v2449_v57  ;;  %v2417_v56 = vor.u32 %v2746_v55, %v2416_v51  ;;  %v2570_v52 = vld [vmem:[#allocation2 + $0x448] sm:$0xf0]  ;;  %v2408_v48 = vld [vmem:[#allocation2 + $0x300] sm:$0xf] }
 0x2d2   :  { %2860 = vtanh.f32 %v1139_v45  ;;  %v1214_v3 = vmul.f32 0.5, %v1210_v2  ;;  %v2450_v45 = vld [vmem:[#allocation2 + $0x358] sm:$0xf0]  ;;  %1706 = vmatpush.bf16.msra.mxu0 %v2473_v37  ;;  %v2552_v2 = vld [vmem:[#allocation2 + $0x420] sm:$0xf]  ;;  %v2573_v57 = vor.u32 %v2783_v46, %v2570_v52 }
 0x2d3   :  { %2862 = vtanh.f32 %v1141_v54  ;;  %v2453_v58 = vor.u32 %v2753_v63, %v2450_v45  ;;  %v2752_v54 = vld [vmem:[#allocation2 + $0x344] sm:$0xf0]  ;;  %v2410_v63 = vld [vmem:[#allocation2 + $0x308] sm:$0xf0]  ;;  %v2781_v45 = vld [vmem:[#allocation2 + $0x434] sm:$0xf] }
 0x2d4   :  { %1722 = vmatpush.bf16.msra.mxu1 %v2561_v62  ;;  %v2744_v40 = vld [vmem:[#allocation2 + $0x304] sm:$0xf0]  ;;  %v2743_v62 = vld [vmem:[#allocation2 + $0x304] sm:$0xf]  ;;  %v2769_v23 = vld [vmem:[#allocation2 + $0x3d4] sm:$0xf] }
 0x2d5   :  { %1739 = vmatpush.bf16.msra.mxu2 %v2453_v58  ;;  %v2409_v61 = vor.u32 %v2744_v40, %v2408_v48  ;;  %v2514_v24 = vld [vmem:[#allocation2 + $0x3d8] sm:$0xf0]  ;;  %v2767_v33 = vld [vmem:[#allocation2 + $0x3c4] sm:$0xf]  ;;  %v2506_v34 = vld [vmem:[#allocation2 + $0x3c8] sm:$0xf0] }
 0x2d6   :  { %v2517_v30 = vor.u32 %v2769_v23, %v2514_v24  ;;  %v2509_v11 = vor.u32 %v2767_v33, %v2506_v34  ;;  %v2498_v59 = vld [vmem:[#allocation2 + $0x3b8] sm:$0xf0]  ;;  %v2490_v48 = vld [vmem:[#allocation2 + $0x3a8] sm:$0xf0] }
 0x2d7   :  { %v2859_v35 = vpop.eup %2858  ;;  %v2796_v34 = vld [vmem:[#allocation5 + $0xa8] sm:$0xff] }
 0x2d8   :  { %v1211_v4 = vadd.f32 1.0, %v2859_v35  ;;  %v2861_v5 = vpop.eup %2860  ;;  %v2441_v35 = vor.u32 %v2752_v54, %v2440_v0  ;;  %v2413_v0 = vor.u32 %v2743_v62, %v2410_v63  ;;  %v2562_v54 = vld [vmem:[#allocation2 + $0x438] sm:$0xf0]  ;;  %v711_v63 = vadd.f32 %v3159_v47, %v3085_v50 }
 0x2d9   :  { %v2863_v18 = vpop.eup %2862  ;;  %v1218_v7 = vmul.f32 %v2861_v5, %v1214_v3  ;;  %v2780_v3 = vld [vmem:[#allocation2 + $0x424] sm:$0xf0]  ;;  %v2442_v5 = vld [vmem:[#allocation2 + $0x348] sm:$0xf0] }
 0x2da   :  { %v1215_v6 = vmul.f32 0.5, %v1211_v4  ;;  %v2751_v4 = vld [vmem:[#allocation2 + $0x344] sm:$0xf]  ;;  %1683 = vmatpush.bf16.msrb.mxu3 %v2441_v35  ;;  %v2565_v35 = vor.u32 %v2781_v45, %v2562_v54 }
 0x2dc   :  { %v1219_v8 = vmul.f32 %v2863_v18, %v1215_v6  ;;  %v2553_v6 = vor.u32 %v2780_v3, %v2552_v2  ;;  %v2445_v18 = vor.u32 %v2751_v4, %v2442_v5  ;;  %v708_v2 = vadd.f32 %v3127_v60, %v3048_v1  ;;  %v2773_v4 = vld [vmem:[#allocation2 + $0x3f4] sm:$0xf]  ;;  %v2530_v5 = vld [vmem:[#allocation2 + $0x3f8] sm:$0xf0] }
 0x2de   :  { %v1221_v9 = vpack.c.bf16 %v1219_v8, %v1218_v7  ;;  %v2789_v7 = vld [vmem:[#allocation2 + $0x474] sm:$0xf]  ;;  %v2594_v8 = vld [vmem:[#allocation2 + $0x478] sm:$0xf0]  ;;  %1723 = vmatpush.bf16.msra.mxu1 %v2553_v6  ;;  %1740 = vmatpush.bf16.msra.mxu2 %v2445_v18  ;;  %v2779_v6 = vld [vmem:[#allocation2 + $0x424] sm:$0xf]  ;;  %v2533_v18 = vor.u32 %v2773_v4, %v2530_v5 }
 0x2df   :  { %1684 = vmatpush.bf16.msrb.mxu3 %v2433_v15 }
 0x2e0   :  { %1305 = vmatmul.bf16.gmra.mxu2 %v1221_v9  ;;  %v2597_v9 = vor.u32 %v2789_v7, %v2594_v8  ;;  %v2554_v7 = vld [vmem:[#allocation2 + $0x428] sm:$0xf0]  ;;  %v2771_v8 = vld [vmem:[#allocation2 + $0x3e4] sm:$0xf] }
 0x2e1   :  { %v2557_v10 = vor.u32 %v2779_v6, %v2554_v7  ;;  %v2474_v7 = vld [vmem:[#allocation2 + $0x388] sm:$0xf0] }
 0x2e2   :  { %1775 = vmatpush.bf16.msrb.mxu0 %v2597_v9  ;;  %1724 = vmatpush.bf16.msra.mxu1 %v2545_v20  ;;  %v2522_v9 = vld [vmem:[#allocation2 + $0x3e8] sm:$0xf0] }
 0x2e3   :  { %1741 = vmatpush.bf16.msra.mxu2 %v2437_v21  ;;  %1685 = vmatpush.bf16.msrb.mxu3 %v2425_v32  ;;  %v2525_v15 = vor.u32 %v2771_v8, %v2522_v9  ;;  %v2538_v32 = vld [vmem:[#allocation2 + $0x408] sm:$0xf0] }
 0x2e6   :  { %1776 = vmatpush.bf16.msrb.mxu0 %v2589_v26  ;;  %1725 = vmatpush.bf16.msra.mxu1 %v2537_v38  ;;  %v2775_v26 = vld [vmem:[#allocation2 + $0x404] sm:$0xf] }
 0x2e7   :  { %1742 = vmatpush.bf16.msra.mxu2 %v2429_v39  ;;  %1686 = vmatpush.bf16.msrb.mxu3 %v2417_v56  ;;  %v2541_v38 = vor.u32 %v2775_v26, %v2538_v32  ;;  %v2765_v56 = vld [vmem:[#allocation2 + $0x3b4] sm:$0xf] }
 0x2ea   :  { %1777 = vmatpush.bf16.msrb.mxu0 %v2581_v49  ;;  %v710_v49 = vadd.f32 %v3142_v22, %v3068_v31 }
 0x2eb   :  { %1743 = vmatpush.bf16.msra.mxu2 %v2421_v53  ;;  %1687 = vmatpush.bf16.msrb.mxu3 %v2409_v61  ;;  %v2501_v53 = vor.u32 %v2765_v56, %v2498_v59  ;;  %v2761_v61 = vld [vmem:[#allocation2 + $0x394] sm:$0xf]  ;;  %v2791_v59 = vld [vmem:[#allocation5 + $0x80] sm:$0xff] }
 0x2ee   :  { %1778 = vmatpush.bf16.msrb.mxu0 %v2573_v57  ;;  %v2763_v57 = vld [vmem:[#allocation2 + $0x3a4] sm:$0xf] }
 0x2ef   :  { %1744 = vmatpush.bf16.msra.mxu2 %v2413_v0  ;;  %1756 = vmatpush.bf16.msra.mxu3 %v2533_v18  ;;  %v2493_v40 = vor.u32 %v2763_v57, %v2490_v48  ;;  %v2759_v18 = vld [vmem:[#allocation2 + $0x384] sm:$0xf] }
 0x2f0   :  { %v2477_v12 = vor.u32 %v2759_v18, %v2474_v7 }
 0x2f2   :  { %1779 = vmatpush.bf16.msrb.mxu0 %v2565_v35 }
 0x2f3   :  { %1757 = vmatpush.bf16.msra.mxu3 %v2525_v15 }
 0x2f6   :  { %1780 = vmatpush.bf16.msrb.mxu0 %v2557_v10 }
 0x2f7   :  { %1758 = vmatpush.bf16.msra.mxu3 %v2517_v30  ;;  %v2798_v30 = vld [vmem:[#allocation5 + $0xb8] sm:$0xff] }
 0x2f8   :  { %1886 = vmatpush.bf16.msrb.mxu1 %v2798_v30  ;;  %2810 = vmatpush.bf16.msrb.mxu2 %v2798_v30 }
 0x2fa   :  { %1781 = vmatpush.bf16.msrb.mxu0 %v2549_v17 }
 0x2fb   :  { %1759 = vmatpush.bf16.msra.mxu3 %v2509_v11  ;;  %v2795_v11 = vld [vmem:[#allocation5 + $0xa0] sm:$0xff] }
 0x2fc   :  { %1887 = vmatpush.bf16.msrb.mxu1 %v2797_v14  ;;  %2811 = vmatpush.bf16.msrb.mxu2 %v2797_v14 }
 0x2fe   :  { %1782 = vmatpush.bf16.msrb.mxu0 %v2541_v38 }
 0x2ff   :  { %1760 = vmatpush.bf16.msra.mxu3 %v2501_v53 }
 0x300   :  { %1888 = vmatpush.bf16.msrb.mxu1 %v2796_v34  ;;  %2812 = vmatpush.bf16.msrb.mxu2 %v2796_v34 }
 0x303   :  { %1761 = vmatpush.bf16.msra.mxu3 %v2493_v40 }
 0x304   :  { %1889 = vmatpush.bf16.msrb.mxu1 %v2795_v11  ;;  %2813 = vmatpush.bf16.msrb.mxu2 %v2795_v11 }
 0x353   :  { %v1301_v37 = vpop.f32.mrf.mxu2 }
 0x354   :  { %v3201_v58 = vadd.f32 %v3198_v44, %v1301_v37  ;;  %v2482_v37 = vld [vmem:[#allocation2 + $0x398] sm:$0xf0] }
 0x356   :  { %v3206_v3 = vadd.f32 %v3201_v58, %v708_v2  ;;  %v1315_v60 = vpack.c.bf16 %v3201_v58, %v3201_v58  ;;  %v1321_v27 = vrot.slane %v3201_v58, 4  ;;  %v2485_v2 = vor.u32 %v2761_v61, %v2482_v37 }
 0x358   :  { %v1364_v25 = vunpack.c.l.b16 %v1315_v60  ;;  %1762 = vmatpush.bf16.msra.mxu3 %v2485_v2 }
 0x35b   :  { %v1303_v1 = vpop.f32.mrf.mxu2 }
 0x35c   :  { %v1304_v16 = vadd.f32 %v3198_v44, %v1303_v1  ;;  %1763 = vmatpush.bf16.msra.mxu3 %v2477_v12 }
 0x35e   :  { %v1316_v20 = vpack.c.bf16 %v1304_v16, %v1304_v16  ;;  %v3213_v21 = vadd.f32 %v1304_v16, %v709_v19  ;;  %v1322_v36 = vrot.slane %v1304_v16, 4 }
 0x360   :  { %v1365_v29 = vunpack.c.l.b16 %v1316_v20  ;;  %v1328_v51 = vsel %vm1325_vm11, %v1321_v27, %v1322_v36 }
 0x361   :  { %v1335_v46 = vpack.c.bf16 %v1328_v51, %v1328_v51 }
 0x362   :  { %v3216_v39 = vpack.c.b16 %v1365_v29, %v1364_v25 }
 0x363   :  { %v1306_v42 = vpop.f32.mrf.mxu2  ;;  %v1353_v58 = vunpack.c.l.b16 %v1335_v46 }
 0x364   :  { %v1307_v43 = vadd.f32 %v3198_v44, %v1306_v42  ;;  %1707 = vmatmul.bf16.vlgmr.msra.gmra.mxu0 %v3216_v39  ;;  %v2793_v42 = vld [vmem:[#allocation5 + $0x90] sm:$0xff] }
 0x366   :  { %v1323_v55 = vrot.slane %v1307_v43, 4  ;;  %v3226_v41 = vadd.f32 %v1307_v43, %v710_v49  ;;  %v1317_v54 = vpack.c.bf16 %v1307_v43, %v1307_v43  ;;  %v2792_v49 = vld [vmem:[#allocation5 + $0x88] sm:$0xff] }
 0x368   :  { %v1327_v52 = vsel %vm1325_vm11, %v1322_v36, %v1323_v55  ;;  %v1366_v9 = vunpack.c.l.b16 %v1317_v54 }
 0x369   :  { %v1341_v31 = vsel %vm1339_vm12, %v1327_v52, 0.0  ;;  %v1332_v23 = vsel %vm1319_vm13, %v1327_v52, 0.0 }
 0x36a   :  { %v1345_v22 = vpack.c.bf16 %v1341_v31, %v1341_v31  ;;  %v1336_v26 = vpack.c.bf16 %v1332_v23, %v1332_v23 }
 0x36b   :  { %v1308_v62 = vpop.f32.mrf.mxu2 }
 0x36c   :  { %v1309_v45 = vadd.f32 %v3198_v44, %v1308_v62  ;;  %v1377_v0 = vunpack.c.l.b16 %v1345_v22  ;;  %v1354_v25 = vunpack.c.l.b16 %v1336_v26 }
 0x36e   :  { %v1324_v35 = vrot.slane %v1309_v45, 4  ;;  %v1380_v4 = vpack.c.b16 %v1377_v0, %v1353_v58  ;;  %v1318_v5 = vpack.c.bf16 %v1309_v45, %v1309_v45  ;;  %v3235_v6 = vadd.f32 %v1309_v45, %v711_v63 }
 0x370   :  { %v1329_v8 = vsel %vm1325_vm11, %v1324_v35, %v1321_v27  ;;  %1726 = vmatmul.bf16.vlgmr.msra.gmra.mxu1 %v1380_v4  ;;  %v1367_v50 = vunpack.c.l.b16 %v1318_v5  ;;  %v1326_v13 = vsel %vm1325_vm11, %v1323_v55, %v1324_v35  ;;  %v2405_v55 = vld [vmem:[%s3278_s4 + $0x4] sm:$0x3] }
 0x371   :  { %v1330_v47 = vsel %vm1319_vm13, %v1329_v8, 0.0  ;;  %v1343_v15 = vsel %vm1339_vm12, %v1329_v8, 0.0  ;;  %v1337_v16 = vpack.c.bf16 %v1326_v13, %v1326_v13  ;;  %v1437_v46 = vperm.slane %v2405_v55, 1 }
 0x372   :  { %v1369_v44 = vpack.c.b16 %v1367_v50, %v1366_v9  ;;  %v1334_v10 = vpack.c.bf16 %v1330_v47, %v1330_v47  ;;  %v1347_v17 = vpack.c.bf16 %v1343_v15, %v1343_v15  ;;  %v1436_v48 = vperm.slane %v2405_v55, 0 }
 0x373   :  { %v1355_v19 = vunpack.c.l.b16 %v1337_v16 }
 0x374   :  { %1712 = vmatmul.bf16.gmra.mxu0 %v1369_v44  ;;  %v1352_v1 = vunpack.c.l.b16 %v1334_v10  ;;  %v1379_v20 = vunpack.c.l.b16 %v1347_v17 }
 0x375   :  { %v1357_v28 = vpack.c.b16 %v1355_v19, %v1354_v25 }
 0x376   :  { %v1356_v60 = vpack.c.b16 %v1353_v58, %v1352_v1  ;;  %v1381_v24 = vpack.c.b16 %v1379_v20, %v1355_v19 }
 0x378   :  { %1688 = vmatmul.bf16.vlgmr.msrb.gmra.mxu3 %v1356_v60  ;;  %1745 = vmatmul.bf16.vlgmr.msra.gmra.mxu2 %v1356_v60 }
 0x380   :  { %1731 = vmatmul.bf16.gmra.mxu1 %v1381_v24 }
 0x384   :  { %1783 = vmatmul.bf16.vlgmr.msrb.gmra.mxu0 %v1380_v4 }
 0x388   :  { %1693 = vmatmul.bf16.gmra.mxu3 %v1357_v28  ;;  %1750 = vmatmul.bf16.gmra.mxu2 %v1357_v28 }
 0x394   :  { %1788 = vmatmul.bf16.gmra.mxu0 %v1381_v24 }
 0x398   :  { %1764 = vmatmul.bf16.vlgmr.msra.gmra.mxu3 %v3216_v39  ;;  %v2794_v39 = vld [vmem:[#allocation5 + $0x98] sm:$0xff] }
 0x399   :  { %1890 = vmatpush.bf16.msrb.mxu1 %v2794_v39  ;;  %2814 = vmatpush.bf16.msrb.mxu2 %v2794_v39 }
 0x39d   :  { %1891 = vmatpush.bf16.msrb.mxu1 %v2793_v42  ;;  %2815 = vmatpush.bf16.msrb.mxu2 %v2793_v42 }
 0x3a1   :  { %1892 = vmatpush.bf16.msrb.mxu1 %v2792_v49  ;;  %2816 = vmatpush.bf16.msrb.mxu2 %v2792_v49 }
 0x3a5   :  { %1893 = vmatpush.bf16.msrb.mxu1 %v2791_v59  ;;  %2817 = vmatpush.bf16.msrb.mxu2 %v2791_v59 }
 0x3a8   :  { %1769 = vmatmul.bf16.gmra.mxu3 %v1369_v44 }
 0x3e1   :  { %v1708_v29 = vpop.f32.mrf.mxu0 }
 0x3e9   :  { %v1710_v32 = vpop.f32.mrf.mxu0 }
 0x3ed   :  { %v1727_v53 = vpop.f32.mrf.mxu1 }
 0x3f1   :  { %v3249_v36 = vpop.f32.mrf.mxu0 }
 0x3f5   :  { %v1729_v58 = vpop.f32.mrf.mxu1 }
 0x3f9   :  { %v1715_v43 = vpop.f32.mrf.mxu0 }
 0x3fb   :  { %v1689_v33 = vpop.f32.mrf.mxu3  ;;  %v1746_v51 = vpop.f32.mrf.mxu2 }
 0x3fc   :  { %v1747_v57 = vadd.f32 %v1746_v51, %v1437_v46  ;;  %v1690_v37 = vadd.f32 %v1689_v33, %v1436_v48 }
 0x3fd   :  { %v1732_v12 = vpop.f32.mrf.mxu1 }
 0x3fe   :  { %v1709_v0 = vadd.f32 %v1708_v29, %v1690_v37 }
 0x400   :  { %v1728_v18 = vadd.f32 %v1727_v53, %v1709_v0 }
 0x401   :  { %v1784_v52 = vpop.f32.mrf.mxu0 }
 0x403   :  { %v1691_v38 = vpop.f32.mrf.mxu3  ;;  %v1748_v31 = vpop.f32.mrf.mxu2 }
 0x404   :  { %v1692_v62 = vadd.f32 %v1691_v38, %v1436_v48  ;;  %v1749_v45 = vadd.f32 %v1748_v31, %v1437_v46 }
 0x405   :  { %v1734_v11 = vpop.f32.mrf.mxu1 }
 0x406   :  { %v1711_v2 = vadd.f32 %v1710_v32, %v1692_v62 }
 0x408   :  { %v1730_v8 = vadd.f32 %v1729_v58, %v1711_v2 }
 0x409   :  { %v1786_v63 = vpop.f32.mrf.mxu0 }
 0x40b   :  { %v1694_v27 = vpop.f32.mrf.mxu3  ;;  %v1751_v4 = vpop.f32.mrf.mxu2 }
 0x40c   :  { %v1752_v9 = vadd.f32 %v1751_v4, %v1437_v46  ;;  %v1695_v1 = vadd.f32 %v1694_v27, %v1436_v48 }
 0x40e   :  { %v1714_v25 = vadd.f32 %v3249_v36, %v1695_v1 }
 0x410   :  { %v1733_v39 = vadd.f32 %v1732_v12, %v1714_v25 }
 0x411   :  { %v1789_v50 = vpop.f32.mrf.mxu0 }
 0x413   :  { %v1696_v56 = vpop.f32.mrf.mxu3  ;;  %v1753_v60 = vpop.f32.mrf.mxu2 }
 0x414   :  { %v1697_v19 = vadd.f32 %v1696_v56, %v1436_v48  ;;  %v1754_v26 = vadd.f32 %v1753_v60, %v1437_v46 }
 0x416   :  { %v1716_v32 = vadd.f32 %v1715_v43, %v1697_v19 }
 0x418   :  { %v1735_v42 = vadd.f32 %v1734_v11, %v1716_v32 }
 0x419   :  { %v1791_v14 = vpop.f32.mrf.mxu0 }
 0x41b   :  { %v1765_v22 = vpop.f32.mrf.mxu3 }
 0x41c   :  { %v1766_v40 = vadd.f32 %v1765_v22, %v1747_v57  ;;  %v2829_v57 = vld [vmem:[%s3280_s6 + $0x2] ss:$0 sm:$0xff]  ;;  %s2965_s6 = smov [#allocation7]  }
 0x41e   :  { %v1785_v61 = vadd.f32 %v1784_v52, %v1766_v40  ;;  %v2830_v40 = vld [vmem:[%s3281_s7] ss:$0 sm:$0xff]  ;;  %s1937_s7 = sshll.u32 %s2965_s6, 4  ;;  %s1938_s7 = int_to_ptr.vmem [resolvable:$true] %s1937_s7 }
 0x420   :  { %2864 = vtanh.f32 %v1785_v61 }
 0x423   :  { %v1767_v54 = vpop.f32.mrf.mxu3 }
 0x424   :  { %v1768_v35 = vadd.f32 %v1767_v54, %v1749_v45 }
 0x426   :  { %v1787_v5 = vadd.f32 %v1786_v63, %v1768_v35  ;;  %v2865_v7 = vpop.eup %2864  ;;  %v2831_v63 = vld [vmem:[%s3282_s8] ss:$0 sm:$0xff] }
 0x427   :  { %v1802_v47 = vadd.f32 1.0, %v2865_v7 }
 0x428   :  { %2866 = vtanh.f32 %v1787_v5 }
 0x429   :  { %2868 = vtanh.f32 %v1728_v18  ;;  %v1806_v16 = vmul.f32 0.5, %v1802_v47 }
 0x42a   :  { %2870 = vtanh.f32 %v1730_v8 }
 0x42b   :  { %v1770_v44 = vpop.f32.mrf.mxu3 }
 0x42c   :  { %v1771_v10 = vadd.f32 %v1770_v44, %v1752_v9 }
 0x42e   :  { %v2867_v13 = vpop.eup %2866  ;;  %v1790_v15 = vadd.f32 %v1789_v50, %v1771_v10 }
 0x42f   :  { %v1803_v17 = vadd.f32 1.0, %v2867_v13  ;;  %v2869_v20 = vpop.eup %2868 }
 0x430   :  { %v2871_v24 = vpop.eup %2870  ;;  %2872 = vtanh.f32 %v1790_v15  ;;  %v1810_v28 = vmul.f32 %v2869_v20, %v1806_v16 }
 0x431   :  { %v1807_v23 = vmul.f32 0.5, %v1803_v17 }
 0x433   :  { %v1811_v29 = vmul.f32 %v2871_v24, %v1807_v23  ;;  %v1772_v30 = vpop.f32.mrf.mxu3 }
 0x434   :  { %v1773_v33 = vadd.f32 %v1772_v30, %v1754_v26 }
 0x435   :  { %v1814_v34 = vpack.c.bf16 %v1811_v29, %v1810_v28 }
 0x436   :  { %v1792_v38 = vadd.f32 %v1791_v14, %v1773_v33  ;;  %v2873_v27 = vpop.eup %2872 }
 0x437   :  { %1894 = vmatmul.bf16.vlgmr.msrb.gmra.mxu1 %v1814_v34  ;;  %v1804_v49 = vadd.f32 1.0, %v2873_v27 }
 0x438   :  { %2874 = vtanh.f32 %v1792_v38 }
 0x439   :  { %2876 = vtanh.f32 %v1733_v39  ;;  %v1808_v55 = vmul.f32 0.5, %v1804_v49 }
 0x43a   :  { %2878 = vtanh.f32 %v1735_v42 }
 0x43e   :  { %v2875_v51 = vpop.eup %2874 }
 0x43f   :  { %v1805_v36 = vadd.f32 1.0, %v2875_v51  ;;  %v2877_v56 = vpop.eup %2876 }
 0x440   :  { %v2879_v46 = vpop.eup %2878  ;;  %v1812_v43 = vmul.f32 %v2877_v56, %v1808_v55 }
 0x441   :  { %v1809_v59 = vmul.f32 0.5, %v1805_v36 }
 0x443   :  { %v1813_v52 = vmul.f32 %v2879_v46, %v1809_v59 }
 0x445   :  { %v1815_v53 = vpack.c.bf16 %v1813_v52, %v1812_v43 }
 0x447   :  { %1899 = vmatmul.bf16.vlgmr.msrb.gmra.mxu2 %v1815_v53 }
 0x4b4   :  { %v1895_v48 = vpop.f32.mrf.mxu1 }
 0x4b5   :  { %v1896_v31 = vadd.f32 %v2829_v57, %v1895_v48 }
 0x4b7   :  { %v1905_v22 = vadd.f32 %v1896_v31, %v3206_v3 }
 0x4b9   :  { %v1913_v62 = vmul.f32 %v2830_v40, %v1905_v22 }
 0x4bb   :  { %v1921_v0 = vadd.f32 %v2831_v63, %v1913_v62 }
 0x4bc   :  { %v1897_v61 = vpop.f32.mrf.mxu1 }
 0x4bd   :  { %v1898_v37 = vadd.f32 %v2829_v57, %v1897_v61 }
 0x4bf   :  { %v1906_v45 = vadd.f32 %v1898_v37, %v3213_v21 }
 0x4c1   :  { %v1914_v58 = vmul.f32 %v2830_v40, %v1906_v45 }
 0x4c3   :  { %v1922_v54 = vadd.f32 %v2831_v63, %v1914_v58 }
 0x4c5   :  { %v2802_v2 = vpack.c.bf16 %v1922_v54, %v1921_v0 }
 0x4c7   :  { %2803 = vst [vmem:[#allocation7] sm:$0xff] %v2802_v2  }
 0x4ca   :  { %v1900_v35 = vpop.f32.mrf.mxu2 }
 0x4cb   :  { %v1901_v3 = vadd.f32 %v2829_v57, %v1900_v35 }
 0x4cd   :  { %v1907_v4 = vadd.f32 %v1901_v3, %v3226_v41 }
 0x4cf   :  { %v1915_v7 = vmul.f32 %v2830_v40, %v1907_v4 }
 0x4d1   :  { %v1923_v21 = vadd.f32 %v2831_v63, %v1915_v7 }
 0x4d2   :  { %v1902_v5 = vpop.f32.mrf.mxu2 }
 0x4d3   :  { %v1903_v18 = vadd.f32 %v2829_v57, %v1902_v5 }
 0x4d5   :  { %v1908_v8 = vadd.f32 %v1903_v18, %v3235_v6 }
 0x4d7   :  { %v1916_v9 = vmul.f32 %v2830_v40, %v1908_v8 }
 0x4d9   :  { %v1924_v50 = vadd.f32 %v2831_v63, %v1916_v9 }
 0x4db   :  { %v2807_v47 = vpack.c.bf16 %v1924_v50, %v1923_v21 }
 0x4dd   :  { %2809 = vst [vmem:[#allocation7 + $0x8] sm:$0xff] %v2807_v47  }
 0x4de   :  { %1945 = dma.vmem_to_hbm [thread:$0]  %s1938_s7, 256, %s1940_s25, [#allocation4], %s2962_s21, %s2962_s21, %s2963_s22  }
 0x4df   :  { %2956 = dma.done.wait [#allocation4], 256  }
 0x4e0   :  { %2957 = vsyncadd [#allocation4], 4294967040 }
 0x4e1   :  { %1950 = vsyncpa [#allocation3], 1 }
 0x4e2   :  { %1951 = vsyncpa [#allocation6], 1 }
 0x4e3   :  { %1952 = vsyncpa [#allocation4], 1 }

// kernel: tpu_custom_call.1
= control target key start
LH: loop header
LB: loop body
LE: loop exit
PB: predicated region body
PF: predicated region fallthrough
CT: control target
= control target key end

     0   :  { %14 = vsyncpa [#allocation3], 0  ;;  %s3274_s0 = inlined_call_operand.vmem [shape: f32[2,16,3], index: 0, kind: input, shape index: {}]   ;;  %s3275_s1 = inlined_call_operand.vmem [shape: bf16[3,128], index: 1, kind: input, shape index: {}]   ;;  %s3276_s2 = inlined_call_operand.vmem [shape: f32[1,128], index: 2, kind: input, shape index: {}]   ;;  %s3277_s3 = inlined_call_operand.hbm [shape: bf16[3,384,256], index: 3, kind: input, shape index: {}]   ;;  %s3278_s4 = inlined_call_operand.vmem [shape: f32[3,1,256], index: 4, kind: input, shape index: {}]   ;;  %s3279_s5 = inlined_call_operand.hbm [shape: bf16[3,128,128], index: 5, kind: input, shape index: {}]   ;;  %s3280_s6 = inlined_call_operand.vmem [shape: f32[3,1,128], index: 6, kind: input, shape index: {}]   ;;  %s3281_s7 = inlined_call_operand.vmem [shape: f32[1,128], index: 7, kind: input, shape index: {}]   ;;  %s3282_s8 = inlined_call_operand.vmem [shape: f32[1,128], index: 8, kind: input, shape index: {}]   ;;  %s3283_s9 = inlined_call_operand.hbm [shape: bf16[2,16,128], index: 9, kind: output, shape index: {}]  }
   0x1   :  { %15 = vsyncpa [#allocation6], 0 }
   0x2   :  { %16 = vsyncpa [#allocation4], 0  ;;  %s27_s11 = sshll.u32 %s3277_s3, 4  ;;  %s2958_s12 = smov [#allocation2]   ;;  %s28_s11 = int_to_ptr.hbm [resolvable:$true] %s27_s11 }
   0x3   :  { %s29_s13 = sshll.u32 %s2958_s12, 4  ;;  %s42_s16 = sshll.u32 %s3279_s5, 4  ;;  %s30_s13 = int_to_ptr.vmem [resolvable:$true] %s29_s13  ;;  %s43_s16 = int_to_ptr.hbm [resolvable:$true] %s42_s16 }
   0x4   :  { %s2959_s17 = smov 128   ;;  %s2960_s18 = smov 8  }
   0x5   :  { %35 = dma.hbm_to_vmem [thread:$0]  %s28_s11, 18432, %s30_s13, [#allocation3], %s2959_s17, %s2959_s17, %s2960_s18  }
   0x6   :  { %s2961_s19 = smov [#allocation5]   ;;  %s2962_s21 = smov 64  }
   0x7   :  { %s44_s20 = sshll.u32 %s2961_s19, 4  ;;  %s2963_s22 = smov 4   ;;  %s45_s20 = int_to_ptr.vmem [resolvable:$true] %s44_s20 }
   0x8   :  { %50 = dma.hbm_to_vmem [thread:$0]  %s43_s16, 3072, %s45_s20, [#allocation6], %s2962_s21, %s2962_s21, %s2963_s22  }
   0x9   :  { %2952 = dma.done.wait [#allocation3], 18432  }
   0xa   :  { %2953 = vsyncadd [#allocation3], 4294948864 }
   0xb   :  { %2954 = dma.done.wait [#allocation6], 3072  }
   0xc   :  { %2955 = vsyncadd [#allocation6], 4294964224  ;;  %vm84_vm0 = vcmask 1040384   ;;  %vm85_vm1 = vcmask 1041408   ;;  %v2964_v0 = vmov 65535   ;;  %v66_v4 = vld [vmem:[%s3274_s0] sm:$0xff] }
   0xd   :  { %v86_v1 = vsel %vm84_vm0, 4294967295, %v2964_v0  ;;  %v72_v3 = vld [vmem:[%s3275_s1] sm:$0x3]  ;;  %v67_v5 = vld [vmem:[%s3274_s0 + $0x8] sm:$0xff]  ;;  %v2077_v7 = vld [vmem:[#allocation2 + $0xf0] sm:$0xf] }
   0xe   :  { %v87_v2 = vsel %vm85_vm1, %v86_v1, 0  ;;  %v70_v8 = vpack.c.bf16 %v67_v5, %v66_v4  ;;  %v2662_v9 = vld [vmem:[#allocation2 + $0xf4] sm:$0xf0]  ;;  %v2069_v10 = vld [vmem:[#allocation2 + $0xe0] sm:$0xf]  ;;  %vm77_vm2 = vcmask 23552  }
   0xf   :  { %v89_v6 = vand.u32 %v87_v2, %v72_v3  ;;  %v2660_v11 = vld [vmem:[#allocation2 + $0xe4] sm:$0xf0]  ;;  %v2078_v12 = vor.u32 %v2662_v9, %v2077_v7  ;;  %v2061_v13 = vld [vmem:[#allocation2 + $0xd0] sm:$0xf]  ;;  %v2678_v15 = vld [vmem:[#allocation2 + $0x174] sm:$0xf0] }
  0x10   :  { %v2141_v14 = vld [vmem:[#allocation2 + $0x170] sm:$0xf]  ;;  %v2070_v16 = vor.u32 %v2660_v11, %v2069_v10  ;;  %v2658_v17 = vld [vmem:[#allocation2 + $0xd4] sm:$0xf0]  ;;  %v2053_v20 = vld [vmem:[#allocation2 + $0xc0] sm:$0xf] }
  0x11   :  { %98 = vmatpush.bf16.msra.mxu0 %v89_v6  ;;  %504 = vmatpush.bf16.msra.mxu2 %v2078_v12  ;;  %v2142_v18 = vor.u32 %v2678_v15, %v2141_v14  ;;  %v2062_v19 = vor.u32 %v2658_v17, %v2061_v13  ;;  %v2656_v21 = vld [vmem:[#allocation2 + $0xc4] sm:$0xf0]  ;;  %v68_v23 = vld [vmem:[%s3274_s0 + $0x10] sm:$0xff]  ;;  %v69_v24 = vld [vmem:[%s3274_s0 + $0x18] sm:$0xff]  ;;  %s1939_s25 = sshll.u32 %s3283_s9, 4  ;;  %s1940_s25 = int_to_ptr.hbm [resolvable:$true] %s1939_s25 }
  0x12   :  { %v2054_v22 = vor.u32 %v2656_v21, %v2053_v20  ;;  %v71_v25 = vpack.c.bf16 %v69_v24, %v68_v23  ;;  %v2045_v26 = vld [vmem:[#allocation2 + $0xb0] sm:$0xf]  ;;  %v2654_v27 = vld [vmem:[#allocation2 + $0xb4] sm:$0xf0]  ;;  %v2133_v28 = vld [vmem:[#allocation2 + $0x160] sm:$0xf] }
  0x13   :  { %523 = vmatpush.bf16.msra.mxu3 %v2142_v18  ;;  %v2046_v29 = vor.u32 %v2654_v27, %v2045_v26  ;;  %v2676_v30 = vld [vmem:[#allocation2 + $0x164] sm:$0xf0]  ;;  %v2013_v32 = vld [vmem:[#allocation2 + $0x70] sm:$0xf]  ;;  %v2646_v33 = vld [vmem:[#allocation2 + $0x74] sm:$0xf0] }
  0x14   :  { %1953 = vmatmul.msk.bf16.vlgmr.msra.gmra.mxu0 %vm77_vm2, %v70_v8  ;;  %v2134_v31 = vor.u32 %v2676_v30, %v2133_v28  ;;  %v2037_v34 = vld [vmem:[#allocation2 + $0xa0] sm:$0xf]  ;;  %v2014_v35 = vor.u32 %v2646_v33, %v2013_v32  ;;  %v2652_v36 = vld [vmem:[#allocation2 + $0xa4] sm:$0xf0]  ;;  %v2125_v37 = vld [vmem:[#allocation2 + $0x150] sm:$0xf] }
  0x15   :  { %505 = vmatpush.bf16.msra.mxu2 %v2070_v16  ;;  %v2674_v38 = vld [vmem:[#allocation2 + $0x154] sm:$0xf0]  ;;  %v2038_v39 = vor.u32 %v2652_v36, %v2037_v34  ;;  %v2645_v41 = vld [vmem:[#allocation2 + $0x74] sm:$0xf]  ;;  %v2015_v42 = vld [vmem:[#allocation2 + $0x78] sm:$0xf0] }
  0x16   :  { %v2126_v40 = vor.u32 %v2674_v38, %v2125_v37  ;;  %485 = vmatpush.bf16.msra.mxu1 %v2014_v35  ;;  %v2018_v43 = vor.u32 %v2645_v41, %v2015_v42  ;;  %v2005_v44 = vld [vmem:[#allocation2 + $0x60] sm:$0xf]  ;;  %v2644_v45 = vld [vmem:[#allocation2 + $0x64] sm:$0xf0]  ;;  %v2029_v46 = vld [vmem:[#allocation2 + $0x90] sm:$0xf] }
  0x17   :  { %524 = vmatpush.bf16.msra.mxu3 %v2134_v31  ;;  %v2006_v47 = vor.u32 %v2644_v45, %v2005_v44  ;;  %v2650_v48 = vld [vmem:[#allocation2 + $0x94] sm:$0xf0]  ;;  %v2117_v49 = vld [vmem:[#allocation2 + $0x140] sm:$0xf]  ;;  %v2672_v50 = vld [vmem:[#allocation2 + $0x144] sm:$0xf0] }
  0x18   :  { %542 = vmatpush.bf16.msrb.mxu0 %v2018_v43  ;;  %v2030_v51 = vor.u32 %v2650_v48, %v2029_v46  ;;  %v2118_v52 = vor.u32 %v2672_v50, %v2117_v49  ;;  %v2643_v53 = vld [vmem:[#allocation2 + $0x64] sm:$0xf]  ;;  %v2007_v54 = vld [vmem:[#allocation2 + $0x68] sm:$0xf0]  ;;  %v1997_v56 = vld [vmem:[#allocation2 + $0x50] sm:$0xf] }
  0x19   :  { %506 = vmatpush.bf16.msra.mxu2 %v2062_v19  ;;  %v2010_v55 = vor.u32 %v2643_v53, %v2007_v54  ;;  %v2642_v57 = vld [vmem:[#allocation2 + $0x54] sm:$0xf0]  ;;  %v2021_v58 = vld [vmem:[#allocation2 + $0x80] sm:$0xf]  ;;  %v2648_v60 = vld [vmem:[#allocation2 + $0x84] sm:$0xf0] }
  0x1a   :  { %486 = vmatpush.bf16.msra.mxu1 %v2006_v47  ;;  %v1998_v59 = vor.u32 %v2642_v57, %v1997_v56  ;;  %v2109_v61 = vld [vmem:[#allocation2 + $0x130] sm:$0xf]  ;;  %v2670_v62 = vld [vmem:[#allocation2 + $0x134] sm:$0xf0]  ;;  %v2022_v63 = vor.u32 %v2648_v60, %v2021_v58  ;;  %v2641_v1 = vld [vmem:[#allocation2 + $0x54] sm:$0xf] }
  0x1b   :  { %525 = vmatpush.bf16.msra.mxu3 %v2126_v40  ;;  %v2110_v0 = vor.u32 %v2670_v62, %v2109_v61  ;;  %v1999_v2 = vld [vmem:[#allocation2 + $0x58] sm:$0xf0]  ;;  %v1989_v4 = vld [vmem:[#allocation2 + $0x40] sm:$0xf]  ;;  %v2640_v5 = vld [vmem:[#allocation2 + $0x44] sm:$0xf0] }
  0x1c   :  { %543 = vmatpush.bf16.msrb.mxu0 %v2010_v55  ;;  %v2002_v3 = vor.u32 %v2641_v1, %v1999_v2  ;;  %v2101_v6 = vld [vmem:[#allocation2 + $0x120] sm:$0xf]  ;;  %v1990_v7 = vor.u32 %v2640_v5, %v1989_v4  ;;  %v2668_v8 = vld [vmem:[#allocation2 + $0x124] sm:$0xf0]  ;;  %v2639_v9 = vld [vmem:[#allocation2 + $0x44] sm:$0xf] }
  0x1d   :  { %507 = vmatpush.bf16.msra.mxu2 %v2054_v22  ;;  %v1991_v10 = vld [vmem:[#allocation2 + $0x48] sm:$0xf0]  ;;  %v2102_v11 = vor.u32 %v2668_v8, %v2101_v6  ;;  %v2677_v13 = vld [vmem:[#allocation2 + $0x174] sm:$0xf]  ;;  %v2143_v14 = vld [vmem:[#allocation2 + $0x178] sm:$0xf0]  ;;  %v110_v8 = vlaneseq }
  0x1e   :  { %487 = vmatpush.bf16.msra.mxu1 %v1998_v59  ;;  %v1994_v12 = vor.u32 %v2639_v9, %v1991_v10  ;;  %v2146_v15 = vor.u32 %v2677_v13, %v2143_v14  ;;  %v1981_v16 = vld [vmem:[#allocation2 + $0x30] sm:$0xf]  ;;  %v2638_v17 = vld [vmem:[#allocation2 + $0x34] sm:$0xf0]  ;;  %v2637_v21 = vld [vmem:[#allocation2 + $0x34] sm:$0xf] }
  0x1f   :  { %526 = vmatpush.bf16.msra.mxu3 %v2118_v52  ;;  %v2093_v18 = vld [vmem:[#allocation2 + $0x110] sm:$0xf]  ;;  %v1982_v19 = vor.u32 %v2638_v17, %v1981_v16  ;;  %v2666_v20 = vld [vmem:[#allocation2 + $0x114] sm:$0xf0]  ;;  %v1983_v22 = vld [vmem:[#allocation2 + $0x38] sm:$0xf0] }
  0x20   :  { %544 = vmatpush.bf16.msrb.mxu0 %v2002_v3  ;;  %v2094_v23 = vor.u32 %v2666_v20, %v2093_v18  ;;  %v1986_v24 = vor.u32 %v2637_v21, %v1983_v22  ;;  %v2135_v26 = vld [vmem:[#allocation2 + $0x168] sm:$0xf0]  ;;  %v1973_v28 = vld [vmem:[#allocation2 + $0x20] sm:$0xf]  ;;  %v2664_v32 = vld [vmem:[#allocation2 + $0x104] sm:$0xf0] }
  0x21   :  { %508 = vmatpush.bf16.msra.mxu2 %v2046_v29  ;;  %v2636_v29 = vld [vmem:[#allocation2 + $0x24] sm:$0xf0]  ;;  %v2085_v30 = vld [vmem:[#allocation2 + $0x100] sm:$0xf]  ;;  %v2635_v33 = vld [vmem:[#allocation2 + $0x24] sm:$0xf] }
  0x22   :  { %488 = vmatpush.bf16.msra.mxu1 %v1990_v7  ;;  %v1974_v31 = vor.u32 %v2636_v29, %v1973_v28  ;;  %v1975_v34 = vld [vmem:[#allocation2 + $0x28] sm:$0xf0]  ;;  %v2086_v35 = vor.u32 %v2664_v32, %v2085_v30  ;;  %v2673_v37 = vld [vmem:[#allocation2 + $0x154] sm:$0xf]  ;;  %v2127_v38 = vld [vmem:[#allocation2 + $0x158] sm:$0xf0] }
  0x23   :  { %527 = vmatpush.bf16.msra.mxu3 %v2110_v0  ;;  %v1978_v36 = vor.u32 %v2635_v33, %v1975_v34  ;;  %v1965_v40 = vld [vmem:[#allocation2 + $0x10] sm:$0xf]  ;;  %v2634_v41 = vld [vmem:[#allocation2 + $0x14] sm:$0xf0]  ;;  %v2633_v42 = vld [vmem:[#allocation2 + $0x14] sm:$0xf] }
  0x24   :  { %1954 = vmatmul.msk.bf16.gmra.mxu0 %vm77_vm2, %v71_v25  ;;  %v2675_v25 = vld [vmem:[#allocation2 + $0x164] sm:$0xf]  ;;  %v1966_v43 = vor.u32 %v2634_v41, %v1965_v40  ;;  %v1967_v44 = vld [vmem:[#allocation2 + $0x18] sm:$0xf0]  ;;  %v2119_v46 = vld [vmem:[#allocation2 + $0x148] sm:$0xf0] }
  0x25   :  { %509 = vmatpush.bf16.msra.mxu2 %v2038_v39  ;;  %545 = vmatpush.bf16.msrb.mxu0 %v1994_v12  ;;  %v2138_v27 = vor.u32 %v2675_v25, %v2135_v26  ;;  %v2130_v39 = vor.u32 %v2673_v37, %v2127_v38  ;;  %v2671_v45 = vld [vmem:[#allocation2 + $0x144] sm:$0xf]  ;;  %v1970_v47 = vor.u32 %v2633_v42, %v1967_v44  ;;  %v1957_v49 = vld [vmem:[#allocation2] sm:$0xf]  ;;  %v2632_v50 = vld [vmem:[#allocation2 + $0x4] sm:$0xf0] }
  0x26   :  { %489 = vmatpush.bf16.msra.mxu1 %v1982_v19  ;;  %v2122_v48 = vor.u32 %v2671_v45, %v2119_v46  ;;  %v1958_v53 = vor.u32 %v2632_v50, %v1957_v49  ;;  %v1959_v54 = vld [vmem:[#allocation2 + $0x8] sm:$0xf0]  ;;  %v2669_v55 = vld [vmem:[#allocation2 + $0x134] sm:$0xf]  ;;  %v2111_v56 = vld [vmem:[#allocation2 + $0x138] sm:$0xf0] }
  0x27   :  { %528 = vmatpush.bf16.msra.mxu3 %v2102_v11  ;;  %v3045_v57 = vld [vmem:[%s3276_s2] ss:$0 sm:$0xff]  ;;  %v2114_v59 = vor.u32 %v2669_v55, %v2111_v56  ;;  %v2661_v60 = vld [vmem:[#allocation2 + $0xf4] sm:$0xf]  ;;  %v2079_v61 = vld [vmem:[#allocation2 + $0xf8] sm:$0xf0] }
  0x28   :  { %v2082_v62 = vor.u32 %v2661_v60, %v2079_v61  ;;  %v2103_v0 = vld [vmem:[#allocation2 + $0x128] sm:$0xf0]  ;;  %v2659_v3 = vld [vmem:[#allocation2 + $0xe4] sm:$0xf]  ;;  %v2665_v5 = vld [vmem:[#allocation2 + $0x114] sm:$0xf] }
  0x29   :  { %510 = vmatpush.bf16.msra.mxu2 %v2030_v51  ;;  %546 = vmatpush.bf16.msrb.mxu0 %v1986_v24  ;;  %v2631_v51 = vld [vmem:[#allocation2 + $0x4] sm:$0xf]  ;;  %v2071_v4 = vld [vmem:[#allocation2 + $0xe8] sm:$0xf0]  ;;  %v2095_v7 = vld [vmem:[#allocation2 + $0x118] sm:$0xf0] }
  0x2a   :  { %490 = vmatpush.bf16.msra.mxu1 %v1974_v31  ;;  %v1962_v58 = vor.u32 %v2631_v51, %v1959_v54  ;;  %v2074_v6 = vor.u32 %v2659_v3, %v2071_v4  ;;  %v2098_v10 = vor.u32 %v2665_v5, %v2095_v7  ;;  %v3057_v14 = vshrl.u32 %v110_v8, 7  ;;  %v2063_v16 = vld [vmem:[#allocation2 + $0xd8] sm:$0xf0]  ;;  %v2663_v18 = vld [vmem:[#allocation2 + $0x104] sm:$0xf] }
  0x2b   :  { %529 = vmatpush.bf16.msra.mxu3 %v2094_v23  ;;  %v2087_v19 = vld [vmem:[#allocation2 + $0x108] sm:$0xf0]  ;;  %v2655_v23 = vld [vmem:[#allocation2 + $0xc4] sm:$0xf]  ;;  %v2649_v46 = vld [vmem:[#allocation2 + $0x94] sm:$0xf] }
  0x2c   :  { %v2090_v22 = vor.u32 %v2663_v18, %v2087_v19  ;;  %v2055_v24 = vld [vmem:[#allocation2 + $0xc8] sm:$0xf0]  ;;  %v3063_v28 = vadd.s32 8, %v3057_v14  ;;  %vm142_vm3 = vcmp.lt.s32.totalorder %v3057_v14, 7  ;;  %vm123_vm5 = vcmp.lt.s32.totalorder %v3057_v14, 1 }
  0x2d   :  { %511 = vmatpush.bf16.msra.mxu2 %v2022_v63  ;;  %547 = vmatpush.bf16.msrb.mxu0 %v1978_v36  ;;  %v2667_v63 = vld [vmem:[#allocation2 + $0x124] sm:$0xf]  ;;  %v2058_v26 = vor.u32 %v2655_v23, %v2055_v24  ;;  %v2047_v36 = vld [vmem:[#allocation2 + $0xb8] sm:$0xf0]  ;;  %v2039_v41 = vld [vmem:[#allocation2 + $0xa8] sm:$0xf0] }
  0x2e   :  { %491 = vmatpush.bf16.msra.mxu1 %v1966_v43  ;;  %v2106_v2 = vor.u32 %v2667_v63, %v2103_v0  ;;  %vm137_vm4 = vcmp.lt.s32.totalorder %v3063_v28, 15  ;;  %v2651_v40 = vld [vmem:[#allocation2 + $0xa4] sm:$0xf]  ;;  %vm117_vm6 = vcmp.ge.s32.totalorder %v3057_v14, 1  ;;  %v2023_v61 = vld [vmem:[#allocation2 + $0x88] sm:$0xf0] }
  0x2f   :  { %530 = vmatpush.bf16.msra.mxu3 %v2086_v35  ;;  %v2653_v35 = vld [vmem:[#allocation2 + $0xb4] sm:$0xf]  ;;  %v2042_v45 = vor.u32 %v2651_v40, %v2039_v41  ;;  %v2682_v40 = vld [vmem:[#allocation5 + $0x18] sm:$0xff]  ;;  %vm741_vm7 = vcmp.lt.s32.totalorder %v3057_v14, 6  ;;  %vm736_vm8 = vcmp.lt.s32.totalorder %v3063_v28, 14  ;;  %vm722_vm9 = vcmp.lt.s32.totalorder %v3057_v14, 2 }
  0x30   :  { %vm716_vm10 = vcmp.ge.s32.totalorder %v3057_v14, 2  ;;  %vm1325_vm11 = vcmp.lt.s32.totalorder %v3057_v14, 4  ;;  %vm1339_vm12 = vcmp.lt.s32.totalorder %v3063_v28, 12  ;;  %vm1319_vm13 = vcmp.ge.s32.totalorder %v3057_v14, 4  ;;  %v2797_v14 = vld [vmem:[#allocation5 + $0xb0] sm:$0xff] }
  0x31   :  { %580 = vmatpush.bf16.msrb.mxu2 %v2146_v15  ;;  %548 = vmatpush.bf16.msrb.mxu0 %v1970_v47  ;;  %v2657_v15 = vld [vmem:[#allocation2 + $0xd4] sm:$0xf]  ;;  %v2031_v47 = vld [vmem:[#allocation2 + $0x98] sm:$0xf0] }
  0x32   :  { %492 = vmatpush.bf16.msra.mxu1 %v1958_v53  ;;  %v2066_v17 = vor.u32 %v2657_v15, %v2063_v16  ;;  %v2034_v54 = vor.u32 %v2649_v46, %v2031_v47  ;;  %v2679_v47 = vld [vmem:[#allocation5] sm:$0xff] }
  0x35   :  { %581 = vmatpush.bf16.msrb.mxu2 %v2138_v27  ;;  %549 = vmatpush.bf16.msrb.mxu0 %v1962_v58 }
  0x36   :  { %561 = vmatpush.bf16.msrb.mxu1 %v2082_v62 }
  0x39   :  { %582 = vmatpush.bf16.msrb.mxu2 %v2130_v39  ;;  %v2050_v39 = vor.u32 %v2653_v35, %v2047_v36  ;;  %v2685_v35 = vld [vmem:[#allocation5 + $0x30] sm:$0xff]  ;;  %v2684_v36 = vld [vmem:[#allocation5 + $0x28] sm:$0xff] }
  0x3a   :  { %562 = vmatpush.bf16.msrb.mxu1 %v2074_v6 }
  0x3d   :  { %583 = vmatpush.bf16.msrb.mxu2 %v2122_v48 }
  0x3e   :  { %563 = vmatpush.bf16.msrb.mxu1 %v2066_v17 }
  0x41   :  { %584 = vmatpush.bf16.msrb.mxu2 %v2114_v59 }
  0x42   :  { %564 = vmatpush.bf16.msrb.mxu1 %v2058_v26 }
  0x45   :  { %585 = vmatpush.bf16.msrb.mxu2 %v2106_v2 }
  0x46   :  { %565 = vmatpush.bf16.msrb.mxu1 %v2050_v39  ;;  %v2683_v39 = vld [vmem:[#allocation5 + $0x20] sm:$0xff] }
  0x49   :  { %586 = vmatpush.bf16.msrb.mxu2 %v2098_v10 }
  0x4a   :  { %566 = vmatpush.bf16.msrb.mxu1 %v2042_v45  ;;  %v239_v45 = vld [vmem:[%s3278_s4] sm:$0x3] }
  0x4d   :  { %587 = vmatpush.bf16.msrb.mxu2 %v2090_v22 }
  0x4e   :  { %567 = vmatpush.bf16.msrb.mxu1 %v2034_v54 }
  0x91   :  { %v100_v52 = vpop.f32.mrf.mxu0 }
  0x92   :  { %v3048_v1 = vadd.f32 %v3045_v57, %v100_v52 }
  0x94   :  { %v113_v12 = vpack.c.bf16 %v3048_v1, %v3048_v1  ;;  %v138_v29 = vrot.slane %v3048_v1, 1  ;;  %v119_v42 = vrot.slane %v3048_v1, 7 }
  0x96   :  { %v171_v20 = vunpack.c.l.b16 %v113_v12 }
  0x99   :  { %v102_v9 = vpop.f32.mrf.mxu0 }
  0x9a   :  { %v3051_v11 = vadd.f32 %v3045_v57, %v102_v9 }
  0x9c   :  { %v114_v13 = vpack.c.bf16 %v3051_v11, %v3051_v11  ;;  %v139_v25 = vrot.slane %v3051_v11, 1  ;;  %v120_v34 = vrot.slane %v3051_v11, 7 }
  0x9e   :  { %v172_v21 = vunpack.c.l.b16 %v114_v13  ;;  %v145_v32 = vsel %vm142_vm3, %v138_v29, %v139_v25  ;;  %v126_v49 = vsel %vm123_vm5, %v119_v42, %v120_v34 }
  0x9f   :  { %v151_v38 = vpack.c.bf16 %v145_v32, %v145_v32  ;;  %v133_v60 = vpack.c.bf16 %v126_v49, %v126_v49  ;;  %v2686_v32 = vld [vmem:[#allocation5 + $0x38] sm:$0xff] }
  0xa0   :  { %v3060_v27 = vpack.c.b16 %v172_v21, %v171_v20  ;;  %689 = vmatpush.bf16.msrb.mxu3 %v2686_v32 }
  0xa1   :  { %v105_v30 = vpop.f32.mrf.mxu0  ;;  %v183_v51 = vunpack.c.l.b16 %v151_v38  ;;  %v160_v10 = vunpack.c.l.b16 %v133_v60 }
  0xa2   :  { %v3068_v31 = vadd.f32 %v3045_v57, %v105_v30  ;;  %512 = vmatmul.bf16.vlgmr.msra.gmra.mxu2 %v3060_v27 }
  0xa4   :  { %v140_v33 = vrot.slane %v3068_v31, 1  ;;  %v115_v53 = vpack.c.bf16 %v3068_v31, %v3068_v31  ;;  %v121_v12 = vrot.slane %v3068_v31, 7  ;;  %690 = vmatpush.bf16.msrb.mxu3 %v2685_v35 }
  0xa6   :  { %v144_v37 = vsel %vm142_vm3, %v139_v25, %v140_v33  ;;  %v173_v62 = vunpack.c.l.b16 %v115_v53  ;;  %v125_v19 = vsel %vm123_vm5, %v120_v34, %v121_v12  ;;  %v241_v53 = vperm.slane %v239_v45, 0 }
  0xa7   :  { %v148_v43 = vsel %vm137_vm4, %v144_v37, 0.0  ;;  %v130_v21 = vsel %vm117_vm6, %v125_v19, 0.0  ;;  %v2734_v19 = vld [vmem:[#allocation2 + $0x2f4] sm:$0xf0] }
  0xa8   :  { %v152_v44 = vpack.c.bf16 %v148_v43, %v148_v43  ;;  %v134_v24 = vpack.c.bf16 %v130_v21, %v130_v21  ;;  %691 = vmatpush.bf16.msrb.mxu3 %v2684_v36  ;;  %v2680_v43 = vld [vmem:[#allocation5 + $0x8] sm:$0xff] }
  0xa9   :  { %v107_v48 = vpop.f32.mrf.mxu0 }
  0xaa   :  { %v3085_v50 = vadd.f32 %v3045_v57, %v107_v48  ;;  %v184_v52 = vunpack.c.l.b16 %v152_v44  ;;  %v2647_v57 = vld [vmem:[#allocation2 + $0x84] sm:$0xf]  ;;  %v161_v26 = vunpack.c.l.b16 %v134_v24  ;;  %v242_v48 = vperm.slane %v239_v45, 1  ;;  %v2714_v24 = vld [vmem:[#allocation2 + $0x254] sm:$0xf0] }
  0xab   :  { %v2026_v6 = vor.u32 %v2647_v57, %v2023_v61 }
  0xac   :  { %v122_v55 = vrot.slane %v3085_v50, 7  ;;  %v141_v56 = vrot.slane %v3085_v50, 1  ;;  %v187_v58 = vpack.c.b16 %v184_v52, %v183_v51  ;;  %v116_v59 = vpack.c.bf16 %v3085_v50, %v3085_v50  ;;  %692 = vmatpush.bf16.msrb.mxu3 %v2683_v39  ;;  %v2278_v39 = vld [vmem:[#allocation2 + $0x240] sm:$0xf] }
  0xad   :  { %568 = vmatpush.bf16.msrb.mxu1 %v2026_v6 }
  0xae   :  { %531 = vmatmul.bf16.vlgmr.msra.gmra.mxu3 %v187_v58  ;;  %v174_v63 = vunpack.c.l.b16 %v116_v59  ;;  %v127_v0 = vsel %vm123_vm5, %v122_v55, %v119_v42  ;;  %v146_v2 = vsel %vm142_vm3, %v141_v56, %v138_v29  ;;  %v143_v7 = vsel %vm142_vm3, %v140_v33, %v141_v56  ;;  %v2681_v42 = vld [vmem:[#allocation5 + $0x10] sm:$0xff] }
  0xaf   :  { %v128_v3 = vsel %vm117_vm6, %v127_v0, 0.0  ;;  %v150_v8 = vsel %vm137_vm4, %v146_v2, 0.0  ;;  %v153_v15 = vpack.c.bf16 %v143_v7, %v143_v7  ;;  %v124_v20 = vsel %vm123_vm5, %v121_v12, %v122_v55  ;;  %v2302_v7 = vld [vmem:[#allocation2 + $0x270] sm:$0xf] }
  0xb0   :  { %v176_v4 = vpack.c.b16 %v174_v63, %v173_v62  ;;  %v132_v5 = vpack.c.bf16 %v128_v3, %v128_v3  ;;  %v154_v16 = vpack.c.bf16 %v150_v8, %v150_v8  ;;  %v135_v23 = vpack.c.bf16 %v124_v20, %v124_v20  ;;  %693 = vmatpush.bf16.msrb.mxu3 %v2682_v40  ;;  %v2718_v8 = vld [vmem:[#allocation2 + $0x274] sm:$0xf0]  ;;  %v2712_v40 = vld [vmem:[#allocation2 + $0x244] sm:$0xf0] }
  0xb1   :  { %v185_v17 = vunpack.c.l.b16 %v153_v15  ;;  %v2303_v12 = vor.u32 %v2718_v8, %v2302_v7  ;;  %v2716_v15 = vld [vmem:[#allocation2 + $0x264] sm:$0xf0]  ;;  %v2710_v7 = vld [vmem:[#allocation2 + $0x234] sm:$0xf0]  ;;  %v2358_v8 = vld [vmem:[#allocation2 + $0x2e0] sm:$0xf] }
  0xb2   :  { %517 = vmatmul.bf16.gmra.mxu2 %v176_v4  ;;  %v159_v9 = vunpack.c.l.b16 %v132_v5  ;;  %v186_v18 = vunpack.c.l.b16 %v154_v16  ;;  %v162_v25 = vunpack.c.l.b16 %v135_v23  ;;  %v2286_v23 = vld [vmem:[#allocation2 + $0x250] sm:$0xf] }
  0xb4   :  { %v163_v13 = vpack.c.b16 %v160_v10, %v159_v9  ;;  %v188_v22 = vpack.c.b16 %v186_v18, %v185_v17  ;;  %v164_v29 = vpack.c.b16 %v162_v25, %v161_v26  ;;  %694 = vmatpush.bf16.msrb.mxu3 %v2681_v42  ;;  %v2366_v18 = vld [vmem:[#allocation2 + $0x2f0] sm:$0xf] }
  0xb5   :  { %v2367_v25 = vor.u32 %v2734_v19, %v2366_v18  ;;  %v2708_v18 = vld [vmem:[#allocation2 + $0x224] sm:$0xf0]  ;;  %v2350_v19 = vld [vmem:[#allocation2 + $0x2d0] sm:$0xf] }
  0xb6   :  { %493 = vmatmul.bf16.vlgmr.msra.gmra.mxu1 %v163_v13  ;;  %550 = vmatmul.bf16.vlgmr.msrb.gmra.mxu0 %v163_v13  ;;  %v2294_v13 = vld [vmem:[#allocation2 + $0x260] sm:$0xf] }
  0xb7   :  { %1105 = vmatpush.bf16.msra.mxu1 %v2303_v12  ;;  %v2295_v17 = vor.u32 %v2716_v15, %v2294_v13  ;;  %1124 = vmatpush.bf16.msra.mxu2 %v2367_v25  ;;  %v2238_v13 = vld [vmem:[#allocation2 + $0x1f0] sm:$0xf]  ;;  %v2702_v15 = vld [vmem:[#allocation2 + $0x1f4] sm:$0xf0] }
  0xb8   :  { %695 = vmatpush.bf16.msrb.mxu3 %v2680_v43 }
  0xbb   :  { %1106 = vmatpush.bf16.msra.mxu1 %v2295_v17  ;;  %v2239_v17 = vor.u32 %v2702_v15, %v2238_v13  ;;  %v2360_v13 = vld [vmem:[#allocation2 + $0x2e8] sm:$0xf0] }
  0xbc   :  { %696 = vmatpush.bf16.msrb.mxu3 %v2679_v47 }
  0xbd   :  { %1086 = vmatpush.bf16.msra.mxu0 %v2239_v17  ;;  %v2692_v17 = vld [vmem:[#allocation2 + $0x1a4] sm:$0xf0] }
  0xbe   :  { %536 = vmatmul.bf16.gmra.mxu3 %v188_v22 }
  0xc2   :  { %588 = vmatmul.bf16.vlgmr.msrb.gmra.mxu2 %v187_v58 }
  0xc6   :  { %498 = vmatmul.bf16.gmra.mxu1 %v164_v29  ;;  %555 = vmatmul.bf16.gmra.mxu0 %v164_v29 }
  0xd2   :  { %593 = vmatmul.bf16.gmra.mxu2 %v188_v22 }
  0xd6   :  { %569 = vmatmul.bf16.vlgmr.msrb.gmra.mxu1 %v3060_v27 }
  0xe6   :  { %574 = vmatmul.bf16.gmra.mxu1 %v176_v4 }
 0x125   :  { %v513_v30 = vpop.f32.mrf.mxu2 }
 0x12d   :  { %v515_v33 = vpop.f32.mrf.mxu2 }
 0x131   :  { %v532_v51 = vpop.f32.mrf.mxu3 }
 0x133   :  { %v494_v34 = vpop.f32.mrf.mxu1  ;;  %v551_v44 = vpop.f32.mrf.mxu0 }
 0x134   :  { %v552_v52 = vadd.f32 %v551_v44, %v242_v48  ;;  %v495_v59 = vadd.f32 %v494_v34, %v241_v53 }
 0x135   :  { %v3112_v37 = vpop.f32.mrf.mxu2 }
 0x136   :  { %v514_v62 = vadd.f32 %v513_v30, %v495_v59 }
 0x138   :  { %v533_v6 = vadd.f32 %v532_v51, %v514_v62 }
 0x139   :  { %v534_v63 = vpop.f32.mrf.mxu3 }
 0x13b   :  { %v496_v38 = vpop.f32.mrf.mxu1  ;;  %v553_v54 = vpop.f32.mrf.mxu0 }
 0x13c   :  { %v497_v60 = vadd.f32 %v496_v38, %v241_v53  ;;  %v554_v61 = vadd.f32 %v553_v54, %v242_v48 }
 0x13d   :  { %v3114_v27 = vpop.f32.mrf.mxu2 }
 0x13e   :  { %v516_v2 = vadd.f32 %v515_v33, %v497_v60  ;;  %v2287_v33 = vor.u32 %v2714_v24, %v2286_v23  ;;  %v2701_v23 = vld [vmem:[#allocation2 + $0x1f4] sm:$0xf]  ;;  %v2240_v24 = vld [vmem:[#allocation2 + $0x1f8] sm:$0xf0] }
 0x13f   :  { %v2243_v25 = vor.u32 %v2701_v23, %v2240_v24 }
 0x140   :  { %v535_v10 = vadd.f32 %v534_v63, %v516_v2  ;;  %1107 = vmatpush.bf16.msra.mxu1 %v2287_v33  ;;  %v2706_v33 = vld [vmem:[#allocation2 + $0x214] sm:$0xf0] }
 0x141   :  { %v537_v29 = vpop.f32.mrf.mxu3  ;;  %1143 = vmatpush.bf16.msra.mxu3 %v2243_v25  ;;  %v2729_v25 = vld [vmem:[#allocation2 + $0x2d4] sm:$0xf] }
 0x143   :  { %v499_v41 = vpop.f32.mrf.mxu1  ;;  %v556_v4 = vpop.f32.mrf.mxu0 }
 0x144   :  { %v557_v16 = vadd.f32 %v556_v4, %v242_v48  ;;  %v500_v34 = vadd.f32 %v499_v41, %v241_v53 }
 0x145   :  { %v589_v49 = vpop.f32.mrf.mxu2 }
 0x146   :  { %v519_v51 = vadd.f32 %v3112_v37, %v500_v34  ;;  %v2342_v34 = vld [vmem:[#allocation2 + $0x2c0] sm:$0xf] }
 0x14b   :  { %v501_v46 = vpop.f32.mrf.mxu1  ;;  %v558_v35 = vpop.f32.mrf.mxu0 }
 0x14c   :  { %v502_v42 = vadd.f32 %v501_v46, %v241_v53  ;;  %v559_v47 = vadd.f32 %v558_v35, %v242_v48  ;;  %v538_v46 = vadd.f32 %v537_v29, %v519_v51  ;;  %v539_v53 = vpop.f32.mrf.mxu3  ;;  %v2700_v29 = vld [vmem:[#allocation2 + $0x1e4] sm:$0xf0]  ;;  %v2334_v51 = vld [vmem:[#allocation2 + $0x2b0] sm:$0xf] }
 0x14d   :  { %v591_v57 = vpop.f32.mrf.mxu2  ;;  %v2728_v35 = vld [vmem:[#allocation2 + $0x2c4] sm:$0xf0] }
 0x14e   :  { %v521_v41 = vadd.f32 %v3114_v27, %v502_v42 }
 0x150   :  { %v540_v48 = vadd.f32 %v539_v53, %v521_v41  ;;  %v2697_v41 = vld [vmem:[#allocation2 + $0x1d4] sm:$0xf] }
 0x153   :  { %v570_v55 = vpop.f32.mrf.mxu1 }
 0x154   :  { %v571_v56 = vadd.f32 %v570_v55, %v552_v52 }
 0x155   :  { %v594_v21 = vpop.f32.mrf.mxu2 }
 0x156   :  { %v590_v58 = vadd.f32 %v589_v49, %v571_v56  ;;  %v2279_v49 = vor.u32 %v2712_v40, %v2278_v39  ;;  %v2699_v39 = vld [vmem:[#allocation2 + $0x1e4] sm:$0xf]  ;;  %v2232_v40 = vld [vmem:[#allocation2 + $0x1e8] sm:$0xf0] }
 0x157   :  { %v2235_v42 = vor.u32 %v2699_v39, %v2232_v40  ;;  %v2344_v39 = vld [vmem:[#allocation2 + $0x2c8] sm:$0xf0]  ;;  %v2182_v40 = vld [vmem:[#allocation2 + $0x180] sm:$0xf] }
 0x158   :  { %2832 = vtanh.f32 %v590_v58  ;;  %1108 = vmatpush.bf16.msra.mxu1 %v2279_v49  ;;  %v2704_v49 = vld [vmem:[#allocation2 + $0x204] sm:$0xf0] }
 0x159   :  { %1144 = vmatpush.bf16.msra.mxu3 %v2235_v42  ;;  %v2688_v42 = vld [vmem:[#allocation2 + $0x184] sm:$0xf0] }
 0x15b   :  { %v572_v0 = vpop.f32.mrf.mxu1 }
 0x15c   :  { %v573_v3 = vadd.f32 %v572_v0, %v554_v61 }
 0x15d   :  { %v596_v58 = vpop.f32.mrf.mxu2 }
 0x15e   :  { %v592_v5 = vadd.f32 %v591_v57, %v573_v3  ;;  %v2833_v9 = vpop.eup %2832 }
 0x15f   :  { %v607_v20 = vadd.f32 1.0, %v2833_v9 }
 0x160   :  { %2834 = vtanh.f32 %v592_v5 }
 0x161   :  { %2836 = vtanh.f32 %v533_v6  ;;  %v611_v36 = vmul.f32 0.5, %v607_v20  ;;  %v2270_v6 = vld [vmem:[#allocation2 + $0x230] sm:$0xf]  ;;  %v2730_v20 = vld [vmem:[#allocation2 + $0x2d4] sm:$0xf0] }
 0x162   :  { %2838 = vtanh.f32 %v535_v10  ;;  %v2271_v9 = vor.u32 %v2710_v7, %v2270_v6  ;;  %v2732_v10 = vld [vmem:[#allocation2 + $0x2e4] sm:$0xf0]  ;;  %v2722_v6 = vld [vmem:[#allocation2 + $0x294] sm:$0xf0]  ;;  %v2693_v7 = vld [vmem:[#allocation2 + $0x1b4] sm:$0xf] }
 0x163   :  { %v575_v22 = vpop.f32.mrf.mxu1  ;;  %v2359_v12 = vor.u32 %v2732_v10, %v2358_v8  ;;  %v2208_v8 = vld [vmem:[#allocation2 + $0x1b8] sm:$0xf0] }
 0x164   :  { %v576_v26 = vadd.f32 %v575_v22, %v557_v16  ;;  %1109 = vmatpush.bf16.msra.mxu1 %v2271_v9  ;;  %v2262_v16 = vld [vmem:[#allocation2 + $0x220] sm:$0xf]  ;;  %v2351_v22 = vor.u32 %v2730_v20, %v2350_v19  ;;  %v2211_v10 = vor.u32 %v2693_v7, %v2208_v8  ;;  %v2720_v20 = vld [vmem:[#allocation2 + $0x284] sm:$0xf0]  ;;  %v2719_v7 = vld [vmem:[#allocation2 + $0x284] sm:$0xf] }
 0x165   :  { %1125 = vmatpush.bf16.msra.mxu2 %v2359_v12  ;;  %v2731_v12 = vld [vmem:[#allocation2 + $0x2e4] sm:$0xf] }
 0x166   :  { %v2835_v30 = vpop.eup %2834  ;;  %v595_v32 = vadd.f32 %v594_v21, %v576_v26  ;;  %v2263_v21 = vor.u32 %v2708_v18, %v2262_v16  ;;  %v2230_v26 = vld [vmem:[#allocation2 + $0x1e0] sm:$0xf]  ;;  %v2363_v15 = vor.u32 %v2731_v12, %v2360_v13  ;;  %v2312_v12 = vld [vmem:[#allocation2 + $0x288] sm:$0xf0]  ;;  %v2711_v13 = vld [vmem:[#allocation2 + $0x244] sm:$0xf] }
 0x167   :  { %v608_v38 = vadd.f32 1.0, %v2835_v30  ;;  %v2837_v43 = vpop.eup %2836  ;;  %v2254_v30 = vld [vmem:[#allocation2 + $0x210] sm:$0xf]  ;;  %v2198_v16 = vld [vmem:[#allocation2 + $0x1a0] sm:$0xf] }
 0x168   :  { %v2839_v45 = vpop.eup %2838  ;;  %2840 = vtanh.f32 %v595_v32  ;;  %v615_v54 = vmul.f32 %v2837_v43, %v611_v36  ;;  %1110 = vmatpush.bf16.msra.mxu1 %v2263_v21  ;;  %v2231_v32 = vor.u32 %v2700_v29, %v2230_v26  ;;  %v2255_v36 = vor.u32 %v2706_v33, %v2254_v30  ;;  %v2222_v43 = vld [vmem:[#allocation2 + $0x1d0] sm:$0xf]  ;;  %v2310_v18 = vld [vmem:[#allocation2 + $0x280] sm:$0xf]  ;;  %v2691_v21 = vld [vmem:[#allocation2 + $0x1a4] sm:$0xf] }
 0x169   :  { %v612_v44 = vmul.f32 0.5, %v608_v38  ;;  %1126 = vmatpush.bf16.msra.mxu2 %v2351_v22  ;;  %v2343_v38 = vor.u32 %v2728_v35, %v2342_v34  ;;  %v2199_v19 = vor.u32 %v2692_v17, %v2198_v16  ;;  %v2200_v22 = vld [vmem:[#allocation2 + $0x1a8] sm:$0xf0]  ;;  %v2311_v23 = vor.u32 %v2720_v20, %v2310_v18  ;;  %v2352_v26 = vld [vmem:[#allocation2 + $0x2d8] sm:$0xf0] }
 0x16a   :  { %1087 = vmatpush.bf16.msra.mxu0 %v2231_v32  ;;  %v2203_v24 = vor.u32 %v2691_v21, %v2200_v22  ;;  %v2355_v29 = vor.u32 %v2729_v25, %v2352_v26  ;;  %v2190_v30 = vld [vmem:[#allocation2 + $0x190] sm:$0xf]  ;;  %v2690_v32 = vld [vmem:[#allocation2 + $0x194] sm:$0xf0]  ;;  %v2689_v34 = vld [vmem:[#allocation2 + $0x194] sm:$0xf]  ;;  %v2315_v17 = vor.u32 %v2719_v7, %v2312_v12 }
 0x16b   :  { %v577_v52 = vpop.f32.mrf.mxu1  ;;  %v616_v55 = vmul.f32 %v2839_v45, %v612_v44  ;;  %v2698_v44 = vld [vmem:[#allocation2 + $0x1d4] sm:$0xf0]  ;;  %v2246_v45 = vld [vmem:[#allocation2 + $0x200] sm:$0xf]  ;;  %v2191_v33 = vor.u32 %v2690_v32, %v2190_v30  ;;  %v2192_v35 = vld [vmem:[#allocation2 + $0x198] sm:$0xf0] }
 0x16c   :  { %v578_v56 = vadd.f32 %v577_v52, %v559_v47  ;;  %1111 = vmatpush.bf16.msra.mxu1 %v2255_v36  ;;  %v2223_v47 = vor.u32 %v2698_v44, %v2222_v43  ;;  %v2726_v52 = vld [vmem:[#allocation2 + $0x2b4] sm:$0xf0]  ;;  %v2727_v36 = vld [vmem:[#allocation2 + $0x2c4] sm:$0xf]  ;;  %v2183_v44 = vor.u32 %v2688_v42, %v2182_v40  ;;  %v2709_v26 = vld [vmem:[#allocation2 + $0x234] sm:$0xf] }
 0x16d   :  { %v619_v59 = vpack.c.bf16 %v616_v55, %v615_v54  ;;  %1127 = vmatpush.bf16.msra.mxu2 %v2343_v38  ;;  %v2247_v54 = vor.u32 %v2704_v49, %v2246_v45  ;;  %v2335_v55 = vor.u32 %v2726_v52, %v2334_v51  ;;  %v2195_v38 = vor.u32 %v2689_v34, %v2192_v35  ;;  %v2184_v49 = vld [vmem:[#allocation2 + $0x188] sm:$0xf0]  ;;  %v2725_v51 = vld [vmem:[#allocation2 + $0x2b4] sm:$0xf]  ;;  %v3124_v52 = vld [vmem:[%s3280_s6] ss:$0 sm:$0xff] }
 0x16e   :  { %v597_v60 = vadd.f32 %v596_v58, %v578_v56  ;;  %v2841_v57 = vpop.eup %2840  ;;  %v2224_v56 = vld [vmem:[#allocation2 + $0x1d8] sm:$0xf0]  ;;  %1088 = vmatpush.bf16.msra.mxu0 %v2223_v47  ;;  %v2347_v43 = vor.u32 %v2727_v36, %v2344_v39  ;;  %v2687_v47 = vld [vmem:[#allocation2 + $0x184] sm:$0xf]  ;;  %v2264_v35 = vld [vmem:[#allocation2 + $0x228] sm:$0xf0] }
 0x16f   :  { %697 = vmatmul.bf16.vlgmr.msrb.gmra.mxu3 %v619_v59  ;;  %v609_v61 = vadd.f32 1.0, %v2841_v57  ;;  %v2227_v58 = vor.u32 %v2697_v41, %v2224_v56  ;;  %v2214_v59 = vld [vmem:[#allocation2 + $0x1c0] sm:$0xf]  ;;  %v2724_v57 = vld [vmem:[#allocation2 + $0x2a4] sm:$0xf0] }
 0x170   :  { %2842 = vtanh.f32 %v597_v60  ;;  %1112 = vmatpush.bf16.msra.mxu1 %v2247_v54  ;;  %v2696_v60 = vld [vmem:[#allocation2 + $0x1c4] sm:$0xf0]  ;;  %v2187_v54 = vor.u32 %v2687_v47, %v2184_v49  ;;  %v2717_v56 = vld [vmem:[#allocation2 + $0x274] sm:$0xf]  ;;  %v2707_v34 = vld [vmem:[#allocation2 + $0x224] sm:$0xf] }
 0x171   :  { %2844 = vtanh.f32 %v538_v46  ;;  %v613_v62 = vmul.f32 0.5, %v609_v61  ;;  %1128 = vmatpush.bf16.msra.mxu2 %v2335_v55  ;;  %v2326_v46 = vld [vmem:[#allocation2 + $0x2a0] sm:$0xf]  ;;  %1145 = vmatpush.bf16.msra.mxu3 %v2227_v58  ;;  %v2215_v53 = vor.u32 %v2696_v60, %v2214_v59  ;;  %v2216_v61 = vld [vmem:[#allocation2 + $0x1c8] sm:$0xf0]  ;;  %v2267_v40 = vor.u32 %v2707_v34, %v2264_v35 }
 0x172   :  { %2846 = vtanh.f32 %v540_v48  ;;  %v2695_v48 = vld [vmem:[#allocation2 + $0x1c4] sm:$0xf]  ;;  %v2336_v55 = vld [vmem:[#allocation2 + $0x2b8] sm:$0xf0]  ;;  %v2705_v42 = vld [vmem:[#allocation2 + $0x214] sm:$0xf] }
 0x173   :  { %1089 = vmatpush.bf16.msra.mxu0 %v2215_v53  ;;  %v2339_v41 = vor.u32 %v2725_v51, %v2336_v55  ;;  %v2304_v58 = vld [vmem:[#allocation2 + $0x278] sm:$0xf0]  ;;  %v2723_v59 = vld [vmem:[#allocation2 + $0x2a4] sm:$0xf]  ;;  %v2328_v53 = vld [vmem:[#allocation2 + $0x2a8] sm:$0xf0] }
 0x174   :  { %v2740_v34 = vld [vmem:[#allocation5 + $0x68] sm:$0xff] }
 0x176   :  { %v2843_v37 = vpop.eup %2842 }
 0x177   :  { %v610_v63 = vadd.f32 1.0, %v2843_v37  ;;  %v2845_v0 = vpop.eup %2844  ;;  %v2327_v37 = vor.u32 %v2724_v57, %v2326_v46  ;;  %v2307_v46 = vor.u32 %v2717_v56, %v2304_v58  ;;  %v2715_v57 = vld [vmem:[#allocation2 + $0x264] sm:$0xf] }
 0x178   :  { %v2847_v27 = vpop.eup %2846  ;;  %v617_v3 = vmul.f32 %v2845_v0, %v613_v62  ;;  %v2219_v62 = vor.u32 %v2695_v48, %v2216_v61  ;;  %v2368_v0 = vld [vmem:[#allocation2 + $0x2f8] sm:$0xf0]  ;;  %v2296_v48 = vld [vmem:[#allocation2 + $0x268] sm:$0xf0]  ;;  %v2331_v61 = vor.u32 %v2723_v59, %v2328_v53 }
 0x179   :  { %v614_v2 = vmul.f32 0.5, %v610_v63  ;;  %v2733_v63 = vld [vmem:[#allocation2 + $0x2f4] sm:$0xf]  ;;  %1129 = vmatpush.bf16.msra.mxu2 %v2327_v37  ;;  %v2248_v53 = vld [vmem:[#allocation2 + $0x208] sm:$0xf0] }
 0x17a   :  { %1146 = vmatpush.bf16.msra.mxu3 %v2219_v62  ;;  %v2721_v37 = vld [vmem:[#allocation2 + $0x294] sm:$0xf]  ;;  %v2320_v62 = vld [vmem:[#allocation2 + $0x298] sm:$0xf0] }
 0x17b   :  { %v618_v4 = vmul.f32 %v2847_v27, %v614_v2  ;;  %v2371_v2 = vor.u32 %v2733_v63, %v2368_v0  ;;  %v2206_v27 = vld [vmem:[#allocation2 + $0x1b0] sm:$0xf]  ;;  %v2299_v63 = vor.u32 %v2715_v57, %v2296_v48 }
 0x17d   :  { %v620_v5 = vpack.c.bf16 %v618_v4, %v617_v3  ;;  %v2694_v3 = vld [vmem:[#allocation2 + $0x1b4] sm:$0xf0]  ;;  %v2318_v4 = vld [vmem:[#allocation2 + $0x290] sm:$0xf]  ;;  %1181 = vmatpush.bf16.msrb.mxu1 %v2371_v2 }
 0x17e   :  { %v2319_v9 = vor.u32 %v2722_v6, %v2318_v4  ;;  %1147 = vmatpush.bf16.msra.mxu3 %v2211_v10  ;;  %v2288_v6 = vld [vmem:[#allocation2 + $0x258] sm:$0xf0] }
 0x17f   :  { %702 = vmatmul.bf16.gmra.mxu3 %v620_v5  ;;  %v2207_v5 = vor.u32 %v2694_v3, %v2206_v27  ;;  %v2323_v3 = vor.u32 %v2721_v37, %v2320_v62 }
 0x180   :  { %1130 = vmatpush.bf16.msra.mxu2 %v2319_v9 }
 0x181   :  { %1090 = vmatpush.bf16.msra.mxu0 %v2207_v5  ;;  %1182 = vmatpush.bf16.msrb.mxu1 %v2363_v15  ;;  %v2713_v5 = vld [vmem:[#allocation2 + $0x254] sm:$0xf]  ;;  %v2280_v15 = vld [vmem:[#allocation2 + $0x248] sm:$0xf0] }
 0x182   :  { %1148 = vmatpush.bf16.msra.mxu3 %v2203_v24  ;;  %v2291_v10 = vor.u32 %v2713_v5, %v2288_v6 }
 0x184   :  { %1131 = vmatpush.bf16.msra.mxu2 %v2311_v23 }
 0x185   :  { %1091 = vmatpush.bf16.msra.mxu0 %v2199_v19  ;;  %1183 = vmatpush.bf16.msrb.mxu1 %v2355_v29  ;;  %v2283_v19 = vor.u32 %v2711_v13, %v2280_v15  ;;  %v2272_v29 = vld [vmem:[#allocation2 + $0x238] sm:$0xf0] }
 0x186   :  { %1149 = vmatpush.bf16.msra.mxu3 %v2195_v38 }
 0x189   :  { %1092 = vmatpush.bf16.msra.mxu0 %v2191_v33  ;;  %1184 = vmatpush.bf16.msrb.mxu1 %v2347_v43  ;;  %v2275_v33 = vor.u32 %v2709_v26, %v2272_v29  ;;  %v2256_v43 = vld [vmem:[#allocation2 + $0x218] sm:$0xf0] }
 0x18a   :  { %1150 = vmatpush.bf16.msra.mxu3 %v2187_v54  ;;  %v2259_v55 = vor.u32 %v2705_v42, %v2256_v43  ;;  %v2742_v29 = vld [vmem:[#allocation5 + $0x78] sm:$0xff]  ;;  %v2737_v42 = vld [vmem:[#allocation5 + $0x50] sm:$0xff]  ;;  %v2736_v43 = vld [vmem:[#allocation5 + $0x48] sm:$0xff] }
 0x18b   :  { %1292 = vmatpush.bf16.msrb.mxu2 %v2742_v29 }
 0x18d   :  { %1093 = vmatpush.bf16.msra.mxu0 %v2183_v44  ;;  %1185 = vmatpush.bf16.msrb.mxu1 %v2339_v41 }
 0x191   :  { %1162 = vmatpush.bf16.msrb.mxu0 %v2307_v46  ;;  %1186 = vmatpush.bf16.msrb.mxu1 %v2331_v61 }
 0x195   :  { %1163 = vmatpush.bf16.msrb.mxu0 %v2299_v63  ;;  %1187 = vmatpush.bf16.msrb.mxu1 %v2323_v3 }
 0x199   :  { %1164 = vmatpush.bf16.msrb.mxu0 %v2291_v10  ;;  %1188 = vmatpush.bf16.msrb.mxu1 %v2315_v17 }
 0x19d   :  { %1165 = vmatpush.bf16.msrb.mxu0 %v2283_v19 }
 0x1a1   :  { %1166 = vmatpush.bf16.msrb.mxu0 %v2275_v33  ;;  %v2741_v33 = vld [vmem:[#allocation5 + $0x70] sm:$0xff] }
 0x1a2   :  { %1293 = vmatpush.bf16.msrb.mxu2 %v2741_v33 }
 0x1a5   :  { %1167 = vmatpush.bf16.msrb.mxu0 %v2267_v40 }
 0x1a6   :  { %1294 = vmatpush.bf16.msrb.mxu2 %v2740_v34 }
 0x1a9   :  { %1168 = vmatpush.bf16.msrb.mxu0 %v2259_v55 }
 0x1f2   :  { %v698_v45 = vpop.f32.mrf.mxu3 }
 0x1f3   :  { %v3127_v60 = vadd.f32 %v3124_v52, %v698_v45 }
 0x1f5   :  { %v712_v2 = vpack.c.bf16 %v3127_v60, %v3127_v60  ;;  %v737_v20 = vrot.slane %v3127_v60, 2  ;;  %v718_v36 = vrot.slane %v3127_v60, 6 }
 0x1f7   :  { %v770_v8 = vunpack.c.l.b16 %v712_v2 }
 0x1fa   :  { %v700_v0 = vpop.f32.mrf.mxu3 }
 0x1fb   :  { %v3132_v27 = vadd.f32 %v3124_v52, %v700_v0 }
 0x1fd   :  { %v713_v4 = vpack.c.bf16 %v3132_v27, %v3132_v27  ;;  %v738_v16 = vrot.slane %v3132_v27, 2  ;;  %v719_v25 = vrot.slane %v3132_v27, 6 }
 0x1ff   :  { %v771_v9 = vunpack.c.l.b16 %v713_v4  ;;  %v744_v23 = vsel %vm741_vm7, %v737_v20, %v738_v16  ;;  %v725_v45 = vsel %vm722_vm9, %v718_v36, %v719_v25 }
 0x200   :  { %v750_v32 = vpack.c.bf16 %v744_v23, %v744_v23  ;;  %v732_v46 = vpack.c.bf16 %v725_v45, %v725_v45 }
 0x201   :  { %v3137_v18 = vpack.c.b16 %v771_v9, %v770_v8 }
 0x202   :  { %v703_v21 = vpop.f32.mrf.mxu3  ;;  %v782_v49 = vunpack.c.l.b16 %v750_v32  ;;  %v759_v6 = vunpack.c.l.b16 %v732_v46 }
 0x203   :  { %v3142_v22 = vadd.f32 %v3124_v52, %v703_v21  ;;  %1113 = vmatmul.bf16.vlgmr.msra.gmra.mxu1 %v3137_v18 }
 0x205   :  { %v739_v24 = vrot.slane %v3142_v22, 2  ;;  %v714_v54 = vpack.c.bf16 %v3142_v22, %v3142_v22  ;;  %v720_v7 = vrot.slane %v3142_v22, 6 }
 0x207   :  { %v743_v30 = vsel %vm741_vm7, %v738_v16, %v739_v24  ;;  %v772_v57 = vunpack.c.l.b16 %v714_v54  ;;  %v724_v15 = vsel %vm722_vm9, %v719_v25, %v720_v7 }
 0x208   :  { %v747_v38 = vsel %vm736_vm8, %v743_v30, 0.0  ;;  %v729_v17 = vsel %vm716_vm10, %v724_v15, 0.0  ;;  %v2772_v15 = vld [vmem:[#allocation2 + $0x3e4] sm:$0xf0] }
 0x209   :  { %v751_v39 = vpack.c.bf16 %v747_v38, %v747_v38  ;;  %v733_v21 = vpack.c.bf16 %v729_v17, %v729_v17  ;;  %v2739_v38 = vld [vmem:[#allocation5 + $0x60] sm:$0xff] }
 0x20a   :  { %v705_v44 = vpop.f32.mrf.mxu3  ;;  %1295 = vmatpush.bf16.msrb.mxu2 %v2739_v38 }
 0x20b   :  { %v3159_v47 = vadd.f32 %v3124_v52, %v705_v44  ;;  %v783_v51 = vunpack.c.l.b16 %v751_v39  ;;  %v2703_v52 = vld [vmem:[#allocation2 + $0x204] sm:$0xf]  ;;  %v2738_v39 = vld [vmem:[#allocation5 + $0x58] sm:$0xff] }
 0x20c   :  { %v2251_v2 = vor.u32 %v2703_v52, %v2248_v53 }
 0x20d   :  { %v721_v41 = vrot.slane %v3159_v47, 6  ;;  %v740_v56 = vrot.slane %v3159_v47, 2  ;;  %v786_v58 = vpack.c.b16 %v783_v51, %v782_v49  ;;  %v715_v59 = vpack.c.bf16 %v3159_v47, %v3159_v47  ;;  %v2735_v49 = vld [vmem:[#allocation5 + $0x40] sm:$0xff] }
 0x20e   :  { %1169 = vmatpush.bf16.msrb.mxu0 %v2251_v2  ;;  %1296 = vmatpush.bf16.msrb.mxu2 %v2738_v39  ;;  %v2179_v51 = vld [vmem:[%s3278_s4 + $0x2] sm:$0x3] }
 0x20f   :  { %1132 = vmatmul.bf16.vlgmr.msra.gmra.mxu2 %v786_v58  ;;  %v773_v48 = vunpack.c.l.b16 %v715_v59  ;;  %v726_v61 = vsel %vm722_vm9, %v721_v41, %v718_v36  ;;  %v745_v37 = vsel %vm741_vm7, %v740_v56, %v737_v20  ;;  %v742_v3 = vsel %vm741_vm7, %v739_v24, %v740_v56 }
 0x210   :  { %v727_v62 = vsel %vm716_vm10, %v726_v61, 0.0  ;;  %v749_v4 = vsel %vm736_vm8, %v745_v37, 0.0  ;;  %v752_v9 = vpack.c.bf16 %v742_v3, %v742_v3  ;;  %v723_v16 = vsel %vm722_vm9, %v720_v7, %v721_v41  ;;  %v2528_v7 = vld [vmem:[#allocation2 + $0x3f0] sm:$0xf] }
 0x211   :  { %v775_v63 = vpack.c.b16 %v773_v48, %v772_v57  ;;  %v731_v0 = vpack.c.bf16 %v727_v62, %v727_v62  ;;  %v753_v10 = vpack.c.bf16 %v749_v4, %v749_v4  ;;  %v734_v20 = vpack.c.bf16 %v723_v16, %v723_v16 }
 0x212   :  { %v784_v12 = vunpack.c.l.b16 %v752_v9  ;;  %v760_v24 = vunpack.c.l.b16 %v733_v21  ;;  %1297 = vmatpush.bf16.msrb.mxu2 %v2737_v42  ;;  %v843_v54 = vperm.slane %v2179_v51, 1 }
 0x213   :  { %1118 = vmatmul.bf16.gmra.mxu1 %v775_v63  ;;  %v758_v5 = vunpack.c.l.b16 %v731_v0  ;;  %v785_v13 = vunpack.c.l.b16 %v753_v10  ;;  %v761_v23 = vunpack.c.l.b16 %v734_v20  ;;  %v2790_v20 = vld [vmem:[#allocation2 + $0x474] sm:$0xf0] }
 0x215   :  { %v762_v8 = vpack.c.b16 %v759_v6, %v758_v5  ;;  %v787_v19 = vpack.c.b16 %v785_v13, %v784_v12  ;;  %v763_v26 = vpack.c.b16 %v761_v23, %v760_v24  ;;  %v2520_v13 = vld [vmem:[#allocation2 + $0x3e0] sm:$0xf] }
 0x216   :  { %1298 = vmatpush.bf16.msrb.mxu2 %v2736_v43  ;;  %v2521_v17 = vor.u32 %v2772_v15, %v2520_v13  ;;  %v2584_v13 = vld [vmem:[#allocation2 + $0x460] sm:$0xf] }
 0x217   :  { %1094 = vmatmul.bf16.vlgmr.msra.gmra.mxu0 %v762_v8  ;;  %1151 = vmatmul.bf16.vlgmr.msra.gmra.mxu3 %v762_v8  ;;  %v2774_v8 = vld [vmem:[#allocation2 + $0x3f4] sm:$0xf0] }
 0x218   :  { %v2529_v12 = vor.u32 %v2774_v8, %v2528_v7 }
 0x21a   :  { %1299 = vmatpush.bf16.msrb.mxu2 %v2735_v49  ;;  %1699 = vmatpush.bf16.msra.mxu0 %v2529_v12  ;;  %v2768_v49 = vld [vmem:[#allocation2 + $0x3c4] sm:$0xf0]  ;;  %v2766_v12 = vld [vmem:[#allocation2 + $0x3b4] sm:$0xf0] }
 0x21e   :  { %1700 = vmatpush.bf16.msra.mxu0 %v2521_v17 }
 0x21f   :  { %1137 = vmatmul.bf16.gmra.mxu2 %v787_v19 }
 0x223   :  { %1189 = vmatmul.bf16.vlgmr.msrb.gmra.mxu1 %v786_v58  ;;  %v842_v58 = vperm.slane %v2179_v51, 0 }
 0x227   :  { %1099 = vmatmul.bf16.gmra.mxu0 %v763_v26  ;;  %1156 = vmatmul.bf16.gmra.mxu3 %v763_v26  ;;  %v2512_v26 = vld [vmem:[#allocation2 + $0x3d0] sm:$0xf] }
 0x233   :  { %1194 = vmatmul.bf16.gmra.mxu1 %v787_v19  ;;  %v2592_v19 = vld [vmem:[#allocation2 + $0x470] sm:$0xf] }
 0x234   :  { %v2593_v29 = vor.u32 %v2790_v20, %v2592_v19  ;;  %v2464_v19 = vld [vmem:[#allocation2 + $0x370] sm:$0xf]  ;;  %v2758_v20 = vld [vmem:[#allocation2 + $0x374] sm:$0xf0] }
 0x236   :  { %1718 = vmatpush.bf16.msra.mxu1 %v2593_v29 }
 0x237   :  { %1170 = vmatmul.bf16.vlgmr.msrb.gmra.mxu0 %v3137_v18 }
 0x247   :  { %1175 = vmatmul.bf16.gmra.mxu0 %v775_v63 }
 0x280   :  { %v1114_v25 = vpop.f32.mrf.mxu1 }
 0x288   :  { %v1116_v30 = vpop.f32.mrf.mxu1 }
 0x290   :  { %v3186_v35 = vpop.f32.mrf.mxu1 }
 0x292   :  { %v1133_v41 = vpop.f32.mrf.mxu2 }
 0x294   :  { %v1095_v32 = vpop.f32.mrf.mxu0 }
 0x295   :  { %v1096_v57 = vadd.f32 %v1095_v32, %v842_v58 }
 0x297   :  { %v1115_v62 = vadd.f32 %v1114_v25, %v1096_v57  ;;  %v2770_v25 = vld [vmem:[#allocation2 + $0x3d4] sm:$0xf0] }
 0x298   :  { %v3188_v18 = vpop.f32.mrf.mxu1 }
 0x299   :  { %v1134_v6 = vadd.f32 %v1133_v41, %v1115_v62 }
 0x29a   :  { %v1152_v44 = vpop.f32.mrf.mxu3  ;;  %v1135_v63 = vpop.f32.mrf.mxu2 }
 0x29b   :  { %v1153_v56 = vadd.f32 %v1152_v44, %v843_v54  ;;  %v2504_v44 = vld [vmem:[#allocation2 + $0x3c0] sm:$0xf] }
 0x29c   :  { %v1097_v36 = vpop.f32.mrf.mxu0 }
 0x29d   :  { %v1098_v48 = vadd.f32 %v1097_v36, %v842_v58  ;;  %v2513_v36 = vor.u32 %v2770_v25, %v2512_v26  ;;  %v2576_v26 = vld [vmem:[#allocation2 + $0x450] sm:$0xf]  ;;  %v2786_v25 = vld [vmem:[#allocation2 + $0x454] sm:$0xf0] }
 0x29f   :  { %v1117_v2 = vadd.f32 %v1116_v30, %v1098_v48  ;;  %1701 = vmatpush.bf16.msra.mxu0 %v2513_v36  ;;  %v2456_v36 = vld [vmem:[#allocation2 + $0x360] sm:$0xf] }
 0x2a0   :  { %v1190_v55 = vpop.f32.mrf.mxu1 }
 0x2a1   :  { %v1136_v10 = vadd.f32 %v1135_v63, %v1117_v2 }
 0x2a2   :  { %v1154_v59 = vpop.f32.mrf.mxu3  ;;  %v1138_v32 = vpop.f32.mrf.mxu2 }
 0x2a3   :  { %v1155_v37 = vadd.f32 %v1154_v59, %v843_v54 }
 0x2a4   :  { %v1100_v40 = vpop.f32.mrf.mxu0 }
 0x2a5   :  { %v1101_v38 = vadd.f32 %v1100_v40, %v842_v58 }
 0x2a8   :  { %v1192_v61 = vpop.f32.mrf.mxu1 }
 0x2aa   :  { %v1157_v4 = vpop.f32.mrf.mxu3 }
 0x2ab   :  { %v1158_v16 = vadd.f32 %v1157_v4, %v843_v54 }
 0x2ac   :  { %v1102_v45 = vpop.f32.mrf.mxu0 }
 0x2ad   :  { %v1103_v51 = vadd.f32 %v1102_v45, %v842_v58  ;;  %v1140_v58 = vpop.f32.mrf.mxu2 }
 0x2af   :  { %v1122_v40 = vadd.f32 %v3188_v18, %v1103_v51 }
 0x2b0   :  { %v1195_v21 = vpop.f32.mrf.mxu1 }
 0x2b2   :  { %v1159_v39 = vpop.f32.mrf.mxu3 }
 0x2b3   :  { %v1160_v59 = vadd.f32 %v1159_v39, %v843_v54  ;;  %v1141_v54 = vadd.f32 %v1140_v58, %v1122_v40  ;;  %v2480_v39 = vld [vmem:[#allocation2 + $0x390] sm:$0xf] }
 0x2b4   :  { %v1171_v46 = vpop.f32.mrf.mxu0  ;;  %v2560_v40 = vld [vmem:[#allocation2 + $0x430] sm:$0xf] }
 0x2b5   :  { %v1172_v52 = vadd.f32 %v1171_v46, %v1153_v56  ;;  %v2505_v46 = vor.u32 %v2768_v49, %v2504_v44  ;;  %v2568_v44 = vld [vmem:[#allocation2 + $0x440] sm:$0xf]  ;;  %v2784_v49 = vld [vmem:[#allocation2 + $0x444] sm:$0xf0] }
 0x2b7   :  { %v1191_v53 = vadd.f32 %v1190_v55, %v1172_v52  ;;  %v1120_v52 = vadd.f32 %v3186_v35, %v1101_v38  ;;  %1702 = vmatpush.bf16.msra.mxu0 %v2505_v46  ;;  %v2756_v38 = vld [vmem:[#allocation2 + $0x364] sm:$0xf0]  ;;  %v2448_v46 = vld [vmem:[#allocation2 + $0x350] sm:$0xf] }
 0x2b9   :  { %2848 = vtanh.f32 %v1191_v53  ;;  %v1139_v45 = vadd.f32 %v1138_v32, %v1120_v52  ;;  %v2757_v32 = vld [vmem:[#allocation2 + $0x374] sm:$0xf]  ;;  %v2754_v52 = vld [vmem:[#allocation2 + $0x354] sm:$0xf0] }
 0x2bc   :  { %v1173_v0 = vpop.f32.mrf.mxu0 }
 0x2bd   :  { %v1174_v3 = vadd.f32 %v1173_v0, %v1155_v37  ;;  %v1197_v37 = vpop.f32.mrf.mxu1 }
 0x2bf   :  { %v1193_v5 = vadd.f32 %v1192_v61, %v1174_v3  ;;  %v2849_v9 = vpop.eup %2848 }
 0x2c0   :  { %v1208_v23 = vadd.f32 1.0, %v2849_v9 }
 0x2c1   :  { %2850 = vtanh.f32 %v1193_v5 }
 0x2c2   :  { %2852 = vtanh.f32 %v1134_v6  ;;  %v1212_v42 = vmul.f32 0.5, %v1208_v23  ;;  %v2465_v23 = vor.u32 %v2758_v20, %v2464_v19  ;;  %v2434_v19 = vld [vmem:[#allocation2 + $0x338] sm:$0xf0] }
 0x2c3   :  { %2854 = vtanh.f32 %v1136_v10  ;;  %v2496_v10 = vld [vmem:[#allocation2 + $0x3b0] sm:$0xf] }
 0x2c4   :  { %v1176_v24 = vpop.f32.mrf.mxu0  ;;  %v2497_v15 = vor.u32 %v2766_v12, %v2496_v10  ;;  %1680 = vmatpush.bf16.msrb.mxu3 %v2465_v23  ;;  %v2432_v10 = vld [vmem:[#allocation2 + $0x330] sm:$0xf]  ;;  %v2750_v12 = vld [vmem:[#allocation2 + $0x334] sm:$0xf0]  ;;  %v2787_v23 = vld [vmem:[#allocation2 + $0x464] sm:$0xf] }
 0x2c5   :  { %v1177_v30 = vadd.f32 %v1176_v24, %v1158_v16  ;;  %v2788_v16 = vld [vmem:[#allocation2 + $0x464] sm:$0xf0] }
 0x2c6   :  { %v2585_v17 = vor.u32 %v2788_v16, %v2584_v13  ;;  %1703 = vmatpush.bf16.msra.mxu0 %v2497_v15  ;;  %v2764_v24 = vld [vmem:[#allocation2 + $0x3a4] sm:$0xf0]  ;;  %v2544_v13 = vld [vmem:[#allocation2 + $0x410] sm:$0xf]  ;;  %v2433_v15 = vor.u32 %v2750_v12, %v2432_v10  ;;  %v2778_v16 = vld [vmem:[#allocation2 + $0x414] sm:$0xf0] }
 0x2c7   :  { %v2851_v33 = vpop.eup %2850  ;;  %v1196_v34 = vadd.f32 %v1195_v21, %v1177_v30  ;;  %v2488_v21 = vld [vmem:[#allocation2 + $0x3a0] sm:$0xf]  ;;  %v2577_v30 = vor.u32 %v2786_v25, %v2576_v26  ;;  %v2545_v20 = vor.u32 %v2778_v16, %v2544_v13  ;;  %v2777_v12 = vld [vmem:[#allocation2 + $0x414] sm:$0xf]  ;;  %v2546_v13 = vld [vmem:[#allocation2 + $0x418] sm:$0xf0] }
 0x2c8   :  { %v1209_v43 = vadd.f32 1.0, %v2851_v33  ;;  %v2853_v55 = vpop.eup %2852  ;;  %1719 = vmatpush.bf16.msra.mxu1 %v2585_v17  ;;  %v2489_v29 = vor.u32 %v2764_v24, %v2488_v21  ;;  %v2466_v33 = vld [vmem:[#allocation2 + $0x378] sm:$0xf0]  ;;  %v2749_v17 = vld [vmem:[#allocation2 + $0x334] sm:$0xf] }
 0x2c9   :  { %v2855_v56 = vpop.eup %2854  ;;  %2856 = vtanh.f32 %v1196_v34  ;;  %v1216_v53 = vmul.f32 %v2853_v55, %v1212_v42  ;;  %v2469_v34 = vor.u32 %v2757_v32, %v2466_v33  ;;  %v2457_v42 = vor.u32 %v2756_v38, %v2456_v36  ;;  %v2586_v24 = vld [vmem:[#allocation2 + $0x468] sm:$0xf0]  ;;  %v2424_v25 = vld [vmem:[#allocation2 + $0x320] sm:$0xf]  ;;  %v2776_v33 = vld [vmem:[#allocation2 + $0x404] sm:$0xf0] }
 0x2ca   :  { %v1213_v41 = vmul.f32 0.5, %v1209_v43  ;;  %1704 = vmatpush.bf16.msra.mxu0 %v2489_v29  ;;  %v2762_v43 = vld [vmem:[#allocation2 + $0x394] sm:$0xf0]  ;;  %v2569_v55 = vor.u32 %v2784_v49, %v2568_v44  ;;  %v2437_v21 = vor.u32 %v2749_v17, %v2434_v19  ;;  %v2589_v26 = vor.u32 %v2787_v23, %v2586_v24  ;;  %v2748_v29 = vld [vmem:[#allocation2 + $0x324] sm:$0xf0] }
 0x2cb   :  { %1737 = vmatpush.bf16.msra.mxu2 %v2469_v34  ;;  %v2481_v51 = vor.u32 %v2762_v43, %v2480_v39  ;;  %1681 = vmatpush.bf16.msrb.mxu3 %v2457_v42  ;;  %v2425_v32 = vor.u32 %v2748_v29, %v2424_v25  ;;  %v2747_v34 = vld [vmem:[#allocation2 + $0x324] sm:$0xf]  ;;  %v2426_v36 = vld [vmem:[#allocation2 + $0x328] sm:$0xf0]  ;;  %v2785_v42 = vld [vmem:[#allocation2 + $0x454] sm:$0xf]  ;;  %v2549_v17 = vor.u32 %v2777_v12, %v2546_v13 }
 0x2cc   :  { %v1217_v57 = vmul.f32 %v2855_v56, %v1213_v41  ;;  %v1178_v48 = vpop.f32.mrf.mxu0  ;;  %1720 = vmatpush.bf16.msra.mxu1 %v2577_v30  ;;  %v2755_v41 = vld [vmem:[#allocation2 + $0x364] sm:$0xf]  ;;  %v2458_v56 = vld [vmem:[#allocation2 + $0x368] sm:$0xf0]  ;;  %v2536_v30 = vld [vmem:[#allocation2 + $0x400] sm:$0xf]  ;;  %v2429_v39 = vor.u32 %v2747_v34, %v2426_v36  ;;  %v709_v19 = vadd.f32 %v3132_v27, %v3051_v11 }
 0x2cd   :  { %v1179_v61 = vadd.f32 %v1178_v48, %v1160_v59  ;;  %v2461_v59 = vor.u32 %v2755_v41, %v2458_v56  ;;  %v2760_v48 = vld [vmem:[#allocation2 + $0x384] sm:$0xf0]  ;;  %v2537_v38 = vor.u32 %v2776_v33, %v2536_v30  ;;  %v2578_v43 = vld [vmem:[#allocation2 + $0x458] sm:$0xf0]  ;;  %v3198_v44 = vld [vmem:[%s3280_s6 + $0x1] ss:$0 sm:$0xff] }
 0x2ce   :  { %v1220_v62 = vpack.c.bf16 %v1217_v57, %v1216_v53  ;;  %1705 = vmatpush.bf16.msra.mxu0 %v2481_v51  ;;  %v2472_v53 = vld [vmem:[#allocation2 + $0x380] sm:$0xf]  ;;  %v2449_v57 = vor.u32 %v2754_v52, %v2448_v46  ;;  %v2581_v49 = vor.u32 %v2785_v42, %v2578_v43  ;;  %v2416_v51 = vld [vmem:[#allocation2 + $0x310] sm:$0xf]  ;;  %v2745_v41 = vld [vmem:[#allocation2 + $0x314] sm:$0xf] }
 0x2cf   :  { %v1198_v63 = vadd.f32 %v1197_v37, %v1179_v61  ;;  %v2857_v0 = vpop.eup %2856  ;;  %1738 = vmatpush.bf16.msra.mxu2 %v2461_v59  ;;  %v2782_v61 = vld [vmem:[#allocation2 + $0x434] sm:$0xf0]  ;;  %v2473_v37 = vor.u32 %v2760_v48, %v2472_v53  ;;  %v2418_v59 = vld [vmem:[#allocation2 + $0x318] sm:$0xf0]  ;;  %v2783_v46 = vld [vmem:[#allocation2 + $0x444] sm:$0xf] }
 0x2d0   :  { %1300 = vmatmul.bf16.vlgmr.msrb.gmra.mxu2 %v1220_v62  ;;  %v1210_v2 = vadd.f32 1.0, %v2857_v0  ;;  %1721 = vmatpush.bf16.msra.mxu1 %v2569_v55  ;;  %v2561_v62 = vor.u32 %v2782_v61, %v2560_v40  ;;  %v2440_v0 = vld [vmem:[#allocation2 + $0x340] sm:$0xf]  ;;  %v2746_v55 = vld [vmem:[#allocation2 + $0x314] sm:$0xf0]  ;;  %v2421_v53 = vor.u32 %v2745_v41, %v2418_v59 }
 0x2d1   :  { %2858 = vtanh.f32 %v1198_v63  ;;  %v2753_v63 = vld [vmem:[#allocation2 + $0x354] sm:$0xf]  ;;  %1682 = vmatpush.bf16.msrb.mxu3 %v2449_v57  ;;  %v2417_v56 = vor.u32 %v2746_v55, %v2416_v51  ;;  %v2570_v52 = vld [vmem:[#allocation2 + $0x448] sm:$0xf0]  ;;  %v2408_v48 = vld [vmem:[#allocation2 + $0x300] sm:$0xf] }
 0x2d2   :  { %2860 = vtanh.f32 %v1139_v45  ;;  %v1214_v3 = vmul.f32 0.5, %v1210_v2  ;;  %v2450_v45 = vld [vmem:[#allocation2 + $0x358] sm:$0xf0]  ;;  %1706 = vmatpush.bf16.msra.mxu0 %v2473_v37  ;;  %v2552_v2 = vld [vmem:[#allocation2 + $0x420] sm:$0xf]  ;;  %v2573_v57 = vor.u32 %v2783_v46, %v2570_v52 }
 0x2d3   :  { %2862 = vtanh.f32 %v1141_v54  ;;  %v2453_v58 = vor.u32 %v2753_v63, %v2450_v45  ;;  %v2752_v54 = vld [vmem:[#allocation2 + $0x344] sm:$0xf0]  ;;  %v2410_v63 = vld [vmem:[#allocation2 + $0x308] sm:$0xf0]  ;;  %v2781_v45 = vld [vmem:[#allocation2 + $0x434] sm:$0xf] }
 0x2d4   :  { %1722 = vmatpush.bf16.msra.mxu1 %v2561_v62  ;;  %v2744_v40 = vld [vmem:[#allocation2 + $0x304] sm:$0xf0]  ;;  %v2743_v62 = vld [vmem:[#allocation2 + $0x304] sm:$0xf]  ;;  %v2769_v23 = vld [vmem:[#allocation2 + $0x3d4] sm:$0xf] }
 0x2d5   :  { %1739 = vmatpush.bf16.msra.mxu2 %v2453_v58  ;;  %v2409_v61 = vor.u32 %v2744_v40, %v2408_v48  ;;  %v2514_v24 = vld [vmem:[#allocation2 + $0x3d8] sm:$0xf0]  ;;  %v2767_v33 = vld [vmem:[#allocation2 + $0x3c4] sm:$0xf]  ;;  %v2506_v34 = vld [vmem:[#allocation2 + $0x3c8] sm:$0xf0] }
 0x2d6   :  { %v2517_v30 = vor.u32 %v2769_v23, %v2514_v24  ;;  %v2509_v11 = vor.u32 %v2767_v33, %v2506_v34  ;;  %v2498_v59 = vld [vmem:[#allocation2 + $0x3b8] sm:$0xf0]  ;;  %v2490_v48 = vld [vmem:[#allocation2 + $0x3a8] sm:$0xf0] }
 0x2d7   :  { %v2859_v35 = vpop.eup %2858  ;;  %v2796_v34 = vld [vmem:[#allocation5 + $0xa8] sm:$0xff] }
 0x2d8   :  { %v1211_v4 = vadd.f32 1.0, %v2859_v35  ;;  %v2861_v5 = vpop.eup %2860  ;;  %v2441_v35 = vor.u32 %v2752_v54, %v2440_v0  ;;  %v2413_v0 = vor.u32 %v2743_v62, %v2410_v63  ;;  %v2562_v54 = vld [vmem:[#allocation2 + $0x438] sm:$0xf0]  ;;  %v711_v63 = vadd.f32 %v3159_v47, %v3085_v50 }
 0x2d9   :  { %v2863_v18 = vpop.eup %2862  ;;  %v1218_v7 = vmul.f32 %v2861_v5, %v1214_v3  ;;  %v2780_v3 = vld [vmem:[#allocation2 + $0x424] sm:$0xf0]  ;;  %v2442_v5 = vld [vmem:[#allocation2 + $0x348] sm:$0xf0] }
 0x2da   :  { %v1215_v6 = vmul.f32 0.5, %v1211_v4  ;;  %v2751_v4 = vld [vmem:[#allocation2 + $0x344] sm:$0xf]  ;;  %1683 = vmatpush.bf16.msrb.mxu3 %v2441_v35  ;;  %v2565_v35 = vor.u32 %v2781_v45, %v2562_v54 }
 0x2dc   :  { %v1219_v8 = vmul.f32 %v2863_v18, %v1215_v6  ;;  %v2553_v6 = vor.u32 %v2780_v3, %v2552_v2  ;;  %v2445_v18 = vor.u32 %v2751_v4, %v2442_v5  ;;  %v708_v2 = vadd.f32 %v3127_v60, %v3048_v1  ;;  %v2773_v4 = vld [vmem:[#allocation2 + $0x3f4] sm:$0xf]  ;;  %v2530_v5 = vld [vmem:[#allocation2 + $0x3f8] sm:$0xf0] }
 0x2de   :  { %v1221_v9 = vpack.c.bf16 %v1219_v8, %v1218_v7  ;;  %v2789_v7 = vld [vmem:[#allocation2 + $0x474] sm:$0xf]  ;;  %v2594_v8 = vld [vmem:[#allocation2 + $0x478] sm:$0xf0]  ;;  %1723 = vmatpush.bf16.msra.mxu1 %v2553_v6  ;;  %1740 = vmatpush.bf16.msra.mxu2 %v2445_v18  ;;  %v2779_v6 = vld [vmem:[#allocation2 + $0x424] sm:$0xf]  ;;  %v2533_v18 = vor.u32 %v2773_v4, %v2530_v5 }
 0x2df   :  { %1684 = vmatpush.bf16.msrb.mxu3 %v2433_v15 }
 0x2e0   :  { %1305 = vmatmul.bf16.gmra.mxu2 %v1221_v9  ;;  %v2597_v9 = vor.u32 %v2789_v7, %v2594_v8  ;;  %v2554_v7 = vld [vmem:[#allocation2 + $0x428] sm:$0xf0]  ;;  %v2771_v8 = vld [vmem:[#allocation2 + $0x3e4] sm:$0xf] }
 0x2e1   :  { %v2557_v10 = vor.u32 %v2779_v6, %v2554_v7  ;;  %v2474_v7 = vld [vmem:[#allocation2 + $0x388] sm:$0xf0] }
 0x2e2   :  { %1775 = vmatpush.bf16.msrb.mxu0 %v2597_v9  ;;  %1724 = vmatpush.bf16.msra.mxu1 %v2545_v20  ;;  %v2522_v9 = vld [vmem:[#allocation2 + $0x3e8] sm:$0xf0] }
 0x2e3   :  { %1741 = vmatpush.bf16.msra.mxu2 %v2437_v21  ;;  %1685 = vmatpush.bf16.msrb.mxu3 %v2425_v32  ;;  %v2525_v15 = vor.u32 %v2771_v8, %v2522_v9  ;;  %v2538_v32 = vld [vmem:[#allocation2 + $0x408] sm:$0xf0] }
 0x2e6   :  { %1776 = vmatpush.bf16.msrb.mxu0 %v2589_v26  ;;  %1725 = vmatpush.bf16.msra.mxu1 %v2537_v38  ;;  %v2775_v26 = vld [vmem:[#allocation2 + $0x404] sm:$0xf] }
 0x2e7   :  { %1742 = vmatpush.bf16.msra.mxu2 %v2429_v39  ;;  %1686 = vmatpush.bf16.msrb.mxu3 %v2417_v56  ;;  %v2541_v38 = vor.u32 %v2775_v26, %v2538_v32  ;;  %v2765_v56 = vld [vmem:[#allocation2 + $0x3b4] sm:$0xf] }
 0x2ea   :  { %1777 = vmatpush.bf16.msrb.mxu0 %v2581_v49  ;;  %v710_v49 = vadd.f32 %v3142_v22, %v3068_v31 }
 0x2eb   :  { %1743 = vmatpush.bf16.msra.mxu2 %v2421_v53  ;;  %1687 = vmatpush.bf16.msrb.mxu3 %v2409_v61  ;;  %v2501_v53 = vor.u32 %v2765_v56, %v2498_v59  ;;  %v2761_v61 = vld [vmem:[#allocation2 + $0x394] sm:$0xf]  ;;  %v2791_v59 = vld [vmem:[#allocation5 + $0x80] sm:$0xff] }
 0x2ee   :  { %1778 = vmatpush.bf16.msrb.mxu0 %v2573_v57  ;;  %v2763_v57 = vld [vmem:[#allocation2 + $0x3a4] sm:$0xf] }
 0x2ef   :  { %1744 = vmatpush.bf16.msra.mxu2 %v2413_v0  ;;  %1756 = vmatpush.bf16.msra.mxu3 %v2533_v18  ;;  %v2493_v40 = vor.u32 %v2763_v57, %v2490_v48  ;;  %v2759_v18 = vld [vmem:[#allocation2 + $0x384] sm:$0xf] }
 0x2f0   :  { %v2477_v12 = vor.u32 %v2759_v18, %v2474_v7 }
 0x2f2   :  { %1779 = vmatpush.bf16.msrb.mxu0 %v2565_v35 }
 0x2f3   :  { %1757 = vmatpush.bf16.msra.mxu3 %v2525_v15 }
 0x2f6   :  { %1780 = vmatpush.bf16.msrb.mxu0 %v2557_v10 }
 0x2f7   :  { %1758 = vmatpush.bf16.msra.mxu3 %v2517_v30  ;;  %v2798_v30 = vld [vmem:[#allocation5 + $0xb8] sm:$0xff] }
 0x2f8   :  { %1886 = vmatpush.bf16.msrb.mxu1 %v2798_v30  ;;  %2810 = vmatpush.bf16.msrb.mxu2 %v2798_v30 }
 0x2fa   :  { %1781 = vmatpush.bf16.msrb.mxu0 %v2549_v17 }
 0x2fb   :  { %1759 = vmatpush.bf16.msra.mxu3 %v2509_v11  ;;  %v2795_v11 = vld [vmem:[#allocation5 + $0xa0] sm:$0xff] }
 0x2fc   :  { %1887 = vmatpush.bf16.msrb.mxu1 %v2797_v14  ;;  %2811 = vmatpush.bf16.msrb.mxu2 %v2797_v14 }
 0x2fe   :  { %1782 = vmatpush.bf16.msrb.mxu0 %v2541_v38 }
 0x2ff   :  { %1760 = vmatpush.bf16.msra.mxu3 %v2501_v53 }
 0x300   :  { %1888 = vmatpush.bf16.msrb.mxu1 %v2796_v34  ;;  %2812 = vmatpush.bf16.msrb.mxu2 %v2796_v34 }
 0x303   :  { %1761 = vmatpush.bf16.msra.mxu3 %v2493_v40 }
 0x304   :  { %1889 = vmatpush.bf16.msrb.mxu1 %v2795_v11  ;;  %2813 = vmatpush.bf16.msrb.mxu2 %v2795_v11 }
 0x353   :  { %v1301_v37 = vpop.f32.mrf.mxu2 }
 0x354   :  { %v3201_v58 = vadd.f32 %v3198_v44, %v1301_v37  ;;  %v2482_v37 = vld [vmem:[#allocation2 + $0x398] sm:$0xf0] }
 0x356   :  { %v3206_v3 = vadd.f32 %v3201_v58, %v708_v2  ;;  %v1315_v60 = vpack.c.bf16 %v3201_v58, %v3201_v58  ;;  %v1321_v27 = vrot.slane %v3201_v58, 4  ;;  %v2485_v2 = vor.u32 %v2761_v61, %v2482_v37 }
 0x358   :  { %v1364_v25 = vunpack.c.l.b16 %v1315_v60  ;;  %1762 = vmatpush.bf16.msra.mxu3 %v2485_v2 }
 0x35b   :  { %v1303_v1 = vpop.f32.mrf.mxu2 }
 0x35c   :  { %v1304_v16 = vadd.f32 %v3198_v44, %v1303_v1  ;;  %1763 = vmatpush.bf16.msra.mxu3 %v2477_v12 }
 0x35e   :  { %v1316_v20 = vpack.c.bf16 %v1304_v16, %v1304_v16  ;;  %v3213_v21 = vadd.f32 %v1304_v16, %v709_v19  ;;  %v1322_v36 = vrot.slane %v1304_v16, 4 }
 0x360   :  { %v1365_v29 = vunpack.c.l.b16 %v1316_v20  ;;  %v1328_v51 = vsel %vm1325_vm11, %v1321_v27, %v1322_v36 }
 0x361   :  { %v1335_v46 = vpack.c.bf16 %v1328_v51, %v1328_v51 }
 0x362   :  { %v3216_v39 = vpack.c.b16 %v1365_v29, %v1364_v25 }
 0x363   :  { %v1306_v42 = vpop.f32.mrf.mxu2  ;;  %v1353_v58 = vunpack.c.l.b16 %v1335_v46 }
 0x364   :  { %v1307_v43 = vadd.f32 %v3198_v44, %v1306_v42  ;;  %1707 = vmatmul.bf16.vlgmr.msra.gmra.mxu0 %v3216_v39  ;;  %v2793_v42 = vld [vmem:[#allocation5 + $0x90] sm:$0xff] }
 0x366   :  { %v1323_v55 = vrot.slane %v1307_v43, 4  ;;  %v3226_v41 = vadd.f32 %v1307_v43, %v710_v49  ;;  %v1317_v54 = vpack.c.bf16 %v1307_v43, %v1307_v43  ;;  %v2792_v49 = vld [vmem:[#allocation5 + $0x88] sm:$0xff] }
 0x368   :  { %v1327_v52 = vsel %vm1325_vm11, %v1322_v36, %v1323_v55  ;;  %v1366_v9 = vunpack.c.l.b16 %v1317_v54 }
 0x369   :  { %v1341_v31 = vsel %vm1339_vm12, %v1327_v52, 0.0  ;;  %v1332_v23 = vsel %vm1319_vm13, %v1327_v52, 0.0 }
 0x36a   :  { %v1345_v22 = vpack.c.bf16 %v1341_v31, %v1341_v31  ;;  %v1336_v26 = vpack.c.bf16 %v1332_v23, %v1332_v23 }
 0x36b   :  { %v1308_v62 = vpop.f32.mrf.mxu2 }
 0x36c   :  { %v1309_v45 = vadd.f32 %v3198_v44, %v1308_v62  ;;  %v1377_v0 = vunpack.c.l.b16 %v1345_v22  ;;  %v1354_v25 = vunpack.c.l.b16 %v1336_v26 }
 0x36e   :  { %v1324_v35 = vrot.slane %v1309_v45, 4  ;;  %v1380_v4 = vpack.c.b16 %v1377_v0, %v1353_v58  ;;  %v1318_v5 = vpack.c.bf16 %v1309_v45, %v1309_v45  ;;  %v3235_v6 = vadd.f32 %v1309_v45, %v711_v63 }
 0x370   :  { %v1329_v8 = vsel %vm1325_vm11, %v1324_v35, %v1321_v27  ;;  %1726 = vmatmul.bf16.vlgmr.msra.gmra.mxu1 %v1380_v4  ;;  %v1367_v50 = vunpack.c.l.b16 %v1318_v5  ;;  %v1326_v13 = vsel %vm1325_vm11, %v1323_v55, %v1324_v35  ;;  %v2405_v55 = vld [vmem:[%s3278_s4 + $0x4] sm:$0x3] }
 0x371   :  { %v1330_v47 = vsel %vm1319_vm13, %v1329_v8, 0.0  ;;  %v1343_v15 = vsel %vm1339_vm12, %v1329_v8, 0.0  ;;  %v1337_v16 = vpack.c.bf16 %v1326_v13, %v1326_v13  ;;  %v1437_v46 = vperm.slane %v2405_v55, 1 }
 0x372   :  { %v1369_v44 = vpack.c.b16 %v1367_v50, %v1366_v9  ;;  %v1334_v10 = vpack.c.bf16 %v1330_v47, %v1330_v47  ;;  %v1347_v17 = vpack.c.bf16 %v1343_v15, %v1343_v15  ;;  %v1436_v48 = vperm.slane %v2405_v55, 0 }
 0x373   :  { %v1355_v19 = vunpack.c.l.b16 %v1337_v16 }
 0x374   :  { %1712 = vmatmul.bf16.gmra.mxu0 %v1369_v44  ;;  %v1352_v1 = vunpack.c.l.b16 %v1334_v10  ;;  %v1379_v20 = vunpack.c.l.b16 %v1347_v17 }
 0x375   :  { %v1357_v28 = vpack.c.b16 %v1355_v19, %v1354_v25 }
 0x376   :  { %v1356_v60 = vpack.c.b16 %v1353_v58, %v1352_v1  ;;  %v1381_v24 = vpack.c.b16 %v1379_v20, %v1355_v19 }
 0x378   :  { %1688 = vmatmul.bf16.vlgmr.msrb.gmra.mxu3 %v1356_v60  ;;  %1745 = vmatmul.bf16.vlgmr.msra.gmra.mxu2 %v1356_v60 }
 0x380   :  { %1731 = vmatmul.bf16.gmra.mxu1 %v1381_v24 }
 0x384   :  { %1783 = vmatmul.bf16.vlgmr.msrb.gmra.mxu0 %v1380_v4 }
 0x388   :  { %1693 = vmatmul.bf16.gmra.mxu3 %v1357_v28  ;;  %1750 = vmatmul.bf16.gmra.mxu2 %v1357_v28 }
 0x394   :  { %1788 = vmatmul.bf16.gmra.mxu0 %v1381_v24 }
 0x398   :  { %1764 = vmatmul.bf16.vlgmr.msra.gmra.mxu3 %v3216_v39  ;;  %v2794_v39 = vld [vmem:[#allocation5 + $0x98] sm:$0xff] }
 0x399   :  { %1890 = vmatpush.bf16.msrb.mxu1 %v2794_v39  ;;  %2814 = vmatpush.bf16.msrb.mxu2 %v2794_v39 }
 0x39d   :  { %1891 = vmatpush.bf16.msrb.mxu1 %v2793_v42  ;;  %2815 = vmatpush.bf16.msrb.mxu2 %v2793_v42 }
 0x3a1   :  { %1892 = vmatpush.bf16.msrb.mxu1 %v2792_v49  ;;  %2816 = vmatpush.bf16.msrb.mxu2 %v2792_v49 }
 0x3a5   :  { %1893 = vmatpush.bf16.msrb.mxu1 %v2791_v59  ;;  %2817 = vmatpush.bf16.msrb.mxu2 %v2791_v59 }
 0x3a8   :  { %1769 = vmatmul.bf16.gmra.mxu3 %v1369_v44 }
 0x3e1   :  { %v1708_v29 = vpop.f32.mrf.mxu0 }
 0x3e9   :  { %v1710_v32 = vpop.f32.mrf.mxu0 }
 0x3ed   :  { %v1727_v53 = vpop.f32.mrf.mxu1 }
 0x3f1   :  { %v3249_v36 = vpop.f32.mrf.mxu0 }
 0x3f5   :  { %v1729_v58 = vpop.f32.mrf.mxu1 }
 0x3f9   :  { %v1715_v43 = vpop.f32.mrf.mxu0 }
 0x3fb   :  { %v1689_v33 = vpop.f32.mrf.mxu3  ;;  %v1746_v51 = vpop.f32.mrf.mxu2 }
 0x3fc   :  { %v1747_v57 = vadd.f32 %v1746_v51, %v1437_v46  ;;  %v1690_v37 = vadd.f32 %v1689_v33, %v1436_v48 }
 0x3fd   :  { %v1732_v12 = vpop.f32.mrf.mxu1 }
 0x3fe   :  { %v1709_v0 = vadd.f32 %v1708_v29, %v1690_v37 }
 0x400   :  { %v1728_v18 = vadd.f32 %v1727_v53, %v1709_v0 }
 0x401   :  { %v1784_v52 = vpop.f32.mrf.mxu0 }
 0x403   :  { %v1691_v38 = vpop.f32.mrf.mxu3  ;;  %v1748_v31 = vpop.f32.mrf.mxu2 }
 0x404   :  { %v1692_v62 = vadd.f32 %v1691_v38, %v1436_v48  ;;  %v1749_v45 = vadd.f32 %v1748_v31, %v1437_v46 }
 0x405   :  { %v1734_v11 = vpop.f32.mrf.mxu1 }
 0x406   :  { %v1711_v2 = vadd.f32 %v1710_v32, %v1692_v62 }
 0x408   :  { %v1730_v8 = vadd.f32 %v1729_v58, %v1711_v2 }
 0x409   :  { %v1786_v63 = vpop.f32.mrf.mxu0 }
 0x40b   :  { %v1694_v27 = vpop.f32.mrf.mxu3  ;;  %v1751_v4 = vpop.f32.mrf.mxu2 }
 0x40c   :  { %v1752_v9 = vadd.f32 %v1751_v4, %v1437_v46  ;;  %v1695_v1 = vadd.f32 %v1694_v27, %v1436_v48 }
 0x40e   :  { %v1714_v25 = vadd.f32 %v3249_v36, %v1695_v1 }
 0x410   :  { %v1733_v39 = vadd.f32 %v1732_v12, %v1714_v25 }
 0x411   :  { %v1789_v50 = vpop.f32.mrf.mxu0 }
 0x413   :  { %v1696_v56 = vpop.f32.mrf.mxu3  ;;  %v1753_v60 = vpop.f32.mrf.mxu2 }
 0x414   :  { %v1697_v19 = vadd.f32 %v1696_v56, %v1436_v48  ;;  %v1754_v26 = vadd.f32 %v1753_v60, %v1437_v46 }
 0x416   :  { %v1716_v32 = vadd.f32 %v1715_v43, %v1697_v19 }
 0x418   :  { %v1735_v42 = vadd.f32 %v1734_v11, %v1716_v32 }
 0x419   :  { %v1791_v14 = vpop.f32.mrf.mxu0 }
 0x41b   :  { %v1765_v22 = vpop.f32.mrf.mxu3 }
 0x41c   :  { %v1766_v40 = vadd.f32 %v1765_v22, %v1747_v57  ;;  %v2829_v57 = vld [vmem:[%s3280_s6 + $0x2] ss:$0 sm:$0xff]  ;;  %s2965_s6 = smov [#allocation7]  }
 0x41e   :  { %v1785_v61 = vadd.f32 %v1784_v52, %v1766_v40  ;;  %v2830_v40 = vld [vmem:[%s3281_s7] ss:$0 sm:$0xff]  ;;  %s1937_s7 = sshll.u32 %s2965_s6, 4  ;;  %s1938_s7 = int_to_ptr.vmem [resolvable:$true] %s1937_s7 }
 0x420   :  { %2864 = vtanh.f32 %v1785_v61 }
 0x423   :  { %v1767_v54 = vpop.f32.mrf.mxu3 }
 0x424   :  { %v1768_v35 = vadd.f32 %v1767_v54, %v1749_v45 }
 0x426   :  { %v1787_v5 = vadd.f32 %v1786_v63, %v1768_v35  ;;  %v2865_v7 = vpop.eup %2864  ;;  %v2831_v63 = vld [vmem:[%s3282_s8] ss:$0 sm:$0xff] }
 0x427   :  { %v1802_v47 = vadd.f32 1.0, %v2865_v7 }
 0x428   :  { %2866 = vtanh.f32 %v1787_v5 }
 0x429   :  { %2868 = vtanh.f32 %v1728_v18  ;;  %v1806_v16 = vmul.f32 0.5, %v1802_v47 }
 0x42a   :  { %2870 = vtanh.f32 %v1730_v8 }
 0x42b   :  { %v1770_v44 = vpop.f32.mrf.mxu3 }
 0x42c   :  { %v1771_v10 = vadd.f32 %v1770_v44, %v1752_v9 }
 0x42e   :  { %v2867_v13 = vpop.eup %2866  ;;  %v1790_v15 = vadd.f32 %v1789_v50, %v1771_v10 }
 0x42f   :  { %v1803_v17 = vadd.f32 1.0, %v2867_v13  ;;  %v2869_v20 = vpop.eup %2868 }
 0x430   :  { %v2871_v24 = vpop.eup %2870  ;;  %2872 = vtanh.f32 %v1790_v15  ;;  %v1810_v28 = vmul.f32 %v2869_v20, %v1806_v16 }
 0x431   :  { %v1807_v23 = vmul.f32 0.5, %v1803_v17 }
 0x433   :  { %v1811_v29 = vmul.f32 %v2871_v24, %v1807_v23  ;;  %v1772_v30 = vpop.f32.mrf.mxu3 }
 0x434   :  { %v1773_v33 = vadd.f32 %v1772_v30, %v1754_v26 }
 0x435   :  { %v1814_v34 = vpack.c.bf16 %v1811_v29, %v1810_v28 }
 0x436   :  { %v1792_v38 = vadd.f32 %v1791_v14, %v1773_v33  ;;  %v2873_v27 = vpop.eup %2872 }
 0x437   :  { %1894 = vmatmul.bf16.vlgmr.msrb.gmra.mxu1 %v1814_v34  ;;  %v1804_v49 = vadd.f32 1.0, %v2873_v27 }
 0x438   :  { %2874 = vtanh.f32 %v1792_v38 }
 0x439   :  { %2876 = vtanh.f32 %v1733_v39  ;;  %v1808_v55 = vmul.f32 0.5, %v1804_v49 }
 0x43a   :  { %2878 = vtanh.f32 %v1735_v42 }
 0x43e   :  { %v2875_v51 = vpop.eup %2874 }
 0x43f   :  { %v1805_v36 = vadd.f32 1.0, %v2875_v51  ;;  %v2877_v56 = vpop.eup %2876 }
 0x440   :  { %v2879_v46 = vpop.eup %2878  ;;  %v1812_v43 = vmul.f32 %v2877_v56, %v1808_v55 }
 0x441   :  { %v1809_v59 = vmul.f32 0.5, %v1805_v36 }
 0x443   :  { %v1813_v52 = vmul.f32 %v2879_v46, %v1809_v59 }
 0x445   :  { %v1815_v53 = vpack.c.bf16 %v1813_v52, %v1812_v43 }
 0x447   :  { %1899 = vmatmul.bf16.vlgmr.msrb.gmra.mxu2 %v1815_v53 }
 0x4b4   :  { %v1895_v48 = vpop.f32.mrf.mxu1 }
 0x4b5   :  { %v1896_v31 = vadd.f32 %v2829_v57, %v1895_v48 }
 0x4b7   :  { %v1905_v22 = vadd.f32 %v1896_v31, %v3206_v3 }
 0x4b9   :  { %v1913_v62 = vmul.f32 %v2830_v40, %v1905_v22 }
 0x4bb   :  { %v1921_v0 = vadd.f32 %v2831_v63, %v1913_v62 }
 0x4bc   :  { %v1897_v61 = vpop.f32.mrf.mxu1 }
 0x4bd   :  { %v1898_v37 = vadd.f32 %v2829_v57, %v1897_v61 }
 0x4bf   :  { %v1906_v45 = vadd.f32 %v1898_v37, %v3213_v21 }
 0x4c1   :  { %v1914_v58 = vmul.f32 %v2830_v40, %v1906_v45 }
 0x4c3   :  { %v1922_v54 = vadd.f32 %v2831_v63, %v1914_v58 }
 0x4c5   :  { %v2802_v2 = vpack.c.bf16 %v1922_v54, %v1921_v0 }
 0x4c7   :  { %2803 = vst [vmem:[#allocation7] sm:$0xff] %v2802_v2  }
 0x4ca   :  { %v1900_v35 = vpop.f32.mrf.mxu2 }
 0x4cb   :  { %v1901_v3 = vadd.f32 %v2829_v57, %v1900_v35 }
 0x4cd   :  { %v1907_v4 = vadd.f32 %v1901_v3, %v3226_v41 }
 0x4cf   :  { %v1915_v7 = vmul.f32 %v2830_v40, %v1907_v4 }
 0x4d1   :  { %v1923_v21 = vadd.f32 %v2831_v63, %v1915_v7 }
 0x4d2   :  { %v1902_v5 = vpop.f32.mrf.mxu2 }
 0x4d3   :  { %v1903_v18 = vadd.f32 %v2829_v57, %v1902_v5 }
 0x4d5   :  { %v1908_v8 = vadd.f32 %v1903_v18, %v3235_v6 }
 0x4d7   :  { %v1916_v9 = vmul.f32 %v2830_v40, %v1908_v8 }
 0x4d9   :  { %v1924_v50 = vadd.f32 %v2831_v63, %v1916_v9 }
 0x4db   :  { %v2807_v47 = vpack.c.bf16 %v1924_v50, %v1923_v21 }
 0x4dd   :  { %2809 = vst [vmem:[#allocation7 + $0x8] sm:$0xff] %v2807_v47  }
 0x4de   :  { %1945 = dma.vmem_to_hbm [thread:$0]  %s1938_s7, 256, %s1940_s25, [#allocation4], %s2962_s21, %s2962_s21, %s2963_s22  }
 0x4df   :  { %2956 = dma.done.wait [#allocation4], 256  }
 0x4e0   :  { %2957 = vsyncadd [#allocation4], 4294967040 }
 0x4e1   :  { %1950 = vsyncpa [#allocation3], 1 }
 0x4e2   :  { %1951 = vsyncpa [#allocation6], 1 }
 0x4e3   :  { %1952 = vsyncpa [#allocation4], 1 }

</bundles_post_ra>
